<compile_context>
chip_gen: v6e
topology: v6e:2x2x1
jax: 0.10.0
libtpu: 0.0.40
codegen_flags: <defaults>
</compile_context>

<pallas_src>
import functools

import jax
import jax.numpy as jnp
from jax.experimental import pallas as pl
from jax.experimental.pallas import tpu as pltpu


def _round_up(x, m):
    return ((x + m - 1) // m) * m


def _dualnet_kernel(H, W, B_TILE,
                    h_ref, fg_ref, masks_ref,
                    w1_ref, b1_ref, w2_ref, b2_ref, w3_ref, b3_ref,
                    a1_ref, a2_ref,
                    out_ref,
                    xbuf_ref):
    """One batch tile (B_TILE images folded side-by-side on the lane axis).

    h_ref    : (B_TILE, n_dual, H*W) f32   residual / first n_dual channels
    fg_ref   : (B_TILE, 2, H*W)      f32   [Op_f ; g] channels
    masks_ref: (9, L) f32, L=B_TILE*H*W    per-tap border-validity masks
    wK_ref   : (9, cout, cin) bf16         tap-major conv weights
    bK_ref   : (cout, 1) f32               bias
    aK_ref   : (1,) f32 in SMEM            PReLU slope
    out_ref  : (B_TILE, n_dual, H*W) f32
    xbuf_ref : VMEM (cpad, L) f32          channel-padded, batch-folded input
    """
    HW = H * W
    L = B_TILE * HW
    n_dual = h_ref.shape[1]
    cpad = xbuf_ref.shape[0]

    # ---- assemble the channel-stacked, batch-folded layer-1 input ----
    for b in range(B_TILE):
        xbuf_ref[0:n_dual, b * HW:(b + 1) * HW] = h_ref[b]
        xbuf_ref[n_dual:n_dual + 2, b * HW:(b + 1) * HW] = fg_ref[b]
    if cpad > n_dual + 2:
        # Keep zeroing the pad rows: the padded w1 columns are zero, but stale
        # VMEM could hold NaNs and 0*NaN would poison the layer-1 dot.
        xbuf_ref[n_dual + 2:, :] = jnp.zeros((cpad - n_dual - 2, L), jnp.float32)
    x = xbuf_ref[...]                                        # (cpad, L) f32

    # ---- tap offsets and (hoisted, precomputed) border masks ----
    offs = [dy * W + dx for dy in (-1, 0, 1) for dx in (-1, 0, 1)]
    masks = [masks_ref[k:k + 1, :] for k in range(9)]        # each (1, L) f32

    def conv3x3(xv, w_ref, b_ref):
        # xv: (cin, L) f32.  Nine accumulating MXU dots (no im2col concat):
        #   acc += w_tap(cout,cin)[bf16] @ tap(cin,L)[bf16], f32 accumulation.
        acc = None
        for k, off in enumerate(offs):
            if off == 0:
                tap = xv                                     # centre tap, always valid
            else:
                # Lane roll across the folded batch axis: any lane that crosses
                # an image boundary is exactly an out-of-image tap -> masked.
                tap = pltpu.roll(xv, shift=(-off) % L, axis=1) * masks[k]
            d = jnp.dot(w_ref[k], tap.astype(jnp.bfloat16),
                        preferred_element_type=jnp.float32)
            acc = d if acc is None else acc + d
        return acc + b_ref[...]                              # (cout, L) f32

    def prelu(v, a):
        return jnp.where(v >= 0.0, v, a * v)

    # ---- three conv layers ----
    y = prelu(conv3x3(x, w1_ref, b1_ref), a1_ref[0])         # (32, L)
    y = prelu(conv3x3(y, w2_ref, b2_ref), a2_ref[0])         # (32, L)
    y = conv3x3(y, w3_ref, b3_ref)                           # (n_dual, L)

    # ---- residual add, per-image lane-dense stores ----
    for b in range(B_TILE):
        out_ref[b] = h_ref[b] + y[:, b * HW:(b + 1) * HW]


def init_params(key, n_dual):
    """Deterministic parameter init mimicking PyTorch default conv init."""
    n_ch = n_dual + 2

    def conv_init(k, cin, cout):
        kw, kb = jax.random.split(k)
        bound = 1.0 / jnp.sqrt(jnp.float32(cin * 9))
        w = jax.random.uniform(kw, (3, 3, cin, cout), jnp.float32, -bound, bound)
        b = jax.random.uniform(kb, (1, cout), jnp.float32, -bound, bound)
        return w, b

    k1, k2, k3 = jax.random.split(key, 3)
    w1, b1 = conv_init(k1, n_ch, 32)
    w2, b2 = conv_init(k2, 32, 32)
    w3, b3 = conv_init(k3, 32, n_dual)
    return {
        "w1": w1, "b1": b1,
        "w2": w2, "b2": b2,
        "w3": w3, "b3": b3,
        "a1": jnp.full((1,), 0.25, jnp.float32),   # nn.PReLU() default slope
        "a2": jnp.full((1,), 0.25, jnp.float32),
    }


def _tapify_weight(w_hwio, cin_pad=None):
    """(3,3,cin,cout) HWIO -> (9, cout, cin[_pad]) bf16, tap index k = ky*3+kx,
    matching the in-kernel (dy, dx) loop order."""
    kh, kw, cin, cout = w_hwio.shape
    if cin_pad is not None and cin_pad != cin:
        w_hwio = jnp.pad(w_hwio, ((0, 0), (0, 0), (0, cin_pad - cin), (0, 0)))
        cin = cin_pad
    w = jnp.transpose(w_hwio, (0, 1, 3, 2)).reshape(kh * kw, cout, cin)
    return w.astype(jnp.bfloat16)


def _make_border_masks(H, W, b_tile):
    """(9, b_tile*H*W) f32 per-tap border-validity masks, tiled per image."""
    HW = H * W
    yy = (jnp.arange(HW, dtype=jnp.int32) // W).reshape(1, HW)
    xx = (jnp.arange(HW, dtype=jnp.int32) % W).reshape(1, HW)
    rows = []
    for dy in (-1, 0, 1):
        for dx in (-1, 0, 1):
            valid = ((yy + dy >= 0) & (yy + dy < H) &
                     (xx + dx >= 0) & (xx + dx < W))
            rows.append(valid.astype(jnp.float32))
    m = jnp.concatenate(rows, axis=0)            # (9, HW)
    return jnp.tile(m, (1, b_tile))              # (9, b_tile*HW)


# Lane budget per grid step; keeps the per-step VMEM live set well under the
# 32 MiB scoped default on all of v5e/v6e/v7x while giving >=2048 lanes when
# the batch allows it.
_MAX_LANES_PER_STEP = 8192


@jax.jit
def dualnet_forward(h, Op_f, g, params):
    """h, Op_f, g are NCHW float32 (PyTorch convention); returns NCHW."""
    N, n_dual, H, W = h.shape
    HW = H * W
    cpad = _round_up(n_dual + 2, 8)   # aligned sublane stack for layer-1 input

    # Batch tile: fold as many images onto the lane axis as the budget allows,
    # requiring it to divide N so every grid step is full.
    bt = max(1, min(N, _MAX_LANES_PER_STEP // HW))
    while N % bt:
        bt -= 1
    L = bt * HW

    # Free reshapes + one tiny channel concat (Op_f | g) in the wrapper.
    h3 = h.reshape(N, n_dual, HW)
    fg3 = jnp.concatenate([Op_f, g], axis=1).reshape(N, 2, HW)

    # Hoisted per-tap border masks (constant block index -> DMA'd once).
    masks = _make_border_masks(H, W, bt)                     # (9, L) f32

    # Weights: tap-major (9, cout, cin) bf16; layer-1 cin zero-padded to cpad.
    w1t = _tapify_weight(params["w1"], cpad)                 # (9, 32, cpad)
    w2t = _tapify_weight(params["w2"])                       # (9, 32, 32)
    w3t = _tapify_weight(params["w3"])                       # (9, n_dual, 32)
    b1 = params["b1"].reshape(32, 1)
    b2 = params["b2"].reshape(32, 1)
    b3 = params["b3"].reshape(n_dual, 1)

    kernel = functools.partial(_dualnet_kernel, H, W, bt)

    out3 = pl.pallas_call(
        kernel,
        out_shape=jax.ShapeDtypeStruct((N, n_dual, HW), jnp.float32),
        grid_spec=pltpu.PrefetchScalarGridSpec(
            num_scalar_prefetch=0,
            grid=(N // bt,),
            in_specs=[
                pl.BlockSpec((bt, n_dual, HW), lambda i: (i, 0, 0)),
                pl.BlockSpec((bt, 2, HW), lambda i: (i, 0, 0)),
                pl.BlockSpec((9, L), lambda i: (0, 0)),            # masks
                pl.BlockSpec((9, 32, cpad), lambda i: (0, 0, 0)),  # w1
                pl.BlockSpec((32, 1), lambda i: (0, 0)),           # b1
                pl.BlockSpec((9, 32, 32), lambda i: (0, 0, 0)),    # w2
                pl.BlockSpec((32, 1), lambda i: (0, 0)),           # b2
                pl.BlockSpec((9, n_dual, 32), lambda i: (0, 0, 0)),  # w3
                pl.BlockSpec((n_dual, 1), lambda i: (0, 0)),       # b3
                pl.BlockSpec(memory_space=pltpu.SMEM),             # a1
                pl.BlockSpec(memory_space=pltpu.SMEM),             # a2
            ],
            out_specs=pl.BlockSpec((bt, n_dual, HW), lambda i: (i, 0, 0)),
            scratch_shapes=[pltpu.VMEM((cpad, L), jnp.float32)],
        ),
        compiler_params=pltpu.CompilerParams(
            dimension_semantics=("parallel",)),   # batch-tile axis -> both v7x TCs
    )(h3, fg3, masks, w1t, b1, w2t, b2, w3t, b3, params["a1"], params["a2"])

    return out3.reshape(N, n_dual, H, W)          # free reshape back to NCHW


def dualnet_reference(h, Op_f, g, params):
    """Pure-JAX reference (lax conv, f32 everywhere) for correctness checking."""
    x = jnp.concatenate([h, Op_f, g], axis=1)
    x = jnp.transpose(x, (0, 2, 3, 1))  # NHWC

    def conv(v, w, b):
        y = jax.lax.conv_general_dilated(
            v, w, window_strides=(1, 1), padding="SAME",
            dimension_numbers=("NHWC", "HWIO", "NHWC"))
        return y + b[0]

    def prelu(v, a):
        return jnp.maximum(v, 0.0) + a[0] * jnp.minimum(v, 0.0)

    y = prelu(conv(x, params["w1"], params["b1"]), params["a1"])
    y = prelu(conv(y, params["w2"], params["b2"]), params["a2"])
    y = conv(y, params["w3"], params["b3"])
    y = jnp.transpose(y, (0, 3, 1, 2))  # NCHW
    return h + y


if __name__ == "__main__":
    n_dual = 4
    N, H, W = 2, 16, 16

    key = jax.random.PRNGKey(0)
    kp, kh, kf, kg = jax.random.split(key, 4)

    params = init_params(kp, n_dual)
    h = jax.random.normal(kh, (N, n_dual, H, W), jnp.float32)
    Op_f = jax.random.normal(kf, (N, 1, H, W), jnp.float32)
    g = jax.random.normal(kg, (N, 1, H, W), jnp.float32)

    out = dualnet_forward(h, Op_f, g, params)
    out = jax.block_until_ready(out)

    ref = dualnet_reference(h, Op_f, g, params)
    assert out.shape == (N, n_dual, H, W)
    max_err = jnp.max(jnp.abs(out - ref))
    # Tolerance accounts for the bf16 MXU inputs (f32 accumulation); expected
    # max abs error is ~1e-2 for O(1) activations through three conv layers.
    assert jnp.allclose(out, ref, atol=3e-2, rtol=3e-2), (
        f"max abs err {max_err}")

    print("KERNEL_OK")
</pallas_src>

<mosaic_0001>
module attributes {stable_mosaic.version = 11 : i64} {
  func.func @_dualnet_kernel(%arg0: i32, %arg1: memref<2x4x256xf32, #tpu.memory_space<vmem>>, %arg2: memref<2x2x256xf32, #tpu.memory_space<vmem>>, %arg3: memref<9x512xf32, #tpu.memory_space<vmem>>, %arg4: memref<9x32x8xbf16, #tpu.memory_space<vmem>>, %arg5: memref<32x1xf32, #tpu.memory_space<vmem>>, %arg6: memref<9x32x32xbf16, #tpu.memory_space<vmem>>, %arg7: memref<32x1xf32, #tpu.memory_space<vmem>>, %arg8: memref<9x4x32xbf16, #tpu.memory_space<vmem>>, %arg9: memref<4x1xf32, #tpu.memory_space<vmem>>, %arg10: memref<1xf32, #tpu.memory_space<smem>>, %arg11: memref<1xf32, #tpu.memory_space<smem>>, %arg12: memref<2x4x256xf32, #tpu.memory_space<vmem>>, %arg13: memref<8x512xf32, #tpu.memory_space<vmem>>) attributes {dimension_semantics = [#tpu.dimension_semantics<parallel>], iteration_bounds = array<i64: 1>, scalar_prefetch = 0 : i64, scratch_operands = 1 : i64, tpu.core_type = #tpu.core_type<tc>, window_params = [{transform_indices = @transform_0, window_bounds = array<i64: 2, 4, 256>}, {transform_indices = @transform_1, window_bounds = array<i64: 2, 2, 256>}, {pipeline_mode = #tpu.pipeline_mode<synchronous>, transform_indices = @transform_2, window_bounds = array<i64: 9, 512>}, {pipeline_mode = #tpu.pipeline_mode<synchronous>, transform_indices = @transform_3, window_bounds = array<i64: 9, 32, 8>}, {pipeline_mode = #tpu.pipeline_mode<synchronous>, transform_indices = @transform_4, window_bounds = array<i64: 32, 1>}, {pipeline_mode = #tpu.pipeline_mode<synchronous>, transform_indices = @transform_5, window_bounds = array<i64: 9, 32, 32>}, {pipeline_mode = #tpu.pipeline_mode<synchronous>, transform_indices = @transform_6, window_bounds = array<i64: 32, 1>}, {pipeline_mode = #tpu.pipeline_mode<synchronous>, transform_indices = @transform_7, window_bounds = array<i64: 9, 4, 32>}, {pipeline_mode = #tpu.pipeline_mode<synchronous>, transform_indices = @transform_8, window_bounds = array<i64: 4, 1>}, {transform_indices = @transform_9, window_bounds = array<i64: 1>}, {transform_indices = @transform_10, window_bounds = array<i64: 1>}, {transform_indices = @transform_11, window_bounds = array<i64: 2, 4, 256>}]} {
    %c0 = arith.constant 0 : index
    %c0_0 = arith.constant 0 : index
    %c0_1 = arith.constant 0 : index
    %0 = vector.load %arg1[%c0, %c0_0, %c0_1] : memref<2x4x256xf32, #tpu.memory_space<vmem>>, vector<1x4x256xf32>
    %1 = vector.shape_cast %0 : vector<1x4x256xf32> to vector<4x256xf32>
    %c0_2 = arith.constant 0 : index
    %c0_3 = arith.constant 0 : index
    %2 = vector.load %arg13[%c0_2, %c0_3] : memref<8x512xf32, #tpu.memory_space<vmem>>, vector<4x256xf32>
    tpu.vector_store %arg13[%c0_2, %c0_3], %1 {strides = array<i32>} : memref<8x512xf32, #tpu.memory_space<vmem>>, vector<4x256xf32>,
    %c0_4 = arith.constant 0 : index
    %c0_5 = arith.constant 0 : index
    %c0_6 = arith.constant 0 : index
    %3 = vector.load %arg2[%c0_4, %c0_5, %c0_6] : memref<2x2x256xf32, #tpu.memory_space<vmem>>, vector<1x2x256xf32>
    %4 = vector.shape_cast %3 : vector<1x2x256xf32> to vector<2x256xf32>
    %c4 = arith.constant 4 : index
    %c0_7 = arith.constant 0 : index
    %5 = vector.load %arg13[%c4, %c0_7] : memref<8x512xf32, #tpu.memory_space<vmem>>, vector<2x256xf32>
    tpu.vector_store %arg13[%c4, %c0_7], %4 {strides = array<i32>} : memref<8x512xf32, #tpu.memory_space<vmem>>, vector<2x256xf32>,
    %c1 = arith.constant 1 : index
    %c0_8 = arith.constant 0 : index
    %c0_9 = arith.constant 0 : index
    %6 = vector.load %arg1[%c1, %c0_8, %c0_9] : memref<2x4x256xf32, #tpu.memory_space<vmem>>, vector<1x4x256xf32>
    %7 = vector.shape_cast %6 : vector<1x4x256xf32> to vector<4x256xf32>
    %c0_10 = arith.constant 0 : index
    %c256 = arith.constant 256 : index
    %8 = vector.load %arg13[%c0_10, %c256] : memref<8x512xf32, #tpu.memory_space<vmem>>, vector<4x256xf32>
    tpu.vector_store %arg13[%c0_10, %c256], %7 {strides = array<i32>} : memref<8x512xf32, #tpu.memory_space<vmem>>, vector<4x256xf32>,
    %c1_11 = arith.constant 1 : index
    %c0_12 = arith.constant 0 : index
    %c0_13 = arith.constant 0 : index
    %9 = vector.load %arg2[%c1_11, %c0_12, %c0_13] : memref<2x2x256xf32, #tpu.memory_space<vmem>>, vector<1x2x256xf32>
    %10 = vector.shape_cast %9 : vector<1x2x256xf32> to vector<2x256xf32>
    %c4_14 = arith.constant 4 : index
    %c256_15 = arith.constant 256 : index
    %11 = vector.load %arg13[%c4_14, %c256_15] : memref<8x512xf32, #tpu.memory_space<vmem>>, vector<2x256xf32>
    tpu.vector_store %arg13[%c4_14, %c256_15], %10 {strides = array<i32>} : memref<8x512xf32, #tpu.memory_space<vmem>>, vector<2x256xf32>,
    %cst = arith.constant 0.000000e+00 : f32
    %12 = vector.broadcast %cst : f32 to vector<2x512xf32>
    %c6 = arith.constant 6 : index
    %c0_16 = arith.constant 0 : index
    %13 = vector.load %arg13[%c6, %c0_16] : memref<8x512xf32, #tpu.memory_space<vmem>>, vector<2x512xf32>
    tpu.vector_store %arg13[%c6, %c0_16], %12 {strides = array<i32>} : memref<8x512xf32, #tpu.memory_space<vmem>>, vector<2x512xf32>,
    %c0_17 = arith.constant 0 : index
    %c0_18 = arith.constant 0 : index
    %14 = vector.load %arg13[%c0_17, %c0_18] : memref<8x512xf32, #tpu.memory_space<vmem>>, vector<8x512xf32>
    %c0_19 = arith.constant 0 : index
    %c0_20 = arith.constant 0 : index
    %15 = vector.load %arg3[%c0_19, %c0_20] : memref<9x512xf32, #tpu.memory_space<vmem>>, vector<1x512xf32>
    %c1_21 = arith.constant 1 : index
    %c0_22 = arith.constant 0 : index
    %16 = vector.load %arg3[%c1_21, %c0_22] : memref<9x512xf32, #tpu.memory_space<vmem>>, vector<1x512xf32>
    %c2 = arith.constant 2 : index
    %c0_23 = arith.constant 0 : index
    %17 = vector.load %arg3[%c2, %c0_23] : memref<9x512xf32, #tpu.memory_space<vmem>>, vector<1x512xf32>
    %c3 = arith.constant 3 : index
    %c0_24 = arith.constant 0 : index
    %18 = vector.load %arg3[%c3, %c0_24] : memref<9x512xf32, #tpu.memory_space<vmem>>, vector<1x512xf32>
    %c5 = arith.constant 5 : index
    %c0_25 = arith.constant 0 : index
    %19 = vector.load %arg3[%c5, %c0_25] : memref<9x512xf32, #tpu.memory_space<vmem>>, vector<1x512xf32>
    %c6_26 = arith.constant 6 : index
    %c0_27 = arith.constant 0 : index
    %20 = vector.load %arg3[%c6_26, %c0_27] : memref<9x512xf32, #tpu.memory_space<vmem>>, vector<1x512xf32>
    %c7 = arith.constant 7 : index
    %c0_28 = arith.constant 0 : index
    %21 = vector.load %arg3[%c7, %c0_28] : memref<9x512xf32, #tpu.memory_space<vmem>>, vector<1x512xf32>
    %c8 = arith.constant 8 : index
    %c0_29 = arith.constant 0 : index
    %22 = vector.load %arg3[%c8, %c0_29] : memref<9x512xf32, #tpu.memory_space<vmem>>, vector<1x512xf32>
    %c17_i32 = arith.constant 17 : i32
    %23 = tpu.dynamic_rotate %14 by %c17_i32 dim 1 : vector<8x512xf32>, i32 -> vector<8x512xf32>
    %24 = vector.broadcast %15 : vector<1x512xf32> to vector<8x512xf32>
    %25 = arith.mulf %23, %24 : vector<8x512xf32>
    %c0_30 = arith.constant 0 : index
    %c0_31 = arith.constant 0 : index
    %c0_32 = arith.constant 0 : index
    %26 = vector.load %arg4[%c0_30, %c0_31, %c0_32] : memref<9x32x8xbf16, #tpu.memory_space<vmem>>, vector<1x32x8xbf16>
    %27 = vector.shape_cast %26 : vector<1x32x8xbf16> to vector<32x8xbf16>
    %28 = arith.truncf %25 : vector<8x512xf32> to vector<8x512xbf16>
    %cst_33 = arith.constant dense<0.000000e+00> : vector<32x512xf32>
    %29 = tpu.matmul %27, %28, %cst_33 {dimension_numbers = #tpu.dot_dimension_numbers<[1], [0], [0], [1], [0, 0, 1, 1], [], []>} : vector<32x8xbf16>, vector<8x512xbf16>, vector<32x512xf32> -> vector<32x512xf32>
    %c16_i32 = arith.constant 16 : i32
    %30 = tpu.dynamic_rotate %14 by %c16_i32 dim 1 : vector<8x512xf32>, i32 -> vector<8x512xf32>
    %31 = vector.broadcast %16 : vector<1x512xf32> to vector<8x512xf32>
    %32 = arith.mulf %30, %31 : vector<8x512xf32>
    %c1_34 = arith.constant 1 : index
    %c0_35 = arith.constant 0 : index
    %c0_36 = arith.constant 0 : index
    %33 = vector.load %arg4[%c1_34, %c0_35, %c0_36] : memref<9x32x8xbf16, #tpu.memory_space<vmem>>, vector<1x32x8xbf16>
    %34 = vector.shape_cast %33 : vector<1x32x8xbf16> to vector<32x8xbf16>
    %35 = arith.truncf %32 : vector<8x512xf32> to vector<8x512xbf16>
    %cst_37 = arith.constant dense<0.000000e+00> : vector<32x512xf32>
    %36 = tpu.matmul %34, %35, %cst_37 {dimension_numbers = #tpu.dot_dimension_numbers<[1], [0], [0], [1], [0, 0, 1, 1], [], []>} : vector<32x8xbf16>, vector<8x512xbf16>, vector<32x512xf32> -> vector<32x512xf32>
    %37 = arith.addf %29, %36 : vector<32x512xf32>
    %c15_i32 = arith.constant 15 : i32
    %38 = tpu.dynamic_rotate %14 by %c15_i32 dim 1 : vector<8x512xf32>, i32 -> vector<8x512xf32>
    %39 = vector.broadcast %17 : vector<1x512xf32> to vector<8x512xf32>
    %40 = arith.mulf %38, %39 : vector<8x512xf32>
    %c2_38 = arith.constant 2 : index
    %c0_39 = arith.constant 0 : index
    %c0_40 = arith.constant 0 : index
    %41 = vector.load %arg4[%c2_38, %c0_39, %c0_40] : memref<9x32x8xbf16, #tpu.memory_space<vmem>>, vector<1x32x8xbf16>
    %42 = vector.shape_cast %41 : vector<1x32x8xbf16> to vector<32x8xbf16>
    %43 = arith.truncf %40 : vector<8x512xf32> to vector<8x512xbf16>
    %cst_41 = arith.constant dense<0.000000e+00> : vector<32x512xf32>
    %44 = tpu.matmul %42, %43, %cst_41 {dimension_numbers = #tpu.dot_dimension_numbers<[1], [0], [0], [1], [0, 0, 1, 1], [], []>} : vector<32x8xbf16>, vector<8x512xbf16>, vector<32x512xf32> -> vector<32x512xf32>
    %45 = arith.addf %37, %44 : vector<32x512xf32>
    %c1_i32 = arith.constant 1 : i32
    %46 = tpu.dynamic_rotate %14 by %c1_i32 dim 1 : vector<8x512xf32>, i32 -> vector<8x512xf32>
    %47 = vector.broadcast %18 : vector<1x512xf32> to vector<8x512xf32>
    %48 = arith.mulf %46, %47 : vector<8x512xf32>
    %c3_42 = arith.constant 3 : index
    %c0_43 = arith.constant 0 : index
    %c0_44 = arith.constant 0 : index
    %49 = vector.load %arg4[%c3_42, %c0_43, %c0_44] : memref<9x32x8xbf16, #tpu.memory_space<vmem>>, vector<1x32x8xbf16>
    %50 = vector.shape_cast %49 : vector<1x32x8xbf16> to vector<32x8xbf16>
    %51 = arith.truncf %48 : vector<8x512xf32> to vector<8x512xbf16>
    %cst_45 = arith.constant dense<0.000000e+00> : vector<32x512xf32>
    %52 = tpu.matmul %50, %51, %cst_45 {dimension_numbers = #tpu.dot_dimension_numbers<[1], [0], [0], [1], [0, 0, 1, 1], [], []>} : vector<32x8xbf16>, vector<8x512xbf16>, vector<32x512xf32> -> vector<32x512xf32>
    %53 = arith.addf %45, %52 : vector<32x512xf32>
    %c4_46 = arith.constant 4 : index
    %c0_47 = arith.constant 0 : index
    %c0_48 = arith.constant 0 : index
    %54 = vector.load %arg4[%c4_46, %c0_47, %c0_48] : memref<9x32x8xbf16, #tpu.memory_space<vmem>>, vector<1x32x8xbf16>
    %55 = vector.shape_cast %54 : vector<1x32x8xbf16> to vector<32x8xbf16>
    %56 = arith.truncf %14 : vector<8x512xf32> to vector<8x512xbf16>
    %cst_49 = arith.constant dense<0.000000e+00> : vector<32x512xf32>
    %57 = tpu.matmul %55, %56, %cst_49 {dimension_numbers = #tpu.dot_dimension_numbers<[1], [0], [0], [1], [0, 0, 1, 1], [], []>} : vector<32x8xbf16>, vector<8x512xbf16>, vector<32x512xf32> -> vector<32x512xf32>
    %58 = arith.addf %53, %57 : vector<32x512xf32>
    %c511_i32 = arith.constant 511 : i32
    %59 = tpu.dynamic_rotate %14 by %c511_i32 dim 1 : vector<8x512xf32>, i32 -> vector<8x512xf32>
    %60 = vector.broadcast %19 : vector<1x512xf32> to vector<8x512xf32>
    %61 = arith.mulf %59, %60 : vector<8x512xf32>
    %c5_50 = arith.constant 5 : index
    %c0_51 = arith.constant 0 : index
    %c0_52 = arith.constant 0 : index
    %62 = vector.load %arg4[%c5_50, %c0_51, %c0_52] : memref<9x32x8xbf16, #tpu.memory_space<vmem>>, vector<1x32x8xbf16>
    %63 = vector.shape_cast %62 : vector<1x32x8xbf16> to vector<32x8xbf16>
    %64 = arith.truncf %61 : vector<8x512xf32> to vector<8x512xbf16>
    %cst_53 = arith.constant dense<0.000000e+00> : vector<32x512xf32>
    %65 = tpu.matmul %63, %64, %cst_53 {dimension_numbers = #tpu.dot_dimension_numbers<[1], [0], [0], [1], [0, 0, 1, 1], [], []>} : vector<32x8xbf16>, vector<8x512xbf16>, vector<32x512xf32> -> vector<32x512xf32>
    %66 = arith.addf %58, %65 : vector<32x512xf32>
    %c497_i32 = arith.constant 497 : i32
    %67 = tpu.dynamic_rotate %14 by %c497_i32 dim 1 : vector<8x512xf32>, i32 -> vector<8x512xf32>
    %68 = vector.broadcast %20 : vector<1x512xf32> to vector<8x512xf32>
    %69 = arith.mulf %67, %68 : vector<8x512xf32>
    %c6_54 = arith.constant 6 : index
    %c0_55 = arith.constant 0 : index
    %c0_56 = arith.constant 0 : index
    %70 = vector.load %arg4[%c6_54, %c0_55, %c0_56] : memref<9x32x8xbf16, #tpu.memory_space<vmem>>, vector<1x32x8xbf16>
    %71 = vector.shape_cast %70 : vector<1x32x8xbf16> to vector<32x8xbf16>
    %72 = arith.truncf %69 : vector<8x512xf32> to vector<8x512xbf16>
    %cst_57 = arith.constant dense<0.000000e+00> : vector<32x512xf32>
    %73 = tpu.matmul %71, %72, %cst_57 {dimension_numbers = #tpu.dot_dimension_numbers<[1], [0], [0], [1], [0, 0, 1, 1], [], []>} : vector<32x8xbf16>, vector<8x512xbf16>, vector<32x512xf32> -> vector<32x512xf32>
    %74 = arith.addf %66, %73 : vector<32x512xf32>
    %c496_i32 = arith.constant 496 : i32
    %75 = tpu.dynamic_rotate %14 by %c496_i32 dim 1 : vector<8x512xf32>, i32 -> vector<8x512xf32>
    %76 = vector.broadcast %21 : vector<1x512xf32> to vector<8x512xf32>
    %77 = arith.mulf %75, %76 : vector<8x512xf32>
    %c7_58 = arith.constant 7 : index
    %c0_59 = arith.constant 0 : index
    %c0_60 = arith.constant 0 : index
    %78 = vector.load %arg4[%c7_58, %c0_59, %c0_60] : memref<9x32x8xbf16, #tpu.memory_space<vmem>>, vector<1x32x8xbf16>
    %79 = vector.shape_cast %78 : vector<1x32x8xbf16> to vector<32x8xbf16>
    %80 = arith.truncf %77 : vector<8x512xf32> to vector<8x512xbf16>
    %cst_61 = arith.constant dense<0.000000e+00> : vector<32x512xf32>
    %81 = tpu.matmul %79, %80, %cst_61 {dimension_numbers = #tpu.dot_dimension_numbers<[1], [0], [0], [1], [0, 0, 1, 1], [], []>} : vector<32x8xbf16>, vector<8x512xbf16>, vector<32x512xf32> -> vector<32x512xf32>
    %82 = arith.addf %74, %81 : vector<32x512xf32>
    %c495_i32 = arith.constant 495 : i32
    %83 = tpu.dynamic_rotate %14 by %c495_i32 dim 1 : vector<8x512xf32>, i32 -> vector<8x512xf32>
    %84 = vector.broadcast %22 : vector<1x512xf32> to vector<8x512xf32>
    %85 = arith.mulf %83, %84 : vector<8x512xf32>
    %c8_62 = arith.constant 8 : index
    %c0_63 = arith.constant 0 : index
    %c0_64 = arith.constant 0 : index
    %86 = vector.load %arg4[%c8_62, %c0_63, %c0_64] : memref<9x32x8xbf16, #tpu.memory_space<vmem>>, vector<1x32x8xbf16>
    %87 = vector.shape_cast %86 : vector<1x32x8xbf16> to vector<32x8xbf16>
    %88 = arith.truncf %85 : vector<8x512xf32> to vector<8x512xbf16>
    %cst_65 = arith.constant dense<0.000000e+00> : vector<32x512xf32>
    %89 = tpu.matmul %87, %88, %cst_65 {dimension_numbers = #tpu.dot_dimension_numbers<[1], [0], [0], [1], [0, 0, 1, 1], [], []>} : vector<32x8xbf16>, vector<8x512xbf16>, vector<32x512xf32> -> vector<32x512xf32>
    %90 = arith.addf %82, %89 : vector<32x512xf32>
    %c0_66 = arith.constant 0 : index
    %c0_67 = arith.constant 0 : index
    %91 = vector.load %arg5[%c0_66, %c0_67] : memref<32x1xf32, #tpu.memory_space<vmem>>, vector<32x1xf32>
    %92 = vector.broadcast %91 : vector<32x1xf32> to vector<32x512xf32>
    %93 = arith.addf %90, %92 : vector<32x512xf32>
    %c0_68 = arith.constant 0 : index
    %94 = memref.load %arg10[%c0_68] : memref<1xf32, #tpu.memory_space<smem>>
    %cst_69 = arith.constant 0.000000e+00 : f32
    %95 = vector.broadcast %cst_69 : f32 to vector<32x512xf32>
    %96 = arith.cmpf oge, %93, %95 : vector<32x512xf32>
    %97 = vector.broadcast %94 : f32 to vector<32x512xf32>
    %98 = arith.mulf %97, %93 : vector<32x512xf32>
    %99 = arith.select %96, %93, %98 : vector<32x512xi1>, vector<32x512xf32>
    %c17_i32_70 = arith.constant 17 : i32
    %100 = tpu.dynamic_rotate %99 by %c17_i32_70 dim 1 : vector<32x512xf32>, i32 -> vector<32x512xf32>
    %101 = vector.broadcast %15 : vector<1x512xf32> to vector<32x512xf32>
    %102 = arith.mulf %100, %101 : vector<32x512xf32>
    %c0_71 = arith.constant 0 : index
    %c0_72 = arith.constant 0 : index
    %c0_73 = arith.constant 0 : index
    %103 = vector.load %arg6[%c0_71, %c0_72, %c0_73] : memref<9x32x32xbf16, #tpu.memory_space<vmem>>, vector<1x32x32xbf16>
    %104 = vector.shape_cast %103 : vector<1x32x32xbf16> to vector<32x32xbf16>
    %105 = arith.truncf %102 : vector<32x512xf32> to vector<32x512xbf16>
    %cst_74 = arith.constant dense<0.000000e+00> : vector<32x512xf32>
    %106 = tpu.matmul %104, %105, %cst_74 {dimension_numbers = #tpu.dot_dimension_numbers<[1], [0], [0], [1], [0, 0, 1, 1], [], []>} : vector<32x32xbf16>, vector<32x512xbf16>, vector<32x512xf32> -> vector<32x512xf32>
    %c16_i32_75 = arith.constant 16 : i32
    %107 = tpu.dynamic_rotate %99 by %c16_i32_75 dim 1 : vector<32x512xf32>, i32 -> vector<32x512xf32>
    %108 = vector.broadcast %16 : vector<1x512xf32> to vector<32x512xf32>
    %109 = arith.mulf %107, %108 : vector<32x512xf32>
    %c1_76 = arith.constant 1 : index
    %c0_77 = arith.constant 0 : index
    %c0_78 = arith.constant 0 : index
    %110 = vector.load %arg6[%c1_76, %c0_77, %c0_78] : memref<9x32x32xbf16, #tpu.memory_space<vmem>>, vector<1x32x32xbf16>
    %111 = vector.shape_cast %110 : vector<1x32x32xbf16> to vector<32x32xbf16>
    %112 = arith.truncf %109 : vector<32x512xf32> to vector<32x512xbf16>
    %cst_79 = arith.constant dense<0.000000e+00> : vector<32x512xf32>
    %113 = tpu.matmul %111, %112, %cst_79 {dimension_numbers = #tpu.dot_dimension_numbers<[1], [0], [0], [1], [0, 0, 1, 1], [], []>} : vector<32x32xbf16>, vector<32x512xbf16>, vector<32x512xf32> -> vector<32x512xf32>
    %114 = arith.addf %106, %113 : vector<32x512xf32>
    %c15_i32_80 = arith.constant 15 : i32
    %115 = tpu.dynamic_rotate %99 by %c15_i32_80 dim 1 : vector<32x512xf32>, i32 -> vector<32x512xf32>
    %116 = vector.broadcast %17 : vector<1x512xf32> to vector<32x512xf32>
    %117 = arith.mulf %115, %116 : vector<32x512xf32>
    %c2_81 = arith.constant 2 : index
    %c0_82 = arith.constant 0 : index
    %c0_83 = arith.constant 0 : index
    %118 = vector.load %arg6[%c2_81, %c0_82, %c0_83] : memref<9x32x32xbf16, #tpu.memory_space<vmem>>, vector<1x32x32xbf16>
    %119 = vector.shape_cast %118 : vector<1x32x32xbf16> to vector<32x32xbf16>
    %120 = arith.truncf %117 : vector<32x512xf32> to vector<32x512xbf16>
    %cst_84 = arith.constant dense<0.000000e+00> : vector<32x512xf32>
    %121 = tpu.matmul %119, %120, %cst_84 {dimension_numbers = #tpu.dot_dimension_numbers<[1], [0], [0], [1], [0, 0, 1, 1], [], []>} : vector<32x32xbf16>, vector<32x512xbf16>, vector<32x512xf32> -> vector<32x512xf32>
    %122 = arith.addf %114, %121 : vector<32x512xf32>
    %c1_i32_85 = arith.constant 1 : i32
    %123 = tpu.dynamic_rotate %99 by %c1_i32_85 dim 1 : vector<32x512xf32>, i32 -> vector<32x512xf32>
    %124 = vector.broadcast %18 : vector<1x512xf32> to vector<32x512xf32>
    %125 = arith.mulf %123, %124 : vector<32x512xf32>
    %c3_86 = arith.constant 3 : index
    %c0_87 = arith.constant 0 : index
    %c0_88 = arith.constant 0 : index
    %126 = vector.load %arg6[%c3_86, %c0_87, %c0_88] : memref<9x32x32xbf16, #tpu.memory_space<vmem>>, vector<1x32x32xbf16>
    %127 = vector.shape_cast %126 : vector<1x32x32xbf16> to vector<32x32xbf16>
    %128 = arith.truncf %125 : vector<32x512xf32> to vector<32x512xbf16>
    %cst_89 = arith.constant dense<0.000000e+00> : vector<32x512xf32>
    %129 = tpu.matmul %127, %128, %cst_89 {dimension_numbers = #tpu.dot_dimension_numbers<[1], [0], [0], [1], [0, 0, 1, 1], [], []>} : vector<32x32xbf16>, vector<32x512xbf16>, vector<32x512xf32> -> vector<32x512xf32>
    %130 = arith.addf %122, %129 : vector<32x512xf32>
    %c4_90 = arith.constant 4 : index
    %c0_91 = arith.constant 0 : index
    %c0_92 = arith.constant 0 : index
    %131 = vector.load %arg6[%c4_90, %c0_91, %c0_92] : memref<9x32x32xbf16, #tpu.memory_space<vmem>>, vector<1x32x32xbf16>
    %132 = vector.shape_cast %131 : vector<1x32x32xbf16> to vector<32x32xbf16>
    %133 = arith.truncf %99 : vector<32x512xf32> to vector<32x512xbf16>
    %cst_93 = arith.constant dense<0.000000e+00> : vector<32x512xf32>
    %134 = tpu.matmul %132, %133, %cst_93 {dimension_numbers = #tpu.dot_dimension_numbers<[1], [0], [0], [1], [0, 0, 1, 1], [], []>} : vector<32x32xbf16>, vector<32x512xbf16>, vector<32x512xf32> -> vector<32x512xf32>
    %135 = arith.addf %130, %134 : vector<32x512xf32>
    %c511_i32_94 = arith.constant 511 : i32
    %136 = tpu.dynamic_rotate %99 by %c511_i32_94 dim 1 : vector<32x512xf32>, i32 -> vector<32x512xf32>
    %137 = vector.broadcast %19 : vector<1x512xf32> to vector<32x512xf32>
    %138 = arith.mulf %136, %137 : vector<32x512xf32>
    %c5_95 = arith.constant 5 : index
    %c0_96 = arith.constant 0 : index
    %c0_97 = arith.constant 0 : index
    %139 = vector.load %arg6[%c5_95, %c0_96, %c0_97] : memref<9x32x32xbf16, #tpu.memory_space<vmem>>, vector<1x32x32xbf16>
    %140 = vector.shape_cast %139 : vector<1x32x32xbf16> to vector<32x32xbf16>
    %141 = arith.truncf %138 : vector<32x512xf32> to vector<32x512xbf16>
    %cst_98 = arith.constant dense<0.000000e+00> : vector<32x512xf32>
    %142 = tpu.matmul %140, %141, %cst_98 {dimension_numbers = #tpu.dot_dimension_numbers<[1], [0], [0], [1], [0, 0, 1, 1], [], []>} : vector<32x32xbf16>, vector<32x512xbf16>, vector<32x512xf32> -> vector<32x512xf32>
    %143 = arith.addf %135, %142 : vector<32x512xf32>
    %c497_i32_99 = arith.constant 497 : i32
    %144 = tpu.dynamic_rotate %99 by %c497_i32_99 dim 1 : vector<32x512xf32>, i32 -> vector<32x512xf32>
    %145 = vector.broadcast %20 : vector<1x512xf32> to vector<32x512xf32>
    %146 = arith.mulf %144, %145 : vector<32x512xf32>
    %c6_100 = arith.constant 6 : index
    %c0_101 = arith.constant 0 : index
    %c0_102 = arith.constant 0 : index
    %147 = vector.load %arg6[%c6_100, %c0_101, %c0_102] : memref<9x32x32xbf16, #tpu.memory_space<vmem>>, vector<1x32x32xbf16>
    %148 = vector.shape_cast %147 : vector<1x32x32xbf16> to vector<32x32xbf16>
    %149 = arith.truncf %146 : vector<32x512xf32> to vector<32x512xbf16>
    %cst_103 = arith.constant dense<0.000000e+00> : vector<32x512xf32>
    %150 = tpu.matmul %148, %149, %cst_103 {dimension_numbers = #tpu.dot_dimension_numbers<[1], [0], [0], [1], [0, 0, 1, 1], [], []>} : vector<32x32xbf16>, vector<32x512xbf16>, vector<32x512xf32> -> vector<32x512xf32>
    %151 = arith.addf %143, %150 : vector<32x512xf32>
    %c496_i32_104 = arith.constant 496 : i32
    %152 = tpu.dynamic_rotate %99 by %c496_i32_104 dim 1 : vector<32x512xf32>, i32 -> vector<32x512xf32>
    %153 = vector.broadcast %21 : vector<1x512xf32> to vector<32x512xf32>
    %154 = arith.mulf %152, %153 : vector<32x512xf32>
    %c7_105 = arith.constant 7 : index
    %c0_106 = arith.constant 0 : index
    %c0_107 = arith.constant 0 : index
    %155 = vector.load %arg6[%c7_105, %c0_106, %c0_107] : memref<9x32x32xbf16, #tpu.memory_space<vmem>>, vector<1x32x32xbf16>
    %156 = vector.shape_cast %155 : vector<1x32x32xbf16> to vector<32x32xbf16>
    %157 = arith.truncf %154 : vector<32x512xf32> to vector<32x512xbf16>
    %cst_108 = arith.constant dense<0.000000e+00> : vector<32x512xf32>
    %158 = tpu.matmul %156, %157, %cst_108 {dimension_numbers = #tpu.dot_dimension_numbers<[1], [0], [0], [1], [0, 0, 1, 1], [], []>} : vector<32x32xbf16>, vector<32x512xbf16>, vector<32x512xf32> -> vector<32x512xf32>
    %159 = arith.addf %151, %158 : vector<32x512xf32>
    %c495_i32_109 = arith.constant 495 : i32
    %160 = tpu.dynamic_rotate %99 by %c495_i32_109 dim 1 : vector<32x512xf32>, i32 -> vector<32x512xf32>
    %161 = vector.broadcast %22 : vector<1x512xf32> to vector<32x512xf32>
    %162 = arith.mulf %160, %161 : vector<32x512xf32>
    %c8_110 = arith.constant 8 : index
    %c0_111 = arith.constant 0 : index
    %c0_112 = arith.constant 0 : index
    %163 = vector.load %arg6[%c8_110, %c0_111, %c0_112] : memref<9x32x32xbf16, #tpu.memory_space<vmem>>, vector<1x32x32xbf16>
    %164 = vector.shape_cast %163 : vector<1x32x32xbf16> to vector<32x32xbf16>
    %165 = arith.truncf %162 : vector<32x512xf32> to vector<32x512xbf16>
    %cst_113 = arith.constant dense<0.000000e+00> : vector<32x512xf32>
    %166 = tpu.matmul %164, %165, %cst_113 {dimension_numbers = #tpu.dot_dimension_numbers<[1], [0], [0], [1], [0, 0, 1, 1], [], []>} : vector<32x32xbf16>, vector<32x512xbf16>, vector<32x512xf32> -> vector<32x512xf32>
    %167 = arith.addf %159, %166 : vector<32x512xf32>
    %c0_114 = arith.constant 0 : index
    %c0_115 = arith.constant 0 : index
    %168 = vector.load %arg7[%c0_114, %c0_115] : memref<32x1xf32, #tpu.memory_space<vmem>>, vector<32x1xf32>
    %169 = vector.broadcast %168 : vector<32x1xf32> to vector<32x512xf32>
    %170 = arith.addf %167, %169 : vector<32x512xf32>
    %c0_116 = arith.constant 0 : index
    %171 = memref.load %arg11[%c0_116] : memref<1xf32, #tpu.memory_space<smem>>
    %cst_117 = arith.constant 0.000000e+00 : f32
    %172 = vector.broadcast %cst_117 : f32 to vector<32x512xf32>
    %173 = arith.cmpf oge, %170, %172 : vector<32x512xf32>
    %174 = vector.broadcast %171 : f32 to vector<32x512xf32>
    %175 = arith.mulf %174, %170 : vector<32x512xf32>
    %176 = arith.select %173, %170, %175 : vector<32x512xi1>, vector<32x512xf32>
    %c17_i32_118 = arith.constant 17 : i32
    %177 = tpu.dynamic_rotate %176 by %c17_i32_118 dim 1 : vector<32x512xf32>, i32 -> vector<32x512xf32>
    %178 = vector.broadcast %15 : vector<1x512xf32> to vector<32x512xf32>
    %179 = arith.mulf %177, %178 : vector<32x512xf32>
    %c0_119 = arith.constant 0 : index
    %c0_120 = arith.constant 0 : index
    %c0_121 = arith.constant 0 : index
    %180 = vector.load %arg8[%c0_119, %c0_120, %c0_121] : memref<9x4x32xbf16, #tpu.memory_space<vmem>>, vector<1x4x32xbf16>
    %181 = vector.shape_cast %180 : vector<1x4x32xbf16> to vector<4x32xbf16>
    %182 = arith.truncf %179 : vector<32x512xf32> to vector<32x512xbf16>
    %cst_122 = arith.constant dense<0.000000e+00> : vector<4x512xf32>
    %183 = tpu.matmul %181, %182, %cst_122 {dimension_numbers = #tpu.dot_dimension_numbers<[1], [0], [0], [1], [0, 0, 1, 1], [], []>} : vector<4x32xbf16>, vector<32x512xbf16>, vector<4x512xf32> -> vector<4x512xf32>
    %c16_i32_123 = arith.constant 16 : i32
    %184 = tpu.dynamic_rotate %176 by %c16_i32_123 dim 1 : vector<32x512xf32>, i32 -> vector<32x512xf32>
    %185 = vector.broadcast %16 : vector<1x512xf32> to vector<32x512xf32>
    %186 = arith.mulf %184, %185 : vector<32x512xf32>
    %c1_124 = arith.constant 1 : index
    %c0_125 = arith.constant 0 : index
    %c0_126 = arith.constant 0 : index
    %187 = vector.load %arg8[%c1_124, %c0_125, %c0_126] : memref<9x4x32xbf16, #tpu.memory_space<vmem>>, vector<1x4x32xbf16>
    %188 = vector.shape_cast %187 : vector<1x4x32xbf16> to vector<4x32xbf16>
    %189 = arith.truncf %186 : vector<32x512xf32> to vector<32x512xbf16>
    %cst_127 = arith.constant dense<0.000000e+00> : vector<4x512xf32>
    %190 = tpu.matmul %188, %189, %cst_127 {dimension_numbers = #tpu.dot_dimension_numbers<[1], [0], [0], [1], [0, 0, 1, 1], [], []>} : vector<4x32xbf16>, vector<32x512xbf16>, vector<4x512xf32> -> vector<4x512xf32>
    %191 = arith.addf %183, %190 : vector<4x512xf32>
    %c15_i32_128 = arith.constant 15 : i32
    %192 = tpu.dynamic_rotate %176 by %c15_i32_128 dim 1 : vector<32x512xf32>, i32 -> vector<32x512xf32>
    %193 = vector.broadcast %17 : vector<1x512xf32> to vector<32x512xf32>
    %194 = arith.mulf %192, %193 : vector<32x512xf32>
    %c2_129 = arith.constant 2 : index
    %c0_130 = arith.constant 0 : index
    %c0_131 = arith.constant 0 : index
    %195 = vector.load %arg8[%c2_129, %c0_130, %c0_131] : memref<9x4x32xbf16, #tpu.memory_space<vmem>>, vector<1x4x32xbf16>
    %196 = vector.shape_cast %195 : vector<1x4x32xbf16> to vector<4x32xbf16>
    %197 = arith.truncf %194 : vector<32x512xf32> to vector<32x512xbf16>
    %cst_132 = arith.constant dense<0.000000e+00> : vector<4x512xf32>
    %198 = tpu.matmul %196, %197, %cst_132 {dimension_numbers = #tpu.dot_dimension_numbers<[1], [0], [0], [1], [0, 0, 1, 1], [], []>} : vector<4x32xbf16>, vector<32x512xbf16>, vector<4x512xf32> -> vector<4x512xf32>
    %199 = arith.addf %191, %198 : vector<4x512xf32>
    %c1_i32_133 = arith.constant 1 : i32
    %200 = tpu.dynamic_rotate %176 by %c1_i32_133 dim 1 : vector<32x512xf32>, i32 -> vector<32x512xf32>
    %201 = vector.broadcast %18 : vector<1x512xf32> to vector<32x512xf32>
    %202 = arith.mulf %200, %201 : vector<32x512xf32>
    %c3_134 = arith.constant 3 : index
    %c0_135 = arith.constant 0 : index
    %c0_136 = arith.constant 0 : index
    %203 = vector.load %arg8[%c3_134, %c0_135, %c0_136] : memref<9x4x32xbf16, #tpu.memory_space<vmem>>, vector<1x4x32xbf16>
    %204 = vector.shape_cast %203 : vector<1x4x32xbf16> to vector<4x32xbf16>
    %205 = arith.truncf %202 : vector<32x512xf32> to vector<32x512xbf16>
    %cst_137 = arith.constant dense<0.000000e+00> : vector<4x512xf32>
    %206 = tpu.matmul %204, %205, %cst_137 {dimension_numbers = #tpu.dot_dimension_numbers<[1], [0], [0], [1], [0, 0, 1, 1], [], []>} : vector<4x32xbf16>, vector<32x512xbf16>, vector<4x512xf32> -> vector<4x512xf32>
    %207 = arith.addf %199, %206 : vector<4x512xf32>
    %c4_138 = arith.constant 4 : index
    %c0_139 = arith.constant 0 : index
    %c0_140 = arith.constant 0 : index
    %208 = vector.load %arg8[%c4_138, %c0_139, %c0_140] : memref<9x4x32xbf16, #tpu.memory_space<vmem>>, vector<1x4x32xbf16>
    %209 = vector.shape_cast %208 : vector<1x4x32xbf16> to vector<4x32xbf16>
    %210 = arith.truncf %176 : vector<32x512xf32> to vector<32x512xbf16>
    %cst_141 = arith.constant dense<0.000000e+00> : vector<4x512xf32>
    %211 = tpu.matmul %209, %210, %cst_141 {dimension_numbers = #tpu.dot_dimension_numbers<[1], [0], [0], [1], [0, 0, 1, 1], [], []>} : vector<4x32xbf16>, vector<32x512xbf16>, vector<4x512xf32> -> vector<4x512xf32>
    %212 = arith.addf %207, %211 : vector<4x512xf32>
    %c511_i32_142 = arith.constant 511 : i32
    %213 = tpu.dynamic_rotate %176 by %c511_i32_142 dim 1 : vector<32x512xf32>, i32 -> vector<32x512xf32>
    %214 = vector.broadcast %19 : vector<1x512xf32> to vector<32x512xf32>
    %215 = arith.mulf %213, %214 : vector<32x512xf32>
    %c5_143 = arith.constant 5 : index
    %c0_144 = arith.constant 0 : index
    %c0_145 = arith.constant 0 : index
    %216 = vector.load %arg8[%c5_143, %c0_144, %c0_145] : memref<9x4x32xbf16, #tpu.memory_space<vmem>>, vector<1x4x32xbf16>
    %217 = vector.shape_cast %216 : vector<1x4x32xbf16> to vector<4x32xbf16>
    %218 = arith.truncf %215 : vector<32x512xf32> to vector<32x512xbf16>
    %cst_146 = arith.constant dense<0.000000e+00> : vector<4x512xf32>
    %219 = tpu.matmul %217, %218, %cst_146 {dimension_numbers = #tpu.dot_dimension_numbers<[1], [0], [0], [1], [0, 0, 1, 1], [], []>} : vector<4x32xbf16>, vector<32x512xbf16>, vector<4x512xf32> -> vector<4x512xf32>
    %220 = arith.addf %212, %219 : vector<4x512xf32>
    %c497_i32_147 = arith.constant 497 : i32
    %221 = tpu.dynamic_rotate %176 by %c497_i32_147 dim 1 : vector<32x512xf32>, i32 -> vector<32x512xf32>
    %222 = vector.broadcast %20 : vector<1x512xf32> to vector<32x512xf32>
    %223 = arith.mulf %221, %222 : vector<32x512xf32>
    %c6_148 = arith.constant 6 : index
    %c0_149 = arith.constant 0 : index
    %c0_150 = arith.constant 0 : index
    %224 = vector.load %arg8[%c6_148, %c0_149, %c0_150] : memref<9x4x32xbf16, #tpu.memory_space<vmem>>, vector<1x4x32xbf16>
    %225 = vector.shape_cast %224 : vector<1x4x32xbf16> to vector<4x32xbf16>
    %226 = arith.truncf %223 : vector<32x512xf32> to vector<32x512xbf16>
    %cst_151 = arith.constant dense<0.000000e+00> : vector<4x512xf32>
    %227 = tpu.matmul %225, %226, %cst_151 {dimension_numbers = #tpu.dot_dimension_numbers<[1], [0], [0], [1], [0, 0, 1, 1], [], []>} : vector<4x32xbf16>, vector<32x512xbf16>, vector<4x512xf32> -> vector<4x512xf32>
    %228 = arith.addf %220, %227 : vector<4x512xf32>
    %c496_i32_152 = arith.constant 496 : i32
    %229 = tpu.dynamic_rotate %176 by %c496_i32_152 dim 1 : vector<32x512xf32>, i32 -> vector<32x512xf32>
    %230 = vector.broadcast %21 : vector<1x512xf32> to vector<32x512xf32>
    %231 = arith.mulf %229, %230 : vector<32x512xf32>
    %c7_153 = arith.constant 7 : index
    %c0_154 = arith.constant 0 : index
    %c0_155 = arith.constant 0 : index
    %232 = vector.load %arg8[%c7_153, %c0_154, %c0_155] : memref<9x4x32xbf16, #tpu.memory_space<vmem>>, vector<1x4x32xbf16>
    %233 = vector.shape_cast %232 : vector<1x4x32xbf16> to vector<4x32xbf16>
    %234 = arith.truncf %231 : vector<32x512xf32> to vector<32x512xbf16>
    %cst_156 = arith.constant dense<0.000000e+00> : vector<4x512xf32>
    %235 = tpu.matmul %233, %234, %cst_156 {dimension_numbers = #tpu.dot_dimension_numbers<[1], [0], [0], [1], [0, 0, 1, 1], [], []>} : vector<4x32xbf16>, vector<32x512xbf16>, vector<4x512xf32> -> vector<4x512xf32>
    %236 = arith.addf %228, %235 : vector<4x512xf32>
    %c495_i32_157 = arith.constant 495 : i32
    %237 = tpu.dynamic_rotate %176 by %c495_i32_157 dim 1 : vector<32x512xf32>, i32 -> vector<32x512xf32>
    %238 = vector.broadcast %22 : vector<1x512xf32> to vector<32x512xf32>
    %239 = arith.mulf %237, %238 : vector<32x512xf32>
    %c8_158 = arith.constant 8 : index
    %c0_159 = arith.constant 0 : index
    %c0_160 = arith.constant 0 : index
    %240 = vector.load %arg8[%c8_158, %c0_159, %c0_160] : memref<9x4x32xbf16, #tpu.memory_space<vmem>>, vector<1x4x32xbf16>
    %241 = vector.shape_cast %240 : vector<1x4x32xbf16> to vector<4x32xbf16>
    %242 = arith.truncf %239 : vector<32x512xf32> to vector<32x512xbf16>
    %cst_161 = arith.constant dense<0.000000e+00> : vector<4x512xf32>
    %243 = tpu.matmul %241, %242, %cst_161 {dimension_numbers = #tpu.dot_dimension_numbers<[1], [0], [0], [1], [0, 0, 1, 1], [], []>} : vector<4x32xbf16>, vector<32x512xbf16>, vector<4x512xf32> -> vector<4x512xf32>
    %244 = arith.addf %236, %243 : vector<4x512xf32>
    %c0_162 = arith.constant 0 : index
    %c0_163 = arith.constant 0 : index
    %245 = vector.load %arg9[%c0_162, %c0_163] : memref<4x1xf32, #tpu.memory_space<vmem>>, vector<4x1xf32>
    %246 = vector.broadcast %245 : vector<4x1xf32> to vector<4x512xf32>
    %247 = arith.addf %244, %246 : vector<4x512xf32>
    %c0_164 = arith.constant 0 : index
    %c0_165 = arith.constant 0 : index
    %c0_166 = arith.constant 0 : index
    %248 = vector.load %arg1[%c0_164, %c0_165, %c0_166] : memref<2x4x256xf32, #tpu.memory_space<vmem>>, vector<1x4x256xf32>
    %249 = vector.shape_cast %248 : vector<1x4x256xf32> to vector<4x256xf32>
    %250 = vector.extract_strided_slice %247 {offsets = [0, 0], sizes = [4, 256], strides = [1, 1]} : vector<4x512xf32> to vector<4x256xf32>
    %251 = arith.addf %249, %250 : vector<4x256xf32>
    %c0_167 = arith.constant 0 : index
    %c0_168 = arith.constant 0 : index
    %c0_169 = arith.constant 0 : index
    %252 = vector.load %arg12[%c0_167, %c0_168, %c0_169] : memref<2x4x256xf32, #tpu.memory_space<vmem>>, vector<1x4x256xf32>
    %253 = vector.shape_cast %252 : vector<1x4x256xf32> to vector<4x256xf32>
    %254 = vector.shape_cast %251 : vector<4x256xf32> to vector<1x4x256xf32>
    tpu.vector_store %arg12[%c0_167, %c0_168, %c0_169], %254 {strides = array<i32>} : memref<2x4x256xf32, #tpu.memory_space<vmem>>, vector<1x4x256xf32>,
    %c1_170 = arith.constant 1 : index
    %c0_171 = arith.constant 0 : index
    %c0_172 = arith.constant 0 : index
    %255 = vector.load %arg1[%c1_170, %c0_171, %c0_172] : memref<2x4x256xf32, #tpu.memory_space<vmem>>, vector<1x4x256xf32>
    %256 = vector.shape_cast %255 : vector<1x4x256xf32> to vector<4x256xf32>
    %257 = vector.extract_strided_slice %247 {offsets = [0, 256], sizes = [4, 256], strides = [1, 1]} : vector<4x512xf32> to vector<4x256xf32>
    %258 = arith.addf %256, %257 : vector<4x256xf32>
    %c1_173 = arith.constant 1 : index
    %c0_174 = arith.constant 0 : index
    %c0_175 = arith.constant 0 : index
    %259 = vector.load %arg12[%c1_173, %c0_174, %c0_175] : memref<2x4x256xf32, #tpu.memory_space<vmem>>, vector<1x4x256xf32>
    %260 = vector.shape_cast %259 : vector<1x4x256xf32> to vector<4x256xf32>
    %261 = vector.shape_cast %258 : vector<4x256xf32> to vector<1x4x256xf32>
    tpu.vector_store %arg12[%c1_173, %c0_174, %c0_175], %261 {strides = array<i32>} : memref<2x4x256xf32, #tpu.memory_space<vmem>>, vector<1x4x256xf32>,
    return
  }
  func.func @transform_0(%arg0: i32) -> (i32, i32, i32) {
    %c0_i32 = arith.constant 0 : i32
    %c0_i32_0 = arith.constant 0 : i32
    %c0_i32_1 = arith.constant 0 : i32
    return %arg0, %c0_i32, %c0_i32_0 : i32, i32, i32
  }
  func.func @transform_1(%arg0: i32) -> (i32, i32, i32) {
    %c0_i32 = arith.constant 0 : i32
    %c0_i32_0 = arith.constant 0 : i32
    %c0_i32_1 = arith.constant 0 : i32
    return %arg0, %c0_i32, %c0_i32_0 : i32, i32, i32
  }
  func.func @transform_2(%arg0: i32) -> (i32, i32) {
    %c0_i32 = arith.constant 0 : i32
    %c0_i32_0 = arith.constant 0 : i32
    %c0_i32_1 = arith.constant 0 : i32
    return %c0_i32, %c0_i32_0 : i32, i32
  }
  func.func @transform_3(%arg0: i32) -> (i32, i32, i32) {
    %c0_i32 = arith.constant 0 : i32
    %c0_i32_0 = arith.constant 0 : i32
    %c0_i32_1 = arith.constant 0 : i32
    %c0_i32_2 = arith.constant 0 : i32
    return %c0_i32, %c0_i32_0, %c0_i32_1 : i32, i32, i32
  }
  func.func @transform_4(%arg0: i32) -> (i32, i32) {
    %c0_i32 = arith.constant 0 : i32
    %c0_i32_0 = arith.constant 0 : i32
    %c0_i32_1 = arith.constant 0 : i32
    return %c0_i32, %c0_i32_0 : i32, i32
  }
  func.func @transform_5(%arg0: i32) -> (i32, i32, i32) {
    %c0_i32 = arith.constant 0 : i32
    %c0_i32_0 = arith.constant 0 : i32
    %c0_i32_1 = arith.constant 0 : i32
    %c0_i32_2 = arith.constant 0 : i32
    return %c0_i32, %c0_i32_0, %c0_i32_1 : i32, i32, i32
  }
  func.func @transform_6(%arg0: i32) -> (i32, i32) {
    %c0_i32 = arith.constant 0 : i32
    %c0_i32_0 = arith.constant 0 : i32
    %c0_i32_1 = arith.constant 0 : i32
    return %c0_i32, %c0_i32_0 : i32, i32
  }
  func.func @transform_7(%arg0: i32) -> (i32, i32, i32) {
    %c0_i32 = arith.constant 0 : i32
    %c0_i32_0 = arith.constant 0 : i32
    %c0_i32_1 = arith.constant 0 : i32
    %c0_i32_2 = arith.constant 0 : i32
    return %c0_i32, %c0_i32_0, %c0_i32_1 : i32, i32, i32
  }
  func.func @transform_8(%arg0: i32) -> (i32, i32) {
    %c0_i32 = arith.constant 0 : i32
    %c0_i32_0 = arith.constant 0 : i32
    %c0_i32_1 = arith.constant 0 : i32
    return %c0_i32, %c0_i32_0 : i32, i32
  }
  func.func @transform_9(%arg0: i32) -> i32 {
    %c0_i32 = arith.constant 0 : i32
    %c0_i32_0 = arith.constant 0 : i32
    return %c0_i32 : i32
  }
  func.func @transform_10(%arg0: i32) -> i32 {
    %c0_i32 = arith.constant 0 : i32
    %c0_i32_0 = arith.constant 0 : i32
    return %c0_i32 : i32
  }
  func.func @transform_11(%arg0: i32) -> (i32, i32, i32) {
    %c0_i32 = arith.constant 0 : i32
    %c0_i32_0 = arith.constant 0 : i32
    %c0_i32_1 = arith.constant 0 : i32
    return %arg0, %c0_i32, %c0_i32_0 : i32, i32, i32
  }
}

</mosaic_0001>

<bundles_post_ra>
// kernel: dualnet_forward.1
= control target key start
LH: loop header
LB: loop body
LE: loop exit
PB: predicated region body
PF: predicated region fallthrough
CT: control target
= control target key end

     0   :  { %v5533_v2 = vmov 0.0   ;;  %s5534_s25 = smov 16   ;;  %v8920_v12 = vmov 0   ;;  %s5537_s26 = smov 15   ;;  %v114_v14 = vlaneseq  ;;  %vm218_vm2 = vcmask 1043456   ;;  %s8908_s0 = inlined_call_operand.vmem [shape: f32[2,4,256], index: 0, kind: input, shape index: {}]   ;;  %s8909_s1 = inlined_call_operand.vmem [shape: f32[2,2,256], index: 1, kind: input, shape index: {}]   ;;  %s8910_s3 = inlined_call_operand.vmem [shape: bf16[9,32,8], index: 3, kind: input, shape index: {}]   ;;  %s8911_s2 = inlined_call_operand.vmem [shape: f32[9,512], index: 2, kind: input, shape index: {}]   ;;  %s8912_s4 = inlined_call_operand.vmem [shape: f32[32,1], index: 4, kind: input, shape index: {}]   ;;  %s8913_s9 = inlined_call_operand.<no memory space> [shape: f32[1], index: 9, kind: input, shape index: {}]   ;;  %s8914_s5 = inlined_call_operand.vmem [shape: bf16[9,32,32], index: 5, kind: input, shape index: {}]   ;;  %s8915_s6 = inlined_call_operand.vmem [shape: f32[32,1], index: 6, kind: input, shape index: {}]   ;;  %s8916_s10 = inlined_call_operand.<no memory space> [shape: f32[1], index: 10, kind: input, shape index: {}]   ;;  %s8917_s8 = inlined_call_operand.vmem [shape: f32[4,1], index: 8, kind: input, shape index: {}]   ;;  %s8918_s7 = inlined_call_operand.vmem [shape: bf16[9,4,32], index: 7, kind: input, shape index: {}]   ;;  %s8919_s11 = inlined_call_operand.vmem [shape: f32[2,4,256], index: 11, kind: output, shape index: {}]  }
   0x1   :  { %v5255_v0 = vld [vmem:[%s8908_s0 + $0x8] sm:$0xff]  ;;  %v5257_v1 = vld.sshfl [vmem:[%s8909_s1 + $0x4] sm:$0x33 pattern:$0x76325410]  ;;  %263 = vmatprep.mubr.bf16.mxu0 %v8920_v12  ;;  %316 = vmatprep.mubr.bf16.mxu1 %v8920_v12  ;;  %s5538_s27 = smov 1  }
   0x2   :  { %85 = vst [vmem:[#allocation2 + $0x18] sm:$0xc0] %v5533_v2  ;;  %83 = vst [vmem:[#allocation2 + $0x10] sm:$0xc0] %v5533_v2  ;;  %v41_v3 = vld [vmem:[%s8908_s0] sm:$0xff]  ;;  %v78_v4 = vcombine.low %v5257_v1, %v5257_v1  ;;  %v64_v6 = vcombine.high %v5255_v0, %v5255_v0  ;;  %5494 = vset.pattern.permute.xlu1 %v8920_v12  ;;  %5493 = vset.pattern.permute.xlu0 %v8920_v12  ;;  %s5539_s28 = smov 127  }
   0x3   :  { %84 = vst [vmem:[#allocation2] sm:$0xc0] %v5533_v2  ;;  %86 = vst [vmem:[#allocation2 + $0x8] sm:$0xc0] %v5533_v2  ;;  %v43_v7 = vcombine.high %v41_v3, %v41_v3  ;;  %s5540_s29 = smov 113   ;;  %s5541_s30 = smov 112  }
   0x4   :  { %66 = vst [vmem:[#allocation2 + $0x18] sm:$0xf] %v5255_v0  ;;  %82 = vst [vmem:[#allocation2 + $0x8] sm:$0x30] %v5257_v1  ;;  %s5542_s12 = smov 111   ;;  %v123_v15 = vshrl.u32 %v114_v14, 7 }
   0x5   :  { %45 = vst [vmem:[#allocation2 + $0x10] sm:$0xf] %v41_v3  ;;  %v5254_v5 = vld.sshfl [vmem:[%s8909_s1] sm:$0x33 pattern:$0x76325410] }
   0x6   :  { %v56_v8 = vcombine.low %v5254_v5, %v5254_v5  ;;  %60 = vst [vmem:[#allocation2] sm:$0x30] %v5254_v5  ;;  %81 = vst [vmem:[#allocation2 + $0x18] sm:$0x30] %v78_v4  ;;  %s5536_s1 = smov 17   ;;  %v5691_v16 = vand.u32 127, %v114_v14 }
   0x7   :  { %67 = vst [vmem:[#allocation2 + $0x8] sm:$0xf] %v64_v6  ;;  %46 = vst [vmem:[#allocation2] sm:$0xf] %v43_v7  ;;  %v5693_v17 = vsub.s32 3, %v123_v15  ;;  %v5695_v18 = vsub.s32 0, %v123_v15 }
   0x8   :  { %59 = vst [vmem:[#allocation2 + $0x10] sm:$0x30] %v56_v8  ;;  %9130 = vst [vmem:[#allocation5_spill] sm:$0xff] %v5691_v16  ;;  %v5697_v19 = vsub.s32 1, %v123_v15  ;;  %v5702_v21 = vsub.s32 2, %v123_v15  ;;  %vm162_vm0 = vcmp.lt.s32.totalorder %v5691_v16, 16 }
   0x9   :  { %v5258_v20 = vld [vmem:[%s8911_s2 + $0x1] ss:$8 sm:$0xf]  ;;  %v91_v29 = vld [vmem:[%s8911_s2] ss:$8 sm:$0xf] }
   0xa   :  { %v5706_v24 = vrot.slane %v5258_v20, %v5693_v17  ;;  %v5709_v25 = vrot.slane %v5258_v20, %v5695_v18  ;;  %v5712_v26 = vrot.slane %v5258_v20, %v5697_v19  ;;  %v5715_v27 = vrot.slane %v5258_v20, %v5702_v21  ;;  %v5497_v53 = vld [vmem:[%s8910_s3 + $0x10] sm:$0xff]   ;;  %v5498_v15 = vld [vmem:[%s8910_s3 + $0x18] sm:$0xff]  }
   0xb   :  { %vm116_vm1 = vcmp.lt.s32.totalorder %v5691_v16, 17  ;;  %v5732_v37 = vrot.slane %v91_v29, %v5697_v19  ;;  %v5741_v48 = vrot.slane %v91_v29, %v5695_v18  ;;  %v5747_v51 = vrot.slane %v91_v29, %v5702_v21  ;;  %v5259_v55 = vld [vmem:[%s8911_s2 + $0x2] ss:$8 sm:$0xf] }
   0xc   :  { %9131 = vst [vmem:[#allocation6_spill] sm:$0xff] %v5706_v24  ;;  %9132 = vst [vmem:[#allocation7_spill] sm:$0xff] %v5709_v25  ;;  %v5750_v52 = vrot.slane %v91_v29, %v5693_v17  ;;  %vm211_vm3 = vcmask 64512   ;;  %vm479_vm4 = vcmp.lt.s32.totalorder %v5691_v16, 15  ;;  %v5771_v0 = vrot.slane %v5259_v55, %v5697_v19 }
   0xd   :  { %v5615_v9 = vld [vmem:[#allocation2 + $0x18] sm:$0xff]  ;;  %9133 = vst [vmem:[#allocation8_spill] sm:$0xff] %v5712_v26  ;;  %9134 = vst [vmem:[#allocation9_spill] sm:$0xff] %v5715_v27  ;;  %v5780_v8 = vrot.slane %v5259_v55, %v5695_v18  ;;  %vm676_vm5 = vcmp.lt.s32.totalorder %v5691_v16, 1  ;;  %vm1032_vm6 = vcmp.lt.s32.totalorder %v5691_v16, 127  ;;  %vm1229_vm7 = vcmp.lt.s32.totalorder %v5691_v16, 113 }
   0xe   :  { %v5617_v10 = vld [vmem:[#allocation2 + $0x8] sm:$0xff]  ;;  %158 = vrot.lane.b32.xlu1 %v5615_v9, %s5534_s25  ;;  %v5626_v13 = vld [vmem:[#allocation2] sm:$0xff]  ;;  %9135 = vst [vmem:[#allocation10_spill] sm:$0xff] %v5732_v37  ;;  %9136 = vst [vmem:[#allocation11_spill] sm:$0xff] %v5741_v48  ;;  %vm1426_vm8 = vcmp.lt.s32.totalorder %v5691_v16, 112  ;;  %vm1623_vm9 = vcmp.lt.s32.totalorder %v5691_v16, 111 }
   0xf   :  { %v5621_v11 = vld [vmem:[#allocation2 + $0x10] sm:$0xff]  ;;  %9137 = vst [vmem:[#allocation12_spill] sm:$0xff] %v5747_v51  ;;  %9138 = vst [vmem:[#allocation13_spill] sm:$0xff] %v5750_v52 }
  0x10   :  { %154 = vrot.lane.b32.xlu0 %v5621_v11, %s5534_s25  ;;  %9139 = vst [vmem:[#allocation14_spill] sm:$0xff] %v5771_v0  ;;  %9140 = vst [vmem:[#allocation15_spill] sm:$0xff] %v5780_v8  ;;  %v5260_v29 = vld [vmem:[%s8911_s2 + $0x3] ss:$8 sm:$0xf] }
  0x12   :  { %160 = vrot.lane.b32.xlu1 %v5617_v10, %s5534_s25 }
  0x14   :  { %156 = vrot.lane.b32.xlu0 %v5626_v13, %s5534_s25 }
  0x16   :  { %108 = vrot.lane.b32.xlu1 %v5626_v13, %s5536_s1 }
  0x18   :  { %106 = vrot.lane.b32.xlu0 %v5621_v11, %s5536_s1 }
  0x1a   :  { %112 = vrot.lane.b32.xlu1 %v5617_v10, %s5536_s1 }
  0x1c   :  { %110 = vrot.lane.b32.xlu0 %v5615_v9, %s5536_s1 }
  0x1e   :  { %473 = vrot.lane.b32.xlu1 %v5626_v13, %s5537_s26 }
  0x20   :  { %471 = vrot.lane.b32.xlu0 %v5621_v11, %s5537_s26 }
  0x22   :  { %477 = vrot.lane.b32.xlu1 %v5617_v10, %s5537_s26 }
  0x24   :  { %475 = vrot.lane.b32.xlu0 %v5615_v9, %s5537_s26 }
  0x26   :  { %670 = vrot.lane.b32.xlu1 %v5626_v13, %s5538_s27 }
  0x28   :  { %668 = vrot.lane.b32.xlu0 %v5621_v11, %s5538_s27 }
  0x2a   :  { %674 = vrot.lane.b32.xlu1 %v5617_v10, %s5538_s27 }
  0x2c   :  { %672 = vrot.lane.b32.xlu0 %v5615_v9, %s5538_s27 }
  0x2e   :  { %1026 = vrot.lane.b32.xlu1 %v5626_v13, %s5539_s28 }
  0x30   :  { %1024 = vrot.lane.b32.xlu0 %v5621_v11, %s5539_s28 }
  0x32   :  { %1030 = vrot.lane.b32.xlu1 %v5617_v10, %s5539_s28 }
  0x34   :  { %1028 = vrot.lane.b32.xlu0 %v5615_v9, %s5539_s28 }
  0x36   :  { %1223 = vrot.lane.b32.xlu1 %v5626_v13, %s5540_s29 }
  0x38   :  { %1221 = vrot.lane.b32.xlu0 %v5621_v11, %s5540_s29 }
  0x3a   :  { %1227 = vrot.lane.b32.xlu1 %v5617_v10, %s5540_s29 }
  0x3c   :  { %1225 = vrot.lane.b32.xlu0 %v5615_v9, %s5540_s29 }
  0x3e   :  { %1420 = vrot.lane.b32.xlu1 %v5626_v13, %s5541_s30 }
  0x40   :  { %1418 = vrot.lane.b32.xlu0 %v5621_v11, %s5541_s30 }
  0x42   :  { %1424 = vrot.lane.b32.xlu1 %v5617_v10, %s5541_s30 }
  0x44   :  { %1422 = vrot.lane.b32.xlu0 %v5615_v9, %s5541_s30 }
  0x46   :  { %1617 = vrot.lane.b32.xlu1 %v5626_v13, %s5542_s12 }
  0x48   :  { %1615 = vrot.lane.b32.xlu0 %v5621_v11, %s5542_s12 }
  0x4a   :  { %1621 = vrot.lane.b32.xlu1 %v5617_v10, %s5542_s12 }
  0x4c   :  { %1619 = vrot.lane.b32.xlu0 %v5615_v9, %s5542_s12 }
  0x80   :  { %v159_v22 = vpop.permute.xlu1 %158 }
  0x82   :  { %v155_v23 = vpop.permute.xlu0 %154 }
  0x84   :  { %v161_v28 = vpop.permute.xlu1 %160 }
  0x85   :  { %v166_v30 = vsel %vm162_vm0, %v161_v28, %v155_v23  ;;  %v163_v32 = vsel %vm162_vm0, %v159_v22, %v161_v28 }
  0x86   :  { %v157_v31 = vpop.permute.xlu0 %156  ;;  %v191_v34 = vmul.f32 %v5706_v24, %v163_v32  ;;  %v188_v36 = vmul.f32 %v5709_v25, %v166_v30 }
  0x87   :  { %v164_v33 = vsel %vm162_vm0, %v157_v31, %v159_v22  ;;  %v165_v35 = vsel %vm162_vm0, %v155_v23, %v157_v31  ;;  %v5789_v22 = vrot.slane %v5259_v55, %v5702_v21  ;;  %v5792_v23 = vrot.slane %v5259_v55, %v5693_v17 }
  0x88   :  { %v189_v38 = vmul.f32 %v5712_v26, %v165_v35  ;;  %v190_v39 = vmul.f32 %v5715_v27, %v164_v33  ;;  %v109_v40 = vpop.permute.xlu1 %108  ;;  %v200_v41 = vpack.c.bf16 %v191_v34, %v191_v34  ;;  %v197_v42 = vpack.c.bf16 %v188_v36, %v188_v36 }
  0x89   :  { %9141 = vst [vmem:[#allocation16_spill] sm:$0xff] %v5789_v22  ;;  %9142 = vst [vmem:[#allocation17_spill] sm:$0xff] %v5792_v23 }
  0x8a   :  { %v107_v43 = vpop.permute.xlu0 %106  ;;  %v198_v44 = vpack.c.bf16 %v189_v38, %v189_v38  ;;  %v199_v45 = vpack.c.bf16 %v190_v39, %v190_v39  ;;  %5274 = vmatprep.subr.msk.bf16.mxu1 %vm218_vm2, %v200_v41  ;;  %v220_v47 = vsel %vm218_vm2, %v197_v42, 0  ;;  %v5810_v39 = vrot.slane %v5260_v29, %v5697_v19 }
  0x8b   :  { %v119_v46 = vsel %vm116_vm1, %v107_v43, %v109_v40 }
  0x8c   :  { %v143_v49 = vmul.f32 %v5732_v37, %v119_v46  ;;  %5271 = vmatprep.subr.msk.bf16.mxu0 %vm218_vm2, %v198_v44  ;;  %v226_v50 = vsel %vm218_vm2, %v199_v45, 0  ;;  %v113_v54 = vpop.permute.xlu1 %112  ;;  %9143 = vst [vmem:[#allocation18_spill] sm:$0xff] %v5810_v39  ;;  %v5499_v46 = vld [vmem:[%s8910_s3] sm:$0xff]  }
  0x8d   :  { %246 = vmatpush1.bf16.msra.mxu0 %v220_v47  ;;  %299 = vmatpush1.bf16.msra.mxu1 %v226_v50  ;;  %v120_v57 = vsel %vm116_vm1, %v113_v54, %v107_v43 }
  0x8e   :  { %v151_v56 = vpack.c.bf16 %v143_v49, %v143_v49  ;;  %v111_v58 = vpop.permute.xlu0 %110  ;;  %v142_v59 = vmul.f32 %v5741_v48, %v120_v57  ;;  %v5823_v49 = vrot.slane %v5260_v29, %v5693_v17 }
  0x8f   :  { %v117_v60 = vsel %vm116_vm1, %v111_v58, %v113_v54  ;;  %v118_v61 = vsel %vm116_vm1, %v109_v40, %v111_v58 }
  0x90   :  { %v144_v62 = vmul.f32 %v5747_v51, %v118_v61  ;;  %v145_v63 = vmul.f32 %v5750_v52, %v117_v60  ;;  %5272 = vmatmul.mubr.msk.bf16.vlgmr.msra.gmra.mxu0 %vm211_vm3, %v5497_v53  ;;  %5275 = vmatmul.mubr.msk.bf16.vlgmr.msra.gmra.mxu1 %vm211_vm3, %v5497_v53  ;;  %v150_v1 = vpack.c.bf16 %v142_v59, %v142_v59  ;;  %v474_v2 = vpop.permute.xlu1 %473 }
  0x91   :  { %5279 = vmatprep.subr.msk.bf16.mxu0 %vm218_vm2, %v151_v56  ;;  %273 = vmatprep.mubr.bf16.mxu0 %v8920_v12  ;;  %9144 = vst [vmem:[#allocation19_spill] sm:$0xff] %v5823_v49  ;;  %v5835_v59 = vrot.slane %v5260_v29, %v5702_v21  ;;  %v5838_v61 = vrot.slane %v5260_v29, %v5695_v18 }
  0x92   :  { %v152_v3 = vpack.c.bf16 %v144_v62, %v144_v62  ;;  %v153_v4 = vpack.c.bf16 %v145_v63, %v145_v63  ;;  %326 = vmatprep.mubr.bf16.mxu1 %v8920_v12  ;;  %v472_v5 = vpop.permute.xlu0 %471  ;;  %v354_v6 = vsel %vm218_vm2, %v150_v1, 0  ;;  %v5500_v63 = vld [vmem:[%s8910_s3 + $0x8] sm:$0xff]   ;;  %v873_v29 = vpack.c.bf16 %v5617_v10, %v5617_v10 }
  0x93   :  { %v482_v7 = vsel %vm479_vm4, %v472_v5, %v474_v2  ;;  %380 = vmatpush1.bf16.msra.mxu0 %v354_v6  ;;  %9145 = vst [vmem:[#allocation20_spill] sm:$0xff] %v5835_v59  ;;  %9146 = vst [vmem:[#allocation21_spill] sm:$0xff] %v5838_v61  ;;  %v5501_v6 = vld [vmem:[%s8910_s3 + $0x20] sm:$0xff]  }
  0x94   :  { %5282 = vmatprep.subr.msk.bf16.mxu1 %vm218_vm2, %v153_v4  ;;  %v360_v14 = vsel %vm218_vm2, %v152_v3, 0  ;;  %v506_v20 = vmul.f32 %v5771_v0, %v482_v7  ;;  %v478_v28 = vpop.permute.xlu1 %477  ;;  %v5261_v10 = vld [vmem:[%s8911_s2 + $0x5] ss:$8 sm:$0xf] }
  0x95   :  { %433 = vmatpush1.bf16.msra.mxu1 %v360_v14  ;;  %v483_v31 = vsel %vm479_vm4, %v478_v28, %v472_v5 }
  0x96   :  { %v515_v30 = vpack.c.bf16 %v506_v20, %v506_v20  ;;  %v476_v32 = vpop.permute.xlu0 %475  ;;  %v505_v33 = vmul.f32 %v5780_v8, %v483_v31 }
  0x97   :  { %v480_v34 = vsel %vm479_vm4, %v476_v32, %v478_v28  ;;  %v481_v35 = vsel %vm479_vm4, %v474_v2, %v476_v32  ;;  %v5878_v32 = vrot.slane %v5261_v10, %v5693_v17 }
  0x98   :  { %5273 = vmatmul.mubr.msk.bf16.gmra.mxu0 %vm211_vm3, %v5498_v15  ;;  %5276 = vmatmul.mubr.msk.bf16.gmra.mxu1 %vm211_vm3, %v5498_v15  ;;  %v507_v36 = vmul.f32 %v5789_v22, %v481_v35  ;;  %v508_v38 = vmul.f32 %v5792_v23, %v480_v34  ;;  %v671_v40 = vpop.permute.xlu1 %670  ;;  %v514_v44 = vpack.c.bf16 %v505_v33, %v505_v33 }
  0x99   :  { %397 = vmatprep.mubr.bf16.mxu0 %v8920_v12  ;;  %450 = vmatprep.mubr.bf16.mxu1 %v8920_v12  ;;  %v871_v15 = vpack.c.bf16 %v5626_v13, %v5626_v13  ;;  %v5502_v13 = vld [vmem:[%s8910_s3 + $0x28] sm:$0xff]   ;;  %9147 = vst [vmem:[#allocation22_spill] sm:$0xff] %v5878_v32  ;;  %v5881_v33 = vrot.slane %v5261_v10, %v5697_v19 }
  0x9a   :  { %v516_v41 = vpack.c.bf16 %v507_v36, %v507_v36  ;;  %v517_v42 = vpack.c.bf16 %v508_v38, %v508_v38  ;;  %5291 = vmatprep.subr.msk.bf16.mxu0 %vm218_vm2, %v515_v30  ;;  %v669_v43 = vpop.permute.xlu0 %668  ;;  %v535_v55 = vsel %vm218_vm2, %v514_v44, 0  ;;  %v870_v36 = vpack.c.bf16 %v5621_v11, %v5621_v11 }
  0x9b   :  { %v679_v45 = vsel %vm676_vm5, %v669_v43, %v671_v40  ;;  %9148 = vst [vmem:[#allocation23_spill] sm:$0xff] %v5881_v33  ;;  %v872_v38 = vpack.c.bf16 %v5615_v9, %v5615_v9  ;;  %v5907_v9 = vrot.slane %v5261_v10, %v5695_v18 }
  0x9c   :  { %5294 = vmatprep.subr.msk.bf16.mxu1 %vm218_vm2, %v517_v42  ;;  %v703_v47 = vmul.f32 %v5810_v39, %v679_v45  ;;  %v675_v50 = vpop.permute.xlu1 %674  ;;  %v541_v53 = vsel %vm218_vm2, %v516_v41, 0  ;;  %v5503_v42 = vld [vmem:[%s8910_s3 + $0x30] sm:$0xff]  }
  0x9d   :  { %v680_v1 = vsel %vm676_vm5, %v675_v50, %v669_v43  ;;  %v891_v43 = vsel %vm218_vm2, %v870_v36, 0  ;;  %v897_v44 = vsel %vm218_vm2, %v872_v38, 0  ;;  %9149 = vst [vmem:[#allocation24_spill] sm:$0xff] %v5907_v9  ;;  %v5506_v38 = vld [vmem:[%s8910_s3 + $0x48] sm:$0xff]  }
  0x9e   :  { %v673_v54 = vpop.permute.xlu0 %672  ;;  %v712_v56 = vpack.c.bf16 %v703_v47, %v703_v47  ;;  %v702_v3 = vmul.f32 %v5838_v61, %v680_v1 }
  0x9f   :  { %v677_v57 = vsel %vm676_vm5, %v673_v54, %v675_v50  ;;  %v678_v62 = vsel %vm676_vm5, %v671_v40, %v673_v54  ;;  %v5504_v54 = vld [vmem:[%s8910_s3 + $0x38] sm:$0xff]  }
  0xa0   :  { %5280 = vmatmul.mubr.msk.bf16.vlgmr.msra.gmra.mxu0 %vm211_vm3, %v5499_v46  ;;  %5283 = vmatmul.mubr.msk.bf16.vlgmr.msra.gmra.mxu1 %vm211_vm3, %v5499_v46  ;;  %v705_v58 = vmul.f32 %v5823_v49, %v677_v57  ;;  %v704_v2 = vmul.f32 %v5835_v59, %v678_v62  ;;  %v711_v5 = vpack.c.bf16 %v702_v3, %v702_v3  ;;  %v1027_v20 = vpop.permute.xlu1 %1026 }
  0xa1   :  { %614 = vmatpush1.bf16.msra.mxu1 %v541_v53  ;;  %407 = vmatprep.mubr.bf16.mxu0 %v8920_v12  ;;  %v5912_v53 = vrot.slane %v5261_v10, %v5702_v21 }
  0xa2   :  { %460 = vmatprep.mubr.bf16.mxu1 %v8920_v12  ;;  %561 = vmatpush1.bf16.msra.mxu0 %v535_v55  ;;  %v714_v60 = vpack.c.bf16 %v705_v58, %v705_v58  ;;  %v713_v4 = vpack.c.bf16 %v704_v2, %v704_v2  ;;  %v732_v14 = vsel %vm218_vm2, %v711_v5, 0  ;;  %v1025_v28 = vpop.permute.xlu0 %1024 }
  0xa3   :  { %5303 = vmatprep.subr.msk.bf16.mxu0 %vm218_vm2, %v712_v56  ;;  %v1035_v11 = vsel %vm1032_vm6, %v1025_v28, %v1027_v20  ;;  %9150 = vst [vmem:[#allocation25_spill] sm:$0xff] %v5912_v53  ;;  %v5262_v56 = vld [vmem:[%s8911_s2 + $0x6] ss:$8 sm:$0xf] }
  0xa4   :  { %5306 = vmatprep.subr.msk.bf16.mxu1 %vm218_vm2, %v714_v60  ;;  %v738_v7 = vsel %vm218_vm2, %v713_v4, 0  ;;  %v1031_v30 = vpop.permute.xlu1 %1030  ;;  %v1058_v60 = vmul.f32 %v5907_v9, %v1035_v11  ;;  %v5931_v1 = vrot.slane %v5262_v56, %v5697_v19  ;;  %v5964_v36 = vrot.slane %v5262_v56, %v5702_v21  ;;  %v1813_v11 = vld [vmem:[%s8912_s4 + $0x8] sm:$0xff] }
  0xa5   :  { %v1036_v34 = vsel %vm1032_vm6, %v1031_v30, %v1025_v28 }
  0xa6   :  { %v1029_v31 = vpop.permute.xlu0 %1028  ;;  %v1061_v40 = vmul.f32 %v5878_v32, %v1036_v34  ;;  %9152 = vst [vmem:[#allocation27_spill] sm:$0xff] %v5931_v1  ;;  %v1067_v4 = vpack.c.bf16 %v1058_v60, %v1058_v60  ;;  %v1814_v34 = vld [vmem:[%s8912_s4 + $0x10] sm:$0xff]  ;;  %9154 = vst [vmem:[#allocation29_spill] sm:$0xff] %v5964_v36 }
  0xa7   :  { %v1034_v35 = vsel %vm1032_vm6, %v1027_v20, %v1029_v31  ;;  %v1033_v55 = vsel %vm1032_vm6, %v1029_v31, %v1031_v30  ;;  %v5953_v30 = vrot.slane %v5262_v56, %v5695_v18  ;;  %v1815_v31 = vld [vmem:[%s8912_s4 + $0x18] sm:$0xff]  ;;  %1828 = vperm.xlu0 %5493, %v1814_v34  }
  0xa8   :  { %5281 = vmatmul.mubr.msk.bf16.gmra.mxu0 %vm211_vm3, %v5500_v63  ;;  %5284 = vmatmul.mubr.msk.bf16.gmra.mxu1 %vm211_vm3, %v5500_v63  ;;  %v1059_v41 = vmul.f32 %v5881_v33, %v1034_v35  ;;  %v1070_v45 = vpack.c.bf16 %v1061_v40, %v1061_v40  ;;  %v1224_v47 = vpop.permute.xlu1 %1223  ;;  %v1060_v62 = vmul.f32 %v5912_v53, %v1033_v55 }
  0xa9   :  { %578 = vmatprep.mubr.bf16.mxu0 %v8920_v12  ;;  %631 = vmatprep.mubr.bf16.mxu1 %v8920_v12  ;;  %v5928_v63 = vrot.slane %v5262_v56, %v5693_v17  ;;  %9153 = vst [vmem:[#allocation28_spill] sm:$0xff] %v5953_v30 }
  0xaa   :  { %v1068_v46 = vpack.c.bf16 %v1059_v41, %v1059_v41  ;;  %v1222_v50 = vpop.permute.xlu0 %1221  ;;  %v1069_v5 = vpack.c.bf16 %v1060_v62, %v1060_v62  ;;  %v5263_v41 = vld [vmem:[%s8911_s2 + $0x7] ss:$8 sm:$0xf]  ;;  %1833 = vperm.xlu1 %5494, %v1815_v31   ;;  %v5264_v31 = vld [vmem:[%s8911_s2 + $0x20] ss:$8 sm:$0xf] }
  0xab   :  { %9151 = vst [vmem:[#allocation26_spill] sm:$0xff] %v5928_v63  ;;  %v1232_v35 = vsel %vm1229_vm7, %v1222_v50, %v1224_v47  ;;  %1823 = vperm.xlu0 %5493, %v1813_v11   ;;  %v5507_v62 = vld [vmem:[%s8910_s3 + $0x50] sm:$0xff]  }
  0xac   :  { %v1228_v57 = vpop.permute.xlu1 %1227  ;;  %v1094_v20 = vsel %vm218_vm2, %v1069_v5, 0 }
  0xad   :  { %v1233_v2 = vsel %vm1229_vm7, %v1228_v57, %v1222_v50  ;;  %v1812_v50 = vld [vmem:[%s8912_s4] sm:$0xff] }
  0xae   :  { %v1226_v58 = vpop.permute.xlu0 %1225  ;;  %1818 = vperm.xlu1 %5494, %v1812_v50  }
  0xaf   :  { %v1231_v3 = vsel %vm1229_vm7, %v1224_v47, %v1226_v58  ;;  %v1230_v40 = vsel %vm1229_vm7, %v1226_v58, %v1228_v57  ;;  %v5983_v47 = vrot.slane %v5263_v41, %v5697_v19 }
  0xb0   :  { %5292 = vmatmul.mubr.msk.bf16.vlgmr.msra.gmra.mxu0 %vm211_vm3, %v5501_v6  ;;  %5295 = vmatmul.mubr.msk.bf16.vlgmr.msra.gmra.mxu1 %vm211_vm3, %v5501_v6  ;;  %v1258_v6 = vmul.f32 %v5928_v63, %v1233_v2 }
  0xb1   :  { %811 = vmatpush1.bf16.msra.mxu1 %v738_v7  ;;  %588 = vmatprep.mubr.bf16.mxu0 %v8920_v12  ;;  %v1256_v7 = vmul.f32 %v5931_v1, %v1231_v3  ;;  %9156 = vst [vmem:[#allocation31_spill] sm:$0xff] %v5983_v47 }
  0xb2   :  { %641 = vmatprep.mubr.bf16.mxu1 %v8920_v12  ;;  %758 = vmatpush1.bf16.msra.mxu0 %v732_v14  ;;  %v5505_v14 = vld [vmem:[%s8910_s3 + $0x40] sm:$0xff]   ;;  %v1267_v28 = vpack.c.bf16 %v1258_v6, %v1258_v6  ;;  %v1419_v10 = vpop.permute.xlu0 %1418 }
  0xb3   :  { %5315 = vmatprep.subr.msk.bf16.mxu0 %vm218_vm2, %v871_v15  ;;  %5318 = vmatprep.subr.msk.bf16.mxu1 %vm218_vm2, %v873_v29  ;;  %v1088_v15 = vsel %vm218_vm2, %v1067_v4, 0  ;;  %v1265_v29 = vpack.c.bf16 %v1256_v7, %v1256_v7 }
  0xb8   :  { %5293 = vmatmul.mubr.msk.bf16.gmra.mxu0 %vm211_vm3, %v5502_v13  ;;  %5296 = vmatmul.mubr.msk.bf16.gmra.mxu1 %vm211_vm3, %v5502_v13  ;;  %v1421_v13 = vpop.permute.xlu1 %1420 }
  0xb9   :  { %775 = vmatprep.mubr.bf16.mxu0 %v8920_v12  ;;  %828 = vmatprep.mubr.bf16.mxu1 %v8920_v12 }
  0xc0   :  { %5304 = vmatmul.mubr.msk.bf16.vlgmr.msra.gmra.mxu0 %vm211_vm3, %v5503_v42  ;;  %5307 = vmatmul.mubr.msk.bf16.vlgmr.msra.gmra.mxu1 %vm211_vm3, %v5503_v42  ;;  %v1425_v42 = vpop.permute.xlu1 %1424 }
  0xc1   :  { %785 = vmatprep.mubr.bf16.mxu0 %v8920_v12  ;;  %838 = vmatprep.mubr.bf16.mxu1 %v8920_v12 }
  0xc2   :  { %917 = vmatpush1.bf16.msra.mxu0 %v891_v43  ;;  %970 = vmatpush1.bf16.msra.mxu1 %v897_v44  ;;  %v1423_v43 = vpop.permute.xlu0 %1422  ;;  %v1255_v44 = vmul.f32 %v5953_v30, %v1232_v35 }
  0xc3   :  { %5327 = vmatprep.subr.msk.bf16.mxu0 %vm218_vm2, %v1068_v46  ;;  %5330 = vmatprep.subr.msk.bf16.mxu1 %vm218_vm2, %v1070_v45  ;;  %v1257_v45 = vmul.f32 %v5964_v36, %v1230_v40  ;;  %v5980_v46 = vrot.slane %v5263_v41, %v5693_v17  ;;  %v1428_v55 = vsel %vm1426_vm8, %v1421_v13, %v1423_v43 }
  0xc4   :  { %v1264_v56 = vpack.c.bf16 %v1255_v44, %v1255_v44  ;;  %v1453_v60 = vmul.f32 %v5983_v47, %v1428_v55  ;;  %v1618_v6 = vpop.permute.xlu1 %1617  ;;  %v6035_v40 = vrot.slane %v5264_v31, %v5697_v19 }
  0xc5   :  { %9155 = vst [vmem:[#allocation30_spill] sm:$0xff] %v5980_v46  ;;  %v1266_v57 = vpack.c.bf16 %v1257_v45, %v1257_v45  ;;  %v5509_v45 = vld [vmem:[%s8910_s3 + $0x60] sm:$0xff]  }
  0xc6   :  { %v1285_v2 = vsel %vm218_vm2, %v1264_v56, 0  ;;  %v1462_v5 = vpack.c.bf16 %v1453_v60, %v1453_v60  ;;  %v1616_v7 = vpop.permute.xlu0 %1615  ;;  %9160 = vst [vmem:[#allocation35_spill] sm:$0xff] %v6035_v40  ;;  %v6057_v56 = vrot.slane %v5264_v31, %v5695_v18  ;;  %v5510_v60 = vld [vmem:[%s8910_s3 + $0x68] sm:$0xff]  }
  0xc7   :  { %v1291_v3 = vsel %vm218_vm2, %v1266_v57, 0  ;;  %v1626_v57 = vsel %vm1623_vm9, %v1616_v7, %v1618_v6 }
  0xc8   :  { %5305 = vmatmul.mubr.msk.bf16.gmra.mxu0 %vm211_vm3, %v5504_v54  ;;  %5308 = vmatmul.mubr.msk.bf16.gmra.mxu1 %vm211_vm3, %v5504_v54  ;;  %v1430_v54 = vsel %vm1426_vm8, %v1425_v42, %v1419_v10  ;;  %9161 = vst [vmem:[#allocation36_spill] sm:$0xff] %v6057_v56 }
  0xc9   :  { %934 = vmatprep.mubr.bf16.mxu0 %v8920_v12  ;;  %987 = vmatprep.mubr.bf16.mxu1 %v8920_v12  ;;  %v1455_v58 = vmul.f32 %v5980_v46, %v1430_v54 }
  0xcb   :  { %v1464_v4 = vpack.c.bf16 %v1455_v58, %v1455_v58  ;;  %v6062_v58 = vrot.slane %v5264_v31, %v5702_v21 }
  0xcd   :  { %9162 = vst [vmem:[#allocation37_spill] sm:$0xff] %v6062_v58 }
  0xd0   :  { %5316 = vmatmul.mubr.msk.bf16.vlgmr.msra.gmra.mxu0 %vm211_vm3, %v5505_v14  ;;  %5319 = vmatmul.mubr.msk.bf16.vlgmr.msra.gmra.mxu1 %vm211_vm3, %v5505_v14  ;;  %v6011_v14 = vrot.slane %v5263_v41, %v5695_v18  ;;  %v1649_v18 = vmul.f32 %v6057_v56, %v1626_v57 }
  0xd1   :  { %1114 = vmatpush1.bf16.msra.mxu0 %v1088_v15  ;;  %944 = vmatprep.mubr.bf16.mxu0 %v8920_v12  ;;  %v1429_v15 = vsel %vm1426_vm8, %v1419_v10, %v1421_v13  ;;  %v1622_v13 = vpop.permute.xlu1 %1621  ;;  %v1620_v10 = vpop.permute.xlu0 %1619 }
  0xd2   :  { %997 = vmatprep.mubr.bf16.mxu1 %v8920_v12  ;;  %1167 = vmatpush1.bf16.msra.mxu1 %v1094_v20  ;;  %9157 = vst [vmem:[#allocation32_spill] sm:$0xff] %v6011_v14  ;;  %v6016_v20 = vrot.slane %v5263_v41, %v5702_v21  ;;  %v1452_v34 = vmul.f32 %v6011_v14, %v1429_v15  ;;  %v5513_v15 = vld [vmem:[%s8910_s3 + $0x80] sm:$0xff]  }
  0xd3   :  { %5339 = vmatprep.subr.msk.bf16.mxu0 %vm218_vm2, %v1265_v29  ;;  %5342 = vmatprep.subr.msk.bf16.mxu1 %vm218_vm2, %v1267_v28  ;;  %v5508_v28 = vld [vmem:[%s8910_s3 + $0x58] sm:$0xff]   ;;  %v1427_v29 = vsel %vm1426_vm8, %v1423_v43, %v1425_v42  ;;  %v1627_v41 = vsel %vm1623_vm9, %v1622_v13, %v1616_v7  ;;  %v1625_v42 = vsel %vm1623_vm9, %v1618_v6, %v1620_v10 }
  0xd4   :  { %9158 = vst [vmem:[#allocation33_spill] sm:$0xff] %v6016_v20  ;;  %v1454_v35 = vmul.f32 %v6016_v20, %v1427_v29  ;;  %v1461_v43 = vpack.c.bf16 %v1452_v34, %v1452_v34  ;;  %v1650_v19 = vmul.f32 %v6035_v40, %v1625_v42  ;;  %v1658_v21 = vpack.c.bf16 %v1649_v18, %v1649_v18  ;;  %v5512_v7 = vld [vmem:[%s8910_s3 + $0x78] sm:$0xff]  }
  0xd6   :  { %v1482_v50 = vsel %vm218_vm2, %v1461_v43, 0  ;;  %v1659_v55 = vpack.c.bf16 %v1650_v19, %v1650_v19 }
  0xd8   :  { %5317 = vmatmul.mubr.msk.bf16.gmra.mxu0 %vm211_vm3, %v5506_v38  ;;  %5320 = vmatmul.mubr.msk.bf16.gmra.mxu1 %vm211_vm3, %v5506_v38  ;;  %v6032_v38 = vrot.slane %v5264_v31, %v5693_v17  ;;  %v1463_v17 = vpack.c.bf16 %v1454_v35, %v1454_v35 }
  0xd9   :  { %1131 = vmatprep.mubr.bf16.mxu0 %v8920_v12  ;;  %1184 = vmatprep.mubr.bf16.mxu1 %v8920_v12 }
  0xda   :  { %9159 = vst [vmem:[#allocation34_spill] sm:$0xff] %v6032_v38  ;;  %v1652_v44 = vmul.f32 %v6032_v38, %v1627_v41  ;;  %v1488_v11 = vsel %vm218_vm2, %v1463_v17, 0 }
  0xdc   :  { %v1661_v54 = vpack.c.bf16 %v1652_v44, %v1652_v44 }
  0xe0   :  { %5328 = vmatmul.mubr.msk.bf16.vlgmr.msra.gmra.mxu0 %vm211_vm3, %v5507_v62  ;;  %5331 = vmatmul.mubr.msk.bf16.vlgmr.msra.gmra.mxu1 %vm211_vm3, %v5507_v62  ;;  %v1624_v62 = vsel %vm1623_vm9, %v1620_v10, %v1622_v13 }
  0xe1   :  { %1311 = vmatpush1.bf16.msra.mxu0 %v1285_v2  ;;  %1141 = vmatprep.mubr.bf16.mxu0 %v8920_v12  ;;  %v1651_v2 = vmul.f32 %v6062_v58, %v1624_v62 }
  0xe2   :  { %1194 = vmatprep.mubr.bf16.mxu1 %v8920_v12  ;;  %1364 = vmatpush1.bf16.msra.mxu1 %v1291_v3 }
  0xe3   :  { %5351 = vmatprep.subr.msk.bf16.mxu0 %vm218_vm2, %v1462_v5  ;;  %5354 = vmatprep.subr.msk.bf16.mxu1 %vm218_vm2, %v1464_v4  ;;  %v1660_v3 = vpack.c.bf16 %v1651_v2, %v1651_v2  ;;  %v5511_v4 = vld [vmem:[%s8910_s3 + $0x70] sm:$0xff]   ;;  %v1679_v5 = vsel %vm218_vm2, %v1658_v21, 0 }
  0xe5   :  { %v1685_v6 = vsel %vm218_vm2, %v1660_v3, 0 }
  0xe8   :  { %5329 = vmatmul.mubr.msk.bf16.gmra.mxu0 %vm211_vm3, %v5508_v28  ;;  %5332 = vmatmul.mubr.msk.bf16.gmra.mxu1 %vm211_vm3, %v5508_v28  ;;  %v5514_v28 = vld [vmem:[%s8910_s3 + $0x88] sm:$0xff]  }
  0xe9   :  { %1328 = vmatprep.mubr.bf16.mxu0 %v8920_v12  ;;  %1381 = vmatprep.mubr.bf16.mxu1 %v8920_v12 }
  0xf0   :  { %5340 = vmatmul.mubr.msk.bf16.vlgmr.msra.gmra.mxu0 %vm211_vm3, %v5509_v45  ;;  %5343 = vmatmul.mubr.msk.bf16.vlgmr.msra.gmra.mxu1 %vm211_vm3, %v5509_v45 }
  0xf1   :  { %1508 = vmatpush1.bf16.msra.mxu0 %v1482_v50  ;;  %1338 = vmatprep.mubr.bf16.mxu0 %v8920_v12 }
  0xf2   :  { %1391 = vmatprep.mubr.bf16.mxu1 %v8920_v12  ;;  %1561 = vmatpush1.bf16.msra.mxu1 %v1488_v11 }
  0xf3   :  { %5363 = vmatprep.subr.msk.bf16.mxu0 %vm218_vm2, %v1659_v55  ;;  %5366 = vmatprep.subr.msk.bf16.mxu1 %vm218_vm2, %v1661_v54 }
  0xf8   :  { %5341 = vmatmul.mubr.msk.bf16.gmra.mxu0 %vm211_vm3, %v5510_v60  ;;  %5344 = vmatmul.mubr.msk.bf16.gmra.mxu1 %vm211_vm3, %v5510_v60 }
  0xf9   :  { %1525 = vmatprep.mubr.bf16.mxu0 %v8920_v12  ;;  %1578 = vmatprep.mubr.bf16.mxu1 %v8920_v12 }
 0x100   :  { %5352 = vmatmul.mubr.msk.bf16.vlgmr.msra.gmra.mxu0 %vm211_vm3, %v5511_v4  ;;  %5355 = vmatmul.mubr.msk.bf16.vlgmr.msra.gmra.mxu1 %vm211_vm3, %v5511_v4 }
 0x101   :  { %1705 = vmatpush1.bf16.msra.mxu0 %v1679_v5  ;;  %1535 = vmatprep.mubr.bf16.mxu0 %v8920_v12 }
 0x102   :  { %1588 = vmatprep.mubr.bf16.mxu1 %v8920_v12  ;;  %1758 = vmatpush1.bf16.msra.mxu1 %v1685_v6 }
 0x108   :  { %5353 = vmatmul.mubr.msk.bf16.gmra.mxu0 %vm211_vm3, %v5512_v7  ;;  %5356 = vmatmul.mubr.msk.bf16.gmra.mxu1 %vm211_vm3, %v5512_v7 }
 0x109   :  { %1722 = vmatprep.mubr.bf16.mxu0 %v8920_v12  ;;  %1775 = vmatprep.mubr.bf16.mxu1 %v8920_v12 }
 0x110   :  { %5364 = vmatmul.mubr.msk.bf16.vlgmr.msra.gmra.mxu0 %vm211_vm3, %v5513_v15  ;;  %5367 = vmatmul.mubr.msk.bf16.vlgmr.msra.gmra.mxu1 %vm211_vm3, %v5513_v15 }
 0x111   :  { %1732 = vmatprep.mubr.bf16.mxu0 %v8920_v12  ;;  %1785 = vmatprep.mubr.bf16.mxu1 %v8920_v12 }
 0x118   :  { %5365 = vmatmul.mubr.msk.bf16.gmra.mxu0 %vm211_vm3, %v5514_v28  ;;  %5368 = vmatmul.mubr.msk.bf16.gmra.mxu1 %vm211_vm3, %v5514_v28 }
 0x119   :  { %2104 = vmatprep.mubr.bf16.mxu0 %v8920_v12  ;;  %2157 = vmatprep.mubr.bf16.mxu1 %v8920_v12 }
 0x150   :  { %v265_v29 = vpop.f32.mrf.mxu0  ;;  %v318_v31 = vpop.f32.mrf.mxu1 }
 0x152   :  { %v267_v13 = vpop.f32.mrf.mxu0  ;;  %v320_v10 = vpop.f32.mrf.mxu1 }
 0x154   :  { %v269_v34 = vpop.f32.mrf.mxu0  ;;  %v322_v35 = vpop.f32.mrf.mxu1 }
 0x156   :  { %v6107_v41 = vpop.f32.mrf.mxu0  ;;  %v6109_v42 = vpop.f32.mrf.mxu1 }
 0x158   :  { %v275_v43 = vpop.f32.mrf.mxu0  ;;  %v328_v17 = vpop.f32.mrf.mxu1 }
 0x15a   :  { %v277_v44 = vpop.f32.mrf.mxu0  ;;  %v330_v19 = vpop.f32.mrf.mxu1 }
 0x15c   :  { %v279_v45 = vpop.f32.mrf.mxu0  ;;  %v332_v50 = vpop.f32.mrf.mxu1 }
 0x15e   :  { %v6111_v11 = vpop.f32.mrf.mxu0  ;;  %v6113_v54 = vpop.f32.mrf.mxu1 }
 0x15f   :  { %9163 = vst [vmem:[#allocation38_spill] sm:$0xff] %v6113_v54 }
 0x160   :  { %v399_v55 = vpop.f32.mrf.mxu0  ;;  %v452_v57 = vpop.f32.mrf.mxu1 }
 0x161   :  { %v400_v60 = vadd.f32 %v399_v55, %v265_v29  ;;  %v453_v62 = vadd.f32 %v452_v57, %v318_v31 }
 0x162   :  { %v401_v18 = vpop.f32.mrf.mxu0  ;;  %v454_v2 = vpop.f32.mrf.mxu1 }
 0x163   :  { %v402_v21 = vadd.f32 %v401_v18, %v267_v13  ;;  %v455_v3 = vadd.f32 %v454_v2, %v320_v10 }
 0x164   :  { %v403_v4 = vpop.f32.mrf.mxu0  ;;  %v456_v5 = vpop.f32.mrf.mxu1 }
 0x165   :  { %v404_v6 = vadd.f32 %v403_v4, %v269_v34  ;;  %v457_v7 = vadd.f32 %v456_v5, %v322_v35 }
 0x166   :  { %v6115_v15 = vpop.f32.mrf.mxu0  ;;  %v6117_v28 = vpop.f32.mrf.mxu1 }
 0x168   :  { %v409_v12 = vpop.f32.mrf.mxu0  ;;  %v462_v38 = vpop.f32.mrf.mxu1 }
 0x169   :  { %v410_v58 = vadd.f32 %v409_v12, %v275_v43  ;;  %v463_v40 = vadd.f32 %v462_v38, %v328_v17 }
 0x16a   :  { %v411_v56 = vpop.f32.mrf.mxu0  ;;  %v464_v46 = vpop.f32.mrf.mxu1 }
 0x16b   :  { %v412_v29 = vadd.f32 %v411_v56, %v277_v44  ;;  %v465_v31 = vadd.f32 %v464_v46, %v330_v19 }
 0x16c   :  { %v413_v55 = vpop.f32.mrf.mxu0  ;;  %v466_v57 = vpop.f32.mrf.mxu1 }
 0x16d   :  { %v414_v13 = vadd.f32 %v413_v55, %v279_v45  ;;  %v467_v10 = vadd.f32 %v466_v57, %v332_v50 }
 0x16e   :  { %v6119_v18 = vpop.f32.mrf.mxu0  ;;  %v6121_v34 = vpop.f32.mrf.mxu1 }
 0x16f   :  { %9164 = vst [vmem:[#allocation39_spill] sm:$0xff] %v6121_v34 }
 0x170   :  { %v580_v35 = vpop.f32.mrf.mxu0  ;;  %v633_v2 = vpop.f32.mrf.mxu1 }
 0x171   :  { %v652_v4 = vadd.f32 %v580_v35, %v400_v60  ;;  %v654_v5 = vadd.f32 %v633_v2, %v453_v62 }
 0x172   :  { %v582_v20 = vpop.f32.mrf.mxu0  ;;  %v635_v47 = vpop.f32.mrf.mxu1 }
 0x173   :  { %v653_v12 = vadd.f32 %v582_v20, %v402_v21  ;;  %v655_v38 = vadd.f32 %v635_v47, %v455_v3 }
 0x174   :  { %v584_v43 = vpop.f32.mrf.mxu0  ;;  %v637_v17 = vpop.f32.mrf.mxu1 }
 0x175   :  { %v656_v56 = vadd.f32 %v584_v43, %v404_v6  ;;  %v658_v46 = vadd.f32 %v637_v17, %v457_v7 }
 0x176   :  { %v6123_v44 = vpop.f32.mrf.mxu0  ;;  %v6125_v19 = vpop.f32.mrf.mxu1 }
 0x178   :  { %v590_v45 = vpop.f32.mrf.mxu0  ;;  %v643_v50 = vpop.f32.mrf.mxu1 }
 0x179   :  { %v660_v55 = vadd.f32 %v590_v45, %v410_v58  ;;  %v662_v57 = vadd.f32 %v643_v50, %v463_v40 }
 0x17a   :  { %v592_v14 = vpop.f32.mrf.mxu0  ;;  %v645_v63 = vpop.f32.mrf.mxu1 }
 0x17b   :  { %v661_v60 = vadd.f32 %v592_v14, %v412_v29  ;;  %v663_v62 = vadd.f32 %v645_v63, %v465_v31 }
 0x17c   :  { %v594_v35 = vpop.f32.mrf.mxu0  ;;  %v647_v2 = vpop.f32.mrf.mxu1 }
 0x17d   :  { %v664_v20 = vadd.f32 %v594_v35, %v414_v13  ;;  %v666_v47 = vadd.f32 %v647_v2, %v467_v10 }
 0x17e   :  { %v6127_v21 = vpop.f32.mrf.mxu0  ;;  %v6129_v3 = vpop.f32.mrf.mxu1 }
 0x17f   :  { %9165 = vst [vmem:[#allocation40_spill] sm:$0xff] %v6127_v21  ;;  %9166 = vst [vmem:[#allocation41_spill] sm:$0xff] %v6129_v3 }
 0x180   :  { %v777_v6 = vpop.f32.mrf.mxu0  ;;  %v830_v7 = vpop.f32.mrf.mxu1 }
 0x181   :  { %v6131_v43 = vadd.f32 %v777_v6, %v652_v4  ;;  %v6133_v17 = vadd.f32 %v830_v7, %v654_v5 }
 0x182   :  { %v779_v58 = vpop.f32.mrf.mxu0  ;;  %v832_v40 = vpop.f32.mrf.mxu1 }
 0x183   :  { %v850_v45 = vadd.f32 %v779_v58, %v653_v12  ;;  %v852_v50 = vadd.f32 %v832_v40, %v655_v38 }
 0x184   :  { %v781_v14 = vpop.f32.mrf.mxu0  ;;  %v834_v63 = vpop.f32.mrf.mxu1 }
 0x185   :  { %v6135_v29 = vadd.f32 %v781_v14, %v656_v56  ;;  %v6137_v31 = vadd.f32 %v834_v63, %v658_v46 }
 0x186   :  { %v6139_v13 = vpop.f32.mrf.mxu0  ;;  %v6141_v10 = vpop.f32.mrf.mxu1 }
 0x188   :  { %v787_v35 = vpop.f32.mrf.mxu0  ;;  %v840_v2 = vpop.f32.mrf.mxu1 }
 0x189   :  { %v857_v4 = vadd.f32 %v787_v35, %v660_v55  ;;  %v859_v6 = vadd.f32 %v840_v2, %v662_v57 }
 0x18a   :  { %v789_v5 = vpop.f32.mrf.mxu0  ;;  %v842_v7 = vpop.f32.mrf.mxu1 }
 0x18b   :  { %v858_v36 = vadd.f32 %v789_v5, %v661_v60  ;;  %v860_v1 = vadd.f32 %v842_v7, %v663_v62 }
 0x18c   :  { %v791_v12 = vpop.f32.mrf.mxu0  ;;  %v844_v38 = vpop.f32.mrf.mxu1 }
 0x18d   :  { %v861_v58 = vadd.f32 %v791_v12, %v664_v20  ;;  %v863_v40 = vadd.f32 %v844_v38, %v666_v47 }
 0x18e   :  { %v6143_v56 = vpop.f32.mrf.mxu0  ;;  %v6145_v46 = vpop.f32.mrf.mxu1 }
 0x18f   :  { %9167 = vst [vmem:[#allocation42_spill] sm:$0xff] %v6143_v56  ;;  %9168 = vst [vmem:[#allocation43_spill] sm:$0xff] %v6145_v46 }
 0x190   :  { %v6147_v14 = vpop.f32.mrf.mxu0  ;;  %v6149_v63 = vpop.f32.mrf.mxu1 }
 0x192   :  { %v938_v30 = vpop.f32.mrf.mxu0  ;;  %v991_v32 = vpop.f32.mrf.mxu1 }
 0x193   :  { %v1009_v55 = vadd.f32 %v938_v30, %v850_v45  ;;  %v1011_v57 = vadd.f32 %v991_v32, %v852_v50 }
 0x194   :  { %v6151_v35 = vpop.f32.mrf.mxu0  ;;  %v6153_v60 = vpop.f32.mrf.mxu1 }
 0x196   :  { %v6155_v62 = vpop.f32.mrf.mxu0  ;;  %v6157_v20 = vpop.f32.mrf.mxu1 }
 0x198   :  { %v946_v47 = vpop.f32.mrf.mxu0  ;;  %v999_v2 = vpop.f32.mrf.mxu1 }
 0x199   :  { %v1016_v5 = vadd.f32 %v946_v47, %v857_v4  ;;  %v1018_v7 = vadd.f32 %v999_v2, %v859_v6 }
 0x19a   :  { %v948_v12 = vpop.f32.mrf.mxu0  ;;  %v1001_v38 = vpop.f32.mrf.mxu1 }
 0x19b   :  { %v1017_v53 = vadd.f32 %v948_v12, %v858_v36  ;;  %v1019_v9 = vadd.f32 %v1001_v38, %v860_v1 }
 0x19c   :  { %v950_v33 = vpop.f32.mrf.mxu0  ;;  %v1003_v59 = vpop.f32.mrf.mxu1 }
 0x19d   :  { %v1020_v30 = vadd.f32 %v950_v33, %v861_v58  ;;  %v1022_v32 = vadd.f32 %v1003_v59, %v863_v40 }
 0x19e   :  { %v6159_v45 = vpop.f32.mrf.mxu0  ;;  %v6161_v50 = vpop.f32.mrf.mxu1 }
 0x19f   :  { %9169 = vst [vmem:[#allocation44_spill] sm:$0xff] %v6159_v45  ;;  %9170 = vst [vmem:[#allocation45_spill] sm:$0xff] %v6161_v50 }
 0x1a0   :  { %v6163_v49 = vpop.f32.mrf.mxu0  ;;  %v6165_v61 = vpop.f32.mrf.mxu1 }
 0x1a2   :  { %v1135_v39 = vpop.f32.mrf.mxu0  ;;  %v1188_v22 = vpop.f32.mrf.mxu1 }
 0x1a3   :  { %v1206_v4 = vadd.f32 %v1135_v39, %v1009_v55  ;;  %v1208_v6 = vadd.f32 %v1188_v22, %v1011_v57 }
 0x1a4   :  { %v6167_v47 = vpop.f32.mrf.mxu0  ;;  %v6169_v36 = vpop.f32.mrf.mxu1 }
 0x1a6   :  { %v6171_v1 = vpop.f32.mrf.mxu0  ;;  %v6173_v33 = vpop.f32.mrf.mxu1 }
 0x1a8   :  { %v1143_v59 = vpop.f32.mrf.mxu0  ;;  %v1196_v58 = vpop.f32.mrf.mxu1 }
 0x1a9   :  { %v1213_v40 = vadd.f32 %v1143_v59, %v1016_v5  ;;  %v1215_v2 = vadd.f32 %v1196_v58, %v1018_v7 }
 0x1aa   :  { %v1145_v12 = vpop.f32.mrf.mxu0  ;;  %v1198_v38 = vpop.f32.mrf.mxu1 }
 0x1ab   :  { %v1214_v23 = vadd.f32 %v1145_v12, %v1017_v53  ;;  %v1216_v8 = vadd.f32 %v1198_v38, %v1019_v9 }
 0x1ac   :  { %v1147_v0 = vpop.f32.mrf.mxu0  ;;  %v1200_v51 = vpop.f32.mrf.mxu1 }
 0x1ad   :  { %v1217_v39 = vadd.f32 %v1147_v0, %v1020_v30  ;;  %v1219_v22 = vadd.f32 %v1200_v51, %v1022_v32 }
 0x1ae   :  { %v6175_v55 = vpop.f32.mrf.mxu0  ;;  %v6177_v57 = vpop.f32.mrf.mxu1 }
 0x1af   :  { %9171 = vst [vmem:[#allocation46_spill] sm:$0xff] %v6175_v55  ;;  %9172 = vst [vmem:[#allocation47_spill] sm:$0xff] %v6177_v57 }
 0x1b0   :  { %v1330_v52 = vpop.f32.mrf.mxu0  ;;  %v1383_v48 = vpop.f32.mrf.mxu1 }
 0x1b2   :  { %v1332_v37 = vpop.f32.mrf.mxu0  ;;  %v1385_v27 = vpop.f32.mrf.mxu1 }
 0x1b3   :  { %v6179_v24 = vadd.f32 %v1332_v37, %v1206_v4  ;;  %v6181_v5 = vadd.f32 %v1385_v27, %v1208_v6 }
 0x1b4   :  { %v1334_v7 = vpop.f32.mrf.mxu0  ;;  %v1387_v59 = vpop.f32.mrf.mxu1 }
 0x1b6   :  { %v6183_v53 = vpop.f32.mrf.mxu0  ;;  %v6185_v9 = vpop.f32.mrf.mxu1 }
 0x1b8   :  { %v1340_v0 = vpop.f32.mrf.mxu0  ;;  %v1393_v51 = vpop.f32.mrf.mxu1 }
 0x1b9   :  { %v1410_v30 = vadd.f32 %v1340_v0, %v1213_v40  ;;  %v1412_v32 = vadd.f32 %v1393_v51, %v1215_v2 }
 0x1ba   :  { %v1342_v58 = vpop.f32.mrf.mxu0  ;;  %v1395_v12 = vpop.f32.mrf.mxu1 }
 0x1bb   :  { %v1411_v38 = vadd.f32 %v1342_v58, %v1214_v23  ;;  %v1413_v25 = vadd.f32 %v1395_v12, %v1216_v8  ;;  %v6203_v58 = vpop.permute.xlu1 %1833 }
 0x1bc   :  { %v1344_v26 = vpop.f32.mrf.mxu0  ;;  %v1397_v16 = vpop.f32.mrf.mxu1 }
 0x1bd   :  { %v1414_v37 = vadd.f32 %v1344_v26, %v1217_v39  ;;  %v1416_v4 = vadd.f32 %v1397_v16, %v1219_v22  ;;  %v1008_v16 = vadd.f32 %v6147_v14, %v6131_v43  ;;  %v1010_v26 = vadd.f32 %v6149_v63, %v6133_v17 }
 0x1be   :  { %v6187_v27 = vpop.f32.mrf.mxu0  ;;  %v6189_v6 = vpop.f32.mrf.mxu1  ;;  %v1012_v63 = vadd.f32 %v6151_v35, %v6135_v29 }
 0x1bf   :  { %9173 = vst [vmem:[#allocation48_spill] sm:$0xff] %v6187_v27  ;;  %9174 = vst [vmem:[#allocation49_spill] sm:$0xff] %v6189_v6  ;;  %v1205_v27 = vadd.f32 %v6163_v49, %v1008_v16  ;;  %v1207_v45 = vadd.f32 %v6165_v61, %v1010_v26  ;;  %v1014_v49 = vadd.f32 %v6153_v60, %v6137_v31  ;;  %v6230_v31 = vstv %s8913_s9 }
 0x1c0   :  { %v1527_v57 = vpop.f32.mrf.mxu0  ;;  %v1580_v50 = vpop.f32.mrf.mxu1 }
 0x1c1   :  { %v1402_v43 = vadd.f32 %v1330_v52, %v1205_v27  ;;  %v1404_v14 = vadd.f32 %v1383_v48, %v1207_v45  ;;  %v1209_v48 = vadd.f32 %v6167_v47, %v1012_v63  ;;  %v1211_v52 = vadd.f32 %v6169_v36, %v1014_v49  ;;  %v1829_v45 = vpop.permute.xlu0 %1828 }
 0x1c2   :  { %v6191_v55 = vpop.f32.mrf.mxu0  ;;  %v6193_v46 = vpop.f32.mrf.mxu1 }
 0x1c3   :  { %v1406_v35 = vadd.f32 %v1334_v7, %v1209_v48 }
 0x1c4   :  { %v1531_v40 = vpop.f32.mrf.mxu0  ;;  %v1584_v2 = vpop.f32.mrf.mxu1 }
 0x1c6   :  { %v6195_v0 = vpop.f32.mrf.mxu0  ;;  %v6197_v23 = vpop.f32.mrf.mxu1 }
 0x1c8   :  { %v1537_v8 = vpop.f32.mrf.mxu0  ;;  %v1590_v51 = vpop.f32.mrf.mxu1 }
 0x1c9   :  { %v1607_v39 = vadd.f32 %v1537_v8, %v1410_v30  ;;  %v1609_v22 = vadd.f32 %v1590_v51, %v1412_v32  ;;  %v1601_v32 = vadd.f32 %v1580_v50, %v1404_v14  ;;  %v6246_v14 = vpop.permute.xlu0 %1823 }
 0x1ca   :  { %v1539_v12 = vpop.f32.mrf.mxu0  ;;  %v1592_v6 = vpop.f32.mrf.mxu1 }
 0x1cb   :  { %v6207_v3 = vadd.f32 %v1539_v12, %v1411_v38  ;;  %v6209_v56 = vadd.f32 %v1592_v6, %v1413_v25  ;;  %v1599_v25 = vadd.f32 %v1527_v57, %v1402_v43  ;;  %v6223_v38 = vpop.permute.xlu1 %1818  ;;  %v1603_v57 = vadd.f32 %v1531_v40, %v1406_v35 }
 0x1cc   :  { %v1541_v34 = vpop.f32.mrf.mxu0  ;;  %v1594_v54 = vpop.f32.mrf.mxu1 }
 0x1cd   :  { %v6211_v21 = vadd.f32 %v1541_v34, %v1414_v37  ;;  %v6213_v17 = vadd.f32 %v1594_v54, %v1416_v4  ;;  %v1408_v4 = vadd.f32 %v1387_v59, %v1211_v52 }
 0x1ce   :  { %v6219_v30 = vpop.f32.mrf.mxu1  ;;  %v6221_v61 = vpop.f32.mrf.mxu0 }
 0x1cf   :  { %v1605_v27 = vadd.f32 %v1584_v2, %v1408_v4 }
 0x1d0   :  { %v1724_v54 = vpop.f32.mrf.mxu0  ;;  %v1777_v34 = vpop.f32.mrf.mxu1 }
 0x1d1   :  { %v1796_v37 = vadd.f32 %v1724_v54, %v1599_v25  ;;  %v1798_v29 = vadd.f32 %v1777_v34, %v1601_v32 }
 0x1d2   :  { %v6232_v60 = vpop.f32.mrf.mxu1  ;;  %v6234_v50 = vpop.f32.mrf.mxu0 }
 0x1d3   :  { %v1836_v47 = vadd.f32 %v6223_v38, %v1796_v37  ;;  %v1838_v36 = vadd.f32 %v6223_v38, %v1798_v29 }
 0x1d4   :  { %v1728_v6 = vpop.f32.mrf.mxu0  ;;  %v1781_v8 = vpop.f32.mrf.mxu1 }
 0x1d5   :  { %vm1853_vm10 = vcmp.ge.f32.partialorder %v1836_v47, 0.0  ;;  %v1870_v7 = vmul.f32 %v6230_v31, %v1836_v47  ;;  %v1800_v59 = vadd.f32 %v1728_v6, %v1603_v57  ;;  %v1802_v51 = vadd.f32 %v1781_v8, %v1605_v27 }
 0x1d6   :  { %v6239_v16 = vpop.f32.mrf.mxu0  ;;  %v6241_v26 = vpop.f32.mrf.mxu1  ;;  %v1872_v12 = vmul.f32 %v6230_v31, %v1838_v36  ;;  %vm1855_vm11 = vcmp.ge.f32.partialorder %v1838_v36, 0.0 }
 0x1d7   :  { %v6244_v43 = vsel %vm1853_vm10, %v1836_v47, %v1870_v7  ;;  %v1840_v63 = vadd.f32 %v6246_v14, %v1800_v59  ;;  %v1842_v49 = vadd.f32 %v6246_v14, %v1802_v51 }
 0x1d8   :  { %v1787_v40 = vpop.f32.mrf.mxu1  ;;  %1978 = vrot.lane.b32.xlu1 %v6244_v43, %s5534_s25  ;;  %v1734_v2 = vpop.f32.mrf.mxu0  ;;  %v6252_v54 = vsel %vm1855_vm11, %v1838_v36, %v1872_v12 }
 0x1d9   :  { %v1806_v25 = vadd.f32 %v1787_v40, %v1609_v22  ;;  %v1804_v32 = vadd.f32 %v1734_v2, %v1607_v39  ;;  %vm1857_vm12 = vcmp.ge.f32.partialorder %v1840_v63, 0.0  ;;  %v1874_v34 = vmul.f32 %v6230_v31, %v1840_v63 }
 0x1da   :  { %v1736_v48 = vpop.f32.mrf.mxu0  ;;  %v1789_v52 = vpop.f32.mrf.mxu1  ;;  %v1876_v29 = vmul.f32 %v6230_v31, %v1842_v49  ;;  %vm1859_vm13 = vcmp.ge.f32.partialorder %v1842_v49, 0.0 }
 0x1db   :  { %v6257_v37 = vsel %vm1857_vm12, %v1840_v63, %v1874_v34  ;;  %v1846_v35 = vadd.f32 %v1829_v45, %v1806_v25  ;;  %v1844_v4 = vadd.f32 %v1829_v45, %v1804_v32  ;;  %v1805_v39 = vadd.f32 %v1736_v48, %v6207_v3 }
 0x1dc   :  { %1994 = vrot.lane.b32.xlu1 %v6252_v54, %s5534_s25  ;;  %9175 = vst [vmem:[#allocation50_spill] sm:$0xff] %v6257_v37  ;;  %v1791_v47 = vpop.f32.mrf.mxu1  ;;  %v1738_v57 = vpop.f32.mrf.mxu0  ;;  %v1807_v22 = vadd.f32 %v1789_v52, %v6209_v56  ;;  %1980 = vrot.lane.b32.xlu0 %v6257_v37, %s5534_s25  ;;  %v6270_v3 = vsel %vm1859_vm13, %v1842_v49, %v1876_v29 }
 0x1dd   :  { %vm1863_vm14 = vcmp.ge.f32.partialorder %v1846_v35, 0.0  ;;  %v1880_v36 = vmul.f32 %v6230_v31, %v1846_v35  ;;  %vm1861_vm15 = vcmp.ge.f32.partialorder %v1844_v4, 0.0  ;;  %v1878_v27 = vmul.f32 %v6230_v31, %v1844_v4 }
 0x1de   :  { %v1845_v6 = vadd.f32 %v1829_v45, %v1805_v39  ;;  %v1847_v8 = vadd.f32 %v1829_v45, %v1807_v22  ;;  %v1810_v7 = vadd.f32 %v1791_v47, %v6213_v17  ;;  %v1808_v59 = vadd.f32 %v1738_v57, %v6211_v21  ;;  %v9182_v57 = vld [vmem:[#allocation40_spill] sm:$0xff]  ;;  %v9183_v22 = vld [vmem:[#allocation38_spill] sm:$0xff] }
 0x1df   :  { %v6272_v56 = vsel %vm1863_vm14, %v1846_v35, %v1880_v36  ;;  %v6274_v51 = vsel %vm1861_vm15, %v1844_v4, %v1878_v27  ;;  %v406_v48 = vadd.f32 %v6115_v15, %v6107_v41  ;;  %v459_v34 = vadd.f32 %v6117_v28, %v6109_v42  ;;  %v9184_v36 = vld [vmem:[#allocation39_spill] sm:$0xff] }
 0x1e0   :  { %1902 = vrot.lane.b32.xlu1 %v6244_v43, %s5536_s1  ;;  %9176 = vst [vmem:[#allocation51_spill] sm:$0xff] %v6272_v56  ;;  %9177 = vst [vmem:[#allocation52_spill] sm:$0xff] %v6274_v51  ;;  %vm1862_vm2 = vcmp.ge.f32.partialorder %v1845_v6, 0.0  ;;  %v1879_v12 = vmul.f32 %v6230_v31, %v1845_v6  ;;  %vm1864_vm3 = vcmp.ge.f32.partialorder %v1847_v8, 0.0  ;;  %v1881_v40 = vmul.f32 %v6230_v31, %v1847_v8 }
 0x1e1   :  { %1996 = vrot.lane.b32.xlu0 %v6270_v3, %s5534_s25  ;;  %v1850_v21 = vadd.f32 %v6203_v58, %v1810_v7  ;;  %v1848_v17 = vadd.f32 %v6203_v58, %v1808_v59  ;;  %v657_v52 = vadd.f32 %v6123_v44, %v406_v48  ;;  %v659_v35 = vadd.f32 %v6125_v19, %v459_v34  ;;  %v9186_v7 = vld [vmem:[#allocation41_spill] sm:$0xff]  ;;  %v9191_v48 = vld [vmem:[#allocation48_spill] sm:$0xff]  ;;  %v1740_v34 = vpop.f32.mrf.mxu0 }
 0x1e2   :  { %v6282_v45 = vsel %vm1862_vm2, %v1845_v6, %v1879_v12  ;;  %v6284_v2 = vsel %vm1864_vm3, %v1847_v8, %v1881_v40  ;;  %v1600_v15 = vadd.f32 %v6191_v55, %v6179_v24  ;;  %v416_v47 = vadd.f32 %v6119_v18, %v6111_v11  ;;  %v9185_v6 = vld [vmem:[#allocation42_spill] sm:$0xff]  ;;  %v9187_v12 = vld [vmem:[#allocation44_spill] sm:$0xff]  ;;  %v9188_v18 = vld [vmem:[#allocation43_spill] sm:$0xff] }
 0x1e3   :  { %9178 = vst [vmem:[#allocation53_spill] sm:$0xff] %v6282_v45  ;;  %9179 = vst [vmem:[#allocation54_spill] sm:$0xff] %v6284_v2  ;;  %vm1867_vm10 = vcmp.ge.f32.partialorder %v1850_v21, 0.0  ;;  %v1884_v63 = vmul.f32 %v6230_v31, %v1850_v21  ;;  %vm1865_vm11 = vcmp.ge.f32.partialorder %v1848_v17, 0.0  ;;  %v1882_v49 = vmul.f32 %v6230_v31, %v1848_v17 }
 0x1e4   :  { %1918 = vrot.lane.b32.xlu1 %v6252_v54, %s5536_s1  ;;  %v854_v29 = vadd.f32 %v6139_v13, %v657_v52  ;;  %v856_v44 = vadd.f32 %v6141_v10, %v659_v35  ;;  %v1797_v42 = vadd.f32 %v6234_v50, %v1600_v15  ;;  %v1602_v13 = vadd.f32 %v6193_v46, %v6181_v5  ;;  %v9193_v15 = vld [vmem:[#allocation49_spill] sm:$0xff] }
 0x1e5   :  { %1904 = vrot.lane.b32.xlu0 %v6257_v37, %s5536_s1  ;;  %v6292_v25 = vsel %vm1867_vm10, %v1850_v21, %v1884_v63  ;;  %v6294_v32 = vsel %vm1865_vm11, %v1848_v17, %v1882_v49  ;;  %v665_v39 = vadd.f32 %v9182_v57, %v416_v47  ;;  %v469_v27 = vadd.f32 %v9184_v36, %v9183_v22  ;;  %v9189_v21 = vld [vmem:[#allocation46_spill] sm:$0xff]  ;;  %v9190_v63 = vld [vmem:[#allocation45_spill] sm:$0xff] }
 0x1e6   :  { %9180 = vst [vmem:[#allocation55_spill] sm:$0xff] %v6292_v25  ;;  %9181 = vst [vmem:[#allocation56_spill] sm:$0xff] %v6294_v32  ;;  %v1013_v41 = vadd.f32 %v6155_v62, %v854_v29  ;;  %v1015_v28 = vadd.f32 %v6157_v20, %v856_v44  ;;  %v1799_v62 = vadd.f32 %v6232_v60, %v1602_v13  ;;  %v9192_v29 = vld [vmem:[#allocation47_spill] sm:$0xff]  ;;  %vm2065_vm10 = vcmask 261120  }
 0x1e7   :  { %v862_v8 = vadd.f32 %v9185_v6, %v665_v39  ;;  %v667_v59 = vadd.f32 %v9186_v7, %v469_v27 }
 0x1e8   :  { %2300 = vrot.lane.b32.xlu1 %v6244_v43, %s5537_s26  ;;  %v1210_v4 = vadd.f32 %v6171_v1, %v1013_v41  ;;  %v1212_v24 = vadd.f32 %v6173_v33, %v1015_v28  ;;  %v1837_v1 = vadd.f32 %v6223_v38, %v1797_v42  ;;  %v1839_v33 = vadd.f32 %v6223_v38, %v1799_v62  ;;  %v1793_v42 = vpop.f32.mrf.mxu1 }
 0x1e9   :  { %1920 = vrot.lane.b32.xlu0 %v6270_v3, %s5536_s1  ;;  %v1021_v11 = vadd.f32 %v9187_v12, %v862_v8  ;;  %v864_v40 = vadd.f32 %v9188_v18, %v667_v59 }
 0x1ea   :  { %v1407_v19 = vadd.f32 %v6183_v53, %v1210_v4  ;;  %v1409_v20 = vadd.f32 %v6185_v9, %v1212_v24  ;;  %v1871_v5 = vmul.f32 %v6230_v31, %v1837_v1  ;;  %vm1854_vm12 = vcmp.ge.f32.partialorder %v1837_v1, 0.0 }
 0x1eb   :  { %v1873_v9 = vmul.f32 %v6230_v31, %v1839_v33  ;;  %vm1856_vm13 = vcmp.ge.f32.partialorder %v1839_v33, 0.0  ;;  %v1218_v17 = vadd.f32 %v9189_v21, %v1021_v11  ;;  %v1023_v49 = vadd.f32 %v9190_v63, %v864_v40 }
 0x1ec   :  { %2316 = vrot.lane.b32.xlu1 %v6252_v54, %s5537_s26  ;;  %v1604_v10 = vadd.f32 %v6195_v0, %v1407_v19  ;;  %v1606_v46 = vadd.f32 %v6197_v23, %v1409_v20  ;;  %v6349_v60 = vsel %vm1854_vm12, %v1837_v1, %v1871_v5 }
 0x1ed   :  { %2302 = vrot.lane.b32.xlu0 %v6257_v37, %s5537_s26  ;;  %v6357_v50 = vsel %vm1856_vm13, %v1839_v33, %v1873_v9  ;;  %v1415_v52 = vadd.f32 %v9191_v48, %v1218_v17  ;;  %v1220_v35 = vadd.f32 %v9192_v29, %v1023_v49 }
 0x1ee   :  { %v1801_v55 = vadd.f32 %v6239_v16, %v1604_v10  ;;  %v1803_v0 = vadd.f32 %v6241_v26, %v1606_v46 }
 0x1ef   :  { %v1612_v41 = vadd.f32 %v6221_v61, %v1415_v52  ;;  %v1417_v44 = vadd.f32 %v9193_v15, %v1220_v35 }
 0x1f0   :  { %2515 = vrot.lane.b32.xlu1 %v6244_v43, %s5538_s27  ;;  %v1841_v53 = vadd.f32 %v6246_v14, %v1801_v55  ;;  %v1843_v38 = vadd.f32 %v6246_v14, %v1803_v0 }
 0x1f1   :  { %2318 = vrot.lane.b32.xlu0 %v6270_v3, %s5537_s26  ;;  %v1809_v4 = vadd.f32 %v1740_v34, %v1612_v41  ;;  %v1614_v28 = vadd.f32 %v6219_v30, %v1417_v44 }
 0x1f2   :  { %v1875_v23 = vmul.f32 %v6230_v31, %v1841_v53  ;;  %vm1858_vm14 = vcmp.ge.f32.partialorder %v1841_v53, 0.0  ;;  %v1877_v26 = vmul.f32 %v6230_v31, %v1843_v38  ;;  %vm1860_vm15 = vcmp.ge.f32.partialorder %v1843_v38, 0.0 }
 0x1f3   :  { %v1849_v19 = vadd.f32 %v6203_v58, %v1809_v4  ;;  %v1811_v13 = vadd.f32 %v1793_v42, %v1614_v28 }
 0x1f4   :  { %2531 = vrot.lane.b32.xlu1 %v6252_v54, %s5538_s27  ;;  %v6361_v16 = vsel %vm1858_vm14, %v1841_v53, %v1875_v23  ;;  %v6368_v14 = vsel %vm1860_vm15, %v1843_v38, %v1877_v26 }
 0x1f5   :  { %2517 = vrot.lane.b32.xlu0 %v6257_v37, %s5538_s27  ;;  %v1883_v24 = vmul.f32 %v6230_v31, %v1849_v19  ;;  %v1851_v10 = vadd.f32 %v6203_v58, %v1811_v13  ;;  %vm1866_vm2 = vcmp.ge.f32.partialorder %v1849_v19, 0.0 }
 0x1f7   :  { %v6467_v1 = vsel %vm1866_vm2, %v1849_v19, %v1883_v24  ;;  %v1885_v20 = vmul.f32 %v6230_v31, %v1851_v10  ;;  %vm1868_vm3 = vcmp.ge.f32.partialorder %v1851_v10, 0.0 }
 0x1f8   :  { %2881 = vrot.lane.b32.xlu1 %v6244_v43, %s5539_s28 }
 0x1f9   :  { %2533 = vrot.lane.b32.xlu0 %v6270_v3, %s5538_s27  ;;  %v6478_v46 = vsel %vm1868_vm3, %v1851_v10, %v1885_v20 }
 0x1fc   :  { %2897 = vrot.lane.b32.xlu1 %v6252_v54, %s5539_s28 }
 0x1fd   :  { %2883 = vrot.lane.b32.xlu0 %v6257_v37, %s5539_s28 }
 0x200   :  { %1986 = vrot.lane.b32.xlu1 %v6349_v60, %s5534_s25 }
 0x201   :  { %2899 = vrot.lane.b32.xlu0 %v6270_v3, %s5539_s28 }
 0x204   :  { %2002 = vrot.lane.b32.xlu1 %v6357_v50, %s5534_s25 }
 0x205   :  { %1988 = vrot.lane.b32.xlu0 %v6361_v16, %s5534_s25 }
 0x208   :  { %1910 = vrot.lane.b32.xlu1 %v6349_v60, %s5536_s1 }
 0x209   :  { %2004 = vrot.lane.b32.xlu0 %v6368_v14, %s5534_s25 }
 0x20c   :  { %1926 = vrot.lane.b32.xlu1 %v6357_v50, %s5536_s1 }
 0x20d   :  { %1912 = vrot.lane.b32.xlu0 %v6361_v16, %s5536_s1 }
 0x210   :  { %2308 = vrot.lane.b32.xlu1 %v6349_v60, %s5537_s26 }
 0x211   :  { %1928 = vrot.lane.b32.xlu0 %v6368_v14, %s5536_s1 }
 0x214   :  { %2324 = vrot.lane.b32.xlu1 %v6357_v50, %s5537_s26 }
 0x215   :  { %2310 = vrot.lane.b32.xlu0 %v6361_v16, %s5537_s26 }
 0x218   :  { %2523 = vrot.lane.b32.xlu1 %v6349_v60, %s5538_s27 }
 0x219   :  { %2326 = vrot.lane.b32.xlu0 %v6368_v14, %s5537_s26 }
 0x21c   :  { %2539 = vrot.lane.b32.xlu1 %v6357_v50, %s5538_s27 }
 0x21d   :  { %2525 = vrot.lane.b32.xlu0 %v6361_v16, %s5538_s27 }
 0x220   :  { %2889 = vrot.lane.b32.xlu1 %v6349_v60, %s5539_s28 }
 0x221   :  { %2541 = vrot.lane.b32.xlu0 %v6368_v14, %s5538_s27 }
 0x224   :  { %1982 = vrot.lane.b32.xlu1 %v6274_v51, %s5534_s25 }
 0x225   :  { %2891 = vrot.lane.b32.xlu0 %v6361_v16, %s5539_s28 }
 0x228   :  { %1998 = vrot.lane.b32.xlu1 %v6272_v56, %s5534_s25 }
 0x229   :  { %1984 = vrot.lane.b32.xlu0 %v6294_v32, %s5534_s25 }
 0x22c   :  { %1906 = vrot.lane.b32.xlu1 %v6274_v51, %s5536_s1 }
 0x22d   :  { %2000 = vrot.lane.b32.xlu0 %v6292_v25, %s5534_s25 }
 0x230   :  { %1922 = vrot.lane.b32.xlu1 %v6272_v56, %s5536_s1 }
 0x231   :  { %1908 = vrot.lane.b32.xlu0 %v6294_v32, %s5536_s1 }
 0x234   :  { %2304 = vrot.lane.b32.xlu1 %v6274_v51, %s5537_s26 }
 0x235   :  { %1924 = vrot.lane.b32.xlu0 %v6292_v25, %s5536_s1 }
 0x238   :  { %2320 = vrot.lane.b32.xlu1 %v6272_v56, %s5537_s26 }
 0x239   :  { %2306 = vrot.lane.b32.xlu0 %v6294_v32, %s5537_s26 }
 0x23c   :  { %2519 = vrot.lane.b32.xlu1 %v6274_v51, %s5538_s27 }
 0x23d   :  { %2322 = vrot.lane.b32.xlu0 %v6292_v25, %s5537_s26 }
 0x240   :  { %2535 = vrot.lane.b32.xlu1 %v6272_v56, %s5538_s27 }
 0x241   :  { %2521 = vrot.lane.b32.xlu0 %v6294_v32, %s5538_s27 }
 0x244   :  { %2885 = vrot.lane.b32.xlu1 %v6274_v51, %s5539_s28 }
 0x245   :  { %2537 = vrot.lane.b32.xlu0 %v6292_v25, %s5538_s27 }
 0x248   :  { %2901 = vrot.lane.b32.xlu1 %v6272_v56, %s5539_s28 }
 0x249   :  { %2887 = vrot.lane.b32.xlu0 %v6294_v32, %s5539_s28 }
 0x24a   :  { %v6453_v61 = vpop.permute.xlu1 %1978 }
 0x24c   :  { %1990 = vrot.lane.b32.xlu1 %v6282_v45, %s5534_s25 }
 0x24d   :  { %2903 = vrot.lane.b32.xlu0 %v6292_v25, %s5539_s28 }
 0x24e   :  { %v6461_v30 = vpop.permute.xlu1 %1994  ;;  %v6463_v62 = vpop.permute.xlu0 %1980 }
 0x250   :  { %2006 = vrot.lane.b32.xlu1 %v6284_v2, %s5534_s25 }
 0x251   :  { %1992 = vrot.lane.b32.xlu0 %v6467_v1, %s5534_s25 }
 0x252   :  { %v6472_v58 = vpop.permute.xlu1 %1902 }
 0x253   :  { %v6474_v55 = vpop.permute.xlu0 %1996 }
 0x254   :  { %2905 = vrot.lane.b32.xlu1 %v6357_v50, %s5539_s28 }
 0x255   :  { %2008 = vrot.lane.b32.xlu0 %v6478_v46, %s5534_s25 }
 0x256   :  { %v6482_v33 = vpop.permute.xlu1 %1918 }
 0x257   :  { %v6484_v5 = vpop.permute.xlu0 %1904 }
 0x258   :  { %1914 = vrot.lane.b32.xlu1 %v6282_v45, %s5536_s1 }
 0x259   :  { %2907 = vrot.lane.b32.xlu0 %v6368_v14, %s5539_s28 }
 0x25a   :  { %v6490_v31 = vpop.permute.xlu1 %2300 }
 0x25b   :  { %v6492_v53 = vpop.permute.xlu0 %1920 }
 0x25c   :  { %1930 = vrot.lane.b32.xlu1 %v6284_v2, %s5536_s1 }
 0x25d   :  { %3102 = vrot.lane.b32.xlu0 %v6294_v32, %s5540_s29 }
 0x25e   :  { %v6498_v0 = vpop.permute.xlu1 %2316 }
 0x25f   :  { %v6500_v9 = vpop.permute.xlu0 %2302 }
 0x260   :  { %2312 = vrot.lane.b32.xlu1 %v6282_v45, %s5537_s26 }
 0x261   :  { %1916 = vrot.lane.b32.xlu0 %v6467_v1, %s5536_s1 }
 0x262   :  { %v6506_v23 = vpop.permute.xlu1 %2515 }
 0x263   :  { %9194 = vst [vmem:[#allocation40_spill] sm:$0xff] %v6506_v23  ;;  %v6508_v38 = vpop.permute.xlu0 %2318 }
 0x264   :  { %9195 = vst [vmem:[#allocation38_spill] sm:$0xff] %v6508_v38  ;;  %2328 = vrot.lane.b32.xlu1 %v6284_v2, %s5537_s26 }
 0x265   :  { %1932 = vrot.lane.b32.xlu0 %v6478_v46, %s5536_s1 }
 0x266   :  { %v6514_v26 = vpop.permute.xlu1 %2531 }
 0x267   :  { %9196 = vst [vmem:[#allocation39_spill] sm:$0xff] %v6514_v26  ;;  %v6516_v47 = vpop.permute.xlu0 %2517 }
 0x268   :  { %9197 = vst [vmem:[#allocation42_spill] sm:$0xff] %v6516_v47  ;;  %2527 = vrot.lane.b32.xlu1 %v6282_v45, %s5538_s27  ;;  %v9221_v47 = vld [vmem:[#allocation7_spill] sm:$0xff] }
 0x269   :  { %3118 = vrot.lane.b32.xlu0 %v6292_v25, %s5540_s29 }
 0x26a   :  { %v6522_v57 = vpop.permute.xlu1 %2881 }
 0x26b   :  { %9198 = vst [vmem:[#allocation41_spill] sm:$0xff] %v6522_v57  ;;  %v6524_v39 = vpop.permute.xlu0 %2533 }
 0x26c   :  { %9199 = vst [vmem:[#allocation44_spill] sm:$0xff] %v6524_v39  ;;  %2543 = vrot.lane.b32.xlu1 %v6284_v2, %s5538_s27 }
 0x26d   :  { %3098 = vrot.lane.b32.xlu0 %v6257_v37, %s5540_s29 }
 0x26e   :  { %v6530_v22 = vpop.permute.xlu1 %2897 }
 0x26f   :  { %9200 = vst [vmem:[#allocation43_spill] sm:$0xff] %v6530_v22  ;;  %v6532_v36 = vpop.permute.xlu0 %2883 }
 0x270   :  { %9201 = vst [vmem:[#allocation46_spill] sm:$0xff] %v6532_v36  ;;  %2893 = vrot.lane.b32.xlu1 %v6282_v45, %s5539_s28 }
 0x271   :  { %2314 = vrot.lane.b32.xlu0 %v6467_v1, %s5537_s26 }
 0x272   :  { %v6538_v27 = vpop.permute.xlu1 %1986 }
 0x273   :  { %v6540_v6 = vpop.permute.xlu0 %2899 }
 0x274   :  { %9202 = vst [vmem:[#allocation45_spill] sm:$0xff] %v6540_v6  ;;  %2909 = vrot.lane.b32.xlu1 %v6284_v2, %s5539_s28 }
 0x275   :  { %2330 = vrot.lane.b32.xlu0 %v6478_v46, %s5537_s26 }
 0x276   :  { %v6546_v8 = vpop.permute.xlu1 %2002 }
 0x277   :  { %v6548_v7 = vpop.permute.xlu0 %1988 }
 0x278   :  { %3100 = vrot.lane.b32.xlu1 %v6274_v51, %s5540_s29 }
 0x279   :  { %3106 = vrot.lane.b32.xlu0 %v6361_v16, %s5540_s29 }
 0x27a   :  { %v6554_v59 = vpop.permute.xlu1 %1910 }
 0x27b   :  { %v6556_v12 = vpop.permute.xlu0 %2004 }
 0x27c   :  { %3108 = vrot.lane.b32.xlu1 %v6282_v45, %s5540_s29 }
 0x27d   :  { %3114 = vrot.lane.b32.xlu0 %v6270_v3, %s5540_s29 }
 0x27e   :  { %v6562_v11 = vpop.permute.xlu1 %1926 }
 0x27f   :  { %v6564_v18 = vpop.permute.xlu0 %1912 }
 0x280   :  { %3116 = vrot.lane.b32.xlu1 %v6272_v56, %s5540_s29 }
 0x281   :  { %2529 = vrot.lane.b32.xlu0 %v6467_v1, %s5538_s27 }
 0x282   :  { %v6570_v40 = vpop.permute.xlu1 %2308 }
 0x283   :  { %v6572_v21 = vpop.permute.xlu0 %1928 }
 0x284   :  { %3124 = vrot.lane.b32.xlu1 %v6284_v2, %s5540_s29 }
 0x285   :  { %2545 = vrot.lane.b32.xlu0 %v6478_v46, %s5538_s27 }
 0x286   :  { %v6578_v17 = vpop.permute.xlu1 %2324 }
 0x287   :  { %v6580_v63 = vpop.permute.xlu0 %2310 }
 0x288   :  { %3096 = vrot.lane.b32.xlu1 %v6244_v43, %s5540_s29 }
 0x289   :  { %3122 = vrot.lane.b32.xlu0 %v6368_v14, %s5540_s29 }
 0x28a   :  { %v6586_v49 = vpop.permute.xlu1 %2523 }
 0x28b   :  { %9203 = vst [vmem:[#allocation48_spill] sm:$0xff] %v6586_v49  ;;  %v6588_v48 = vpop.permute.xlu0 %2326 }
 0x28c   :  { %9204 = vst [vmem:[#allocation47_spill] sm:$0xff] %v6588_v48  ;;  %3104 = vrot.lane.b32.xlu1 %v6349_v60, %s5540_s29 }
 0x28d   :  { %3317 = vrot.lane.b32.xlu0 %v6294_v32, %s5541_s30 }
 0x28e   :  { %v6594_v52 = vpop.permute.xlu1 %2539 }
 0x28f   :  { %9205 = vst [vmem:[#allocation49_spill] sm:$0xff] %v6594_v52  ;;  %v6596_v34 = vpop.permute.xlu0 %2525 }
 0x290   :  { %9206 = vst [vmem:[#allocation57_spill] sm:$0xff] %v6596_v34  ;;  %3112 = vrot.lane.b32.xlu1 %v6252_v54, %s5540_s29  ;;  %v9222_v34 = vld [vmem:[#allocation6_spill] sm:$0xff] }
 0x291   :  { %3333 = vrot.lane.b32.xlu0 %v6292_v25, %s5541_s30 }
 0x292   :  { %v6602_v29 = vpop.permute.xlu1 %2889 }
 0x293   :  { %9207 = vst [vmem:[#allocation58_spill] sm:$0xff] %v6602_v29  ;;  %v6604_v35 = vpop.permute.xlu0 %2541 }
 0x294   :  { %9208 = vst [vmem:[#allocation59_spill] sm:$0xff] %v6604_v35  ;;  %3120 = vrot.lane.b32.xlu1 %v6357_v50, %s5540_s29 }
 0x295   :  { %3313 = vrot.lane.b32.xlu0 %v6257_v37, %s5541_s30 }
 0x296   :  { %v1983_v41 = vpop.permute.xlu1 %1982 }
 0x297   :  { %v6610_v15 = vpop.permute.xlu0 %2891 }
 0x298   :  { %9209 = vst [vmem:[#allocation60_spill] sm:$0xff] %v6610_v15  ;;  %3315 = vrot.lane.b32.xlu1 %v6274_v51, %s5541_s30 }
 0x299   :  { %3321 = vrot.lane.b32.xlu0 %v6361_v16, %s5541_s30 }
 0x29a   :  { %v1999_v44 = vpop.permute.xlu1 %1998 }
 0x29b   :  { %v6616_v4 = vpop.permute.xlu0 %1984 }
 0x29c   :  { %3323 = vrot.lane.b32.xlu1 %v6282_v45, %s5541_s30 }
 0x29d   :  { %3329 = vrot.lane.b32.xlu0 %v6270_v3, %s5541_s30 }
 0x29e   :  { %v6622_v42 = vpop.permute.xlu1 %1906 }
 0x29f   :  { %v2001_v28 = vpop.permute.xlu0 %2000 }
 0x2a0   :  { %3331 = vrot.lane.b32.xlu1 %v6272_v56, %s5541_s30 }
 0x2a1   :  { %2895 = vrot.lane.b32.xlu0 %v6467_v1, %s5539_s28 }
 0x2a2   :  { %v6628_v19 = vpop.permute.xlu1 %1922 }
 0x2a3   :  { %v6630_v13 = vpop.permute.xlu0 %1908 }
 0x2a4   :  { %3339 = vrot.lane.b32.xlu1 %v6284_v2, %s5541_s30 }
 0x2a5   :  { %2911 = vrot.lane.b32.xlu0 %v6478_v46, %s5539_s28 }
 0x2a6   :  { %v6636_v24 = vpop.permute.xlu1 %2304 }
 0x2a7   :  { %v6638_v10 = vpop.permute.xlu0 %1924 }
 0x2a8   :  { %3311 = vrot.lane.b32.xlu1 %v6244_v43, %s5541_s30 }
 0x2a9   :  { %3337 = vrot.lane.b32.xlu0 %v6368_v14, %s5541_s30 }
 0x2aa   :  { %v6644_v20 = vpop.permute.xlu1 %2320 }
 0x2ab   :  { %v6646_v57 = vpop.permute.xlu0 %2306 }
 0x2ac   :  { %3319 = vrot.lane.b32.xlu1 %v6349_v60, %s5541_s30 }
 0x2ad   :  { %3532 = vrot.lane.b32.xlu0 %v6294_v32, %s5542_s12 }
 0x2ae   :  { %v6652_v36 = vpop.permute.xlu1 %2519 }
 0x2af   :  { %9210 = vst [vmem:[#allocation61_spill] sm:$0xff] %v6652_v36  ;;  %v6654_v29 = vpop.permute.xlu0 %2322 }
 0x2b0   :  { %3327 = vrot.lane.b32.xlu1 %v6252_v54, %s5541_s30 }
 0x2b1   :  { %3110 = vrot.lane.b32.xlu0 %v6467_v1, %s5540_s29 }
 0x2b2   :  { %v6660_v22 = vpop.permute.xlu1 %2535 }
 0x2b3   :  { %9211 = vst [vmem:[#allocation62_spill] sm:$0xff] %v6660_v22  ;;  %v6662_v15 = vpop.permute.xlu0 %2521 }
 0x2b4   :  { %9212 = vst [vmem:[#allocation63_spill] sm:$0xff] %v6662_v15  ;;  %3335 = vrot.lane.b32.xlu1 %v6357_v50, %s5541_s30 }
 0x2b5   :  { %3126 = vrot.lane.b32.xlu0 %v6478_v46, %s5540_s29 }
 0x2b6   :  { %v6668_v6 = vpop.permute.xlu1 %2885 }
 0x2b7   :  { %9213 = vst [vmem:[#allocation64_spill] sm:$0xff] %v6668_v6  ;;  %v6670_v32 = vpop.permute.xlu0 %2537 }
 0x2b8   :  { %9214 = vst [vmem:[#allocation65_spill] sm:$0xff] %v6670_v32  ;;  %3530 = vrot.lane.b32.xlu1 %v6274_v51, %s5542_s12  ;;  %v5478_v51 = vld [vmem:[%s8918_s7 + $0x10] sm:$0x3] }
 0x2b9   :  { %3548 = vrot.lane.b32.xlu0 %v6292_v25, %s5542_s12 }
 0x2ba   :  { %v6676_v39 = vpop.permute.xlu1 %2901 }
 0x2bb   :  { %9215 = vst [vmem:[#allocation66_spill] sm:$0xff] %v6676_v39  ;;  %v6678_v35 = vpop.permute.xlu0 %2887 }
 0x2bc   :  { %9216 = vst [vmem:[#allocation67_spill] sm:$0xff] %v6678_v35  ;;  %3538 = vrot.lane.b32.xlu1 %v6282_v45, %s5542_s12  ;;  %v2019_v35 = vsel %vm162_vm0, %v6463_v62, %v6548_v7 }
 0x2bd   :  { %3528 = vrot.lane.b32.xlu0 %v6257_v37, %s5542_s12  ;;  %v9219_v37 = vld [vmem:[#allocation8_spill] sm:$0xff] }
 0x2be   :  { %v1991_v22 = vpop.permute.xlu1 %1990  ;;  %v2031_v49 = vmul.f32 %v2019_v35, %v9219_v37 }
 0x2bf   :  { %v6684_v6 = vpop.permute.xlu0 %2903  ;;  %v2020_v39 = vsel %vm162_vm0, %v1983_v41, %v1991_v22 }
 0x2c0   :  { %9217 = vst [vmem:[#allocation68_spill] sm:$0xff] %v6684_v6  ;;  %3546 = vrot.lane.b32.xlu1 %v6272_v56, %s5542_s12  ;;  %v2035_v56 = vmul.f32 %v2020_v39, %v9219_v37  ;;  %v2010_v39 = vsel %vm162_vm0, %v6461_v30, %v6546_v8 }
 0x2c1   :  { %3325 = vrot.lane.b32.xlu0 %v6467_v1, %s5541_s30 }
 0x2c2   :  { %v2007_v25 = vpop.permute.xlu1 %2006 }
 0x2c3   :  { %v1993_v45 = vpop.permute.xlu0 %1992  ;;  %v2012_v32 = vsel %vm162_vm0, %v1999_v44, %v2007_v25  ;;  %v2024_v26 = vsel %vm162_vm0, %v2007_v25, %v1983_v41  ;;  %v2023_v41 = vsel %vm162_vm0, %v6556_v12, %v6463_v62  ;;  %v9223_v62 = vld [vmem:[#allocation9_spill] sm:$0xff] }
 0x2c4   :  { %3554 = vrot.lane.b32.xlu1 %v6284_v2, %s5542_s12  ;;  %v2021_v6 = vsel %vm162_vm0, %v6616_v4, %v1993_v45  ;;  %v2018_v2 = vsel %vm162_vm0, %v6453_v61, %v6538_v27  ;;  %v2017_v25 = vsel %vm162_vm0, %v1993_v45, %v2001_v28  ;;  %v2034_v45 = vmul.f32 %v2024_v26, %v9221_v47 }
 0x2c5   :  { %v2039_v52 = vmul.f32 %v2021_v6, %v9219_v37  ;;  %3341 = vrot.lane.b32.xlu0 %v6478_v46, %s5541_s30  ;;  %v2011_v6 = vsel %vm162_vm0, %v6474_v55, %v6556_v12  ;;  %v2037_v36 = vmul.f32 %v2012_v32, %v9222_v34  ;;  %v2040_v12 = vmul.f32 %v2017_v25, %v9223_v62 }
 0x2c6   :  { %v6709_v23 = vpop.permute.xlu1 %2905  ;;  %v2027_v32 = vmul.f32 %v2018_v2, %v9219_v37  ;;  %v2022_v26 = vsel %vm162_vm0, %v6546_v8, %v6453_v61  ;;  %v2014_v61 = vsel %vm162_vm0, %v6538_v27, %v6461_v30  ;;  %v5515_v27 = vld [vmem:[%s8914_s5 + $0x10] sm:$0xff]  }
 0x2c7   :  { %9220 = vst [vmem:[#allocation5_spill] sm:$0xff] %v6709_v23  ;;  %v2016_v23 = vsel %vm162_vm0, %v1991_v22, %v1999_v44  ;;  %v2009_v15 = vpop.permute.xlu0 %2008  ;;  %v2052_v35 = vpack.c.bf16 %v2039_v52, %v2035_v56  ;;  %v2015_v52 = vsel %vm162_vm0, %v6548_v7, %v6474_v55  ;;  %v2029_v55 = vmul.f32 %v2010_v39, %v9222_v34 }
 0x2c8   :  { %3526 = vrot.lane.b32.xlu1 %v6244_v43, %s5542_s12  ;;  %v2013_v38 = vsel %vm162_vm0, %v2001_v28, %v2009_v15  ;;  %v2025_v48 = vsel %vm162_vm0, %v2009_v15, %v6616_v4  ;;  %v2036_v15 = vmul.f32 %v2016_v23, %v9223_v62  ;;  %v2048_v8 = vpack.c.bf16 %v2031_v49, %v2027_v32  ;;  %v9224_v32 = vld [vmem:[#allocation10_spill] sm:$0xff] }
 0x2c9   :  { %v2038_v22 = vmul.f32 %v2025_v48, %v9221_v47  ;;  %v2041_v44 = vmul.f32 %v2013_v38, %v9222_v34  ;;  %3536 = vrot.lane.b32.xlu0 %v6361_v16, %s5542_s12  ;;  %2084 = vmatprep.subr.bf16.mxu0 %v2052_v35  ;;  %v2033_v48 = vmul.f32 %v2011_v6, %v9222_v34 }
 0x2ca   :  { %v1915_v56 = vpop.permute.xlu1 %1914  ;;  %v2030_v38 = vmul.f32 %v2023_v41, %v9221_v47  ;;  %v2026_v7 = vmul.f32 %v2022_v26, %v9221_v47  ;;  %v2032_v25 = vmul.f32 %v2015_v52, %v9223_v62  ;;  %v2053_v23 = vpack.c.bf16 %v2040_v12, %v2036_v15 }
 0x2cb   :  { %v2051_v4 = vpack.c.bf16 %v2038_v22, %v2034_v45  ;;  %v6758_v28 = vpop.permute.xlu0 %2907  ;;  %v2054_v2 = vpack.c.bf16 %v2041_v44, %v2037_v36  ;;  %v2050_v36 = vpack.c.bf16 %v2033_v48, %v2029_v55  ;;  %v2028_v41 = vmul.f32 %v2014_v61, %v9223_v62  ;;  %v3743_v48 = vld [vmem:[%s8915_s6 + $0x10] sm:$0xff] }
 0x2cc   :  { %3534 = vrot.lane.b32.xlu1 %v6349_v60, %s5542_s12  ;;  %v2047_v35 = vpack.c.bf16 %v2030_v38, %v2026_v7  ;;  %v1944_v39 = vsel %vm116_vm1, %v6622_v42, %v1915_v56  ;;  %v1943_v12 = vsel %vm116_vm1, %v6484_v5, %v6564_v18  ;;  %v1942_v44 = vsel %vm116_vm1, %v6472_v58, %v6554_v59 }
 0x2cd   :  { %3544 = vrot.lane.b32.xlu0 %v6270_v3, %s5542_s12  ;;  %2085 = vmatpush1.bf16.msra.mxu0 %v2051_v4  ;;  %v2049_v49 = vpack.c.bf16 %v2032_v25, %v2028_v41  ;;  %v1959_v26 = vmul.f32 %v1944_v39, %v9224_v32  ;;  %v9225_v61 = vmov 0   ;;  %v1934_v55 = vsel %vm116_vm1, %v6482_v33, %v6562_v11 }
 0x2ce   :  { %v1931_v6 = vpop.permute.xlu1 %1930  ;;  %2137 = vmatprep.subr.bf16.mxu1 %v2054_v2  ;;  %2086 = vmatprep.subr.bf16.mxu0 %v2048_v8  ;;  %v1946_v8 = vsel %vm116_vm1, %v6562_v11, %v6472_v58  ;;  %v1935_v25 = vsel %vm116_vm1, %v6492_v53, %v6572_v21  ;;  %v1940_v58 = vsel %vm116_vm1, %v1915_v56, %v6628_v19 }
 0x2cf   :  { %2138 = vmatpush1.bf16.msra.mxu1 %v2053_v23  ;;  %v6772_v30 = vpop.permute.xlu0 %3102  ;;  %v1936_v38 = vsel %vm116_vm1, %v6628_v19, %v1931_v6  ;;  %v1948_v15 = vsel %vm116_vm1, %v1931_v6, %v6622_v42  ;;  %v1955_v42 = vmul.f32 %v1943_v12, %v9224_v32  ;;  %v1947_v23 = vsel %vm116_vm1, %v6572_v21, %v6484_v5  ;;  %v5516_v5 = vld [vmem:[%s8914_s5 + $0x18] sm:$0xff]   ;;  %v3741_v21 = vld [vmem:[%s8915_s6] sm:$0xff] }
 0x2d0   :  { %3542 = vrot.lane.b32.xlu1 %v6252_v54, %s5542_s12  ;;  %2139 = vmatprep.subr.bf16.mxu1 %v2050_v36  ;;  %v9226_v36 = vld [vmem:[#allocation11_spill] sm:$0xff]  ;;  %v9228_v19 = vld [vmem:[#allocation12_spill] sm:$0xff] }
 0x2d1   :  { %3540 = vrot.lane.b32.xlu0 %v6467_v1, %s5542_s12  ;;  %2087 = vmatpush1.bf16.msra.mxu0 %v2047_v35  ;;  %v1958_v41 = vmul.f32 %v1948_v15, %v9226_v36  ;;  %v9227_v35 = vld [vmem:[#allocation13_spill] sm:$0xff]  ;;  %v1960_v15 = vmul.f32 %v1940_v58, %v9228_v19 }
 0x2d2   :  { %v6784_v45 = vpop.permute.xlu1 %2312 }
 0x2d3   :  { %2140 = vmatpush1.bf16.msra.mxu1 %v2049_v49  ;;  %v1917_v22 = vpop.permute.xlu0 %1916 }
 0x2d4   :  { %3550 = vrot.lane.b32.xlu1 %v6357_v50, %s5542_s12  ;;  %v1945_v52 = vsel %vm116_vm1, %v6630_v13, %v1917_v22  ;;  %5375 = vmatmul.mubr.msk.bf16.vlgmr.msra.gmra.mxu0 %vm2065_vm10, %v5515_v27  ;;  %v1941_v7 = vsel %vm116_vm1, %v1917_v22, %v6638_v10  ;;  %v1951_v22 = vmul.f32 %v1942_v44, %v9224_v32 }
 0x2d5   :  { %v1963_v4 = vmul.f32 %v1945_v52, %v9224_v32  ;;  %3556 = vrot.lane.b32.xlu0 %v6478_v46, %s5542_s12  ;;  %2114 = vmatprep.mubr.bf16.mxu0 %v9225_v61  ;;  %v1964_v56 = vmul.f32 %v1941_v7, %v9228_v19  ;;  %v1957_v52 = vmul.f32 %v1935_v25, %v9227_v35 }
 0x2d6   :  { %v6813_v2 = vpop.permute.xlu1 %2328  ;;  %5377 = vmatmul.mubr.msk.bf16.vlgmr.msra.gmra.mxu1 %vm2065_vm10, %v5515_v27  ;;  %v1961_v27 = vmul.f32 %v1936_v38, %v9227_v35  ;;  %v1954_v38 = vmul.f32 %v1947_v23, %v9226_v36  ;;  %v1953_v25 = vmul.f32 %v1934_v55, %v9227_v35  ;;  %v1971_v58 = vpack.c.bf16 %v1955_v42, %v1951_v22  ;;  %v5517_v42 = vld [vmem:[%s8914_s5] sm:$0xff]  }
 0x2d7   :  { %v1933_v11 = vpop.permute.xlu0 %1932  ;;  %v1975_v6 = vpack.c.bf16 %v1963_v4, %v1959_v26  ;;  %2167 = vmatprep.mubr.bf16.mxu1 %v9225_v61  ;;  %v1939_v26 = vsel %vm116_vm1, %v6564_v18, %v6492_v53  ;;  %v1938_v53 = vsel %vm116_vm1, %v6554_v59, %v6482_v33  ;;  %v1950_v18 = vmul.f32 %v1946_v8, %v9226_v36  ;;  %v3742_v33 = vld [vmem:[%s8915_s6 + $0x8] sm:$0xff] }
 0x2d8   :  { %3757 = vperm.xlu1 %5494, %v3743_v48   ;;  %v1937_v49 = vsel %vm116_vm1, %v6638_v10, %v1933_v11  ;;  %v1949_v39 = vsel %vm116_vm1, %v1933_v11, %v6630_v13  ;;  %v3744_v48 = vld [vmem:[%s8915_s6 + $0x18] sm:$0xff]  ;;  %v1956_v23 = vmul.f32 %v1939_v26, %v9228_v19  ;;  %v1976_v11 = vpack.c.bf16 %v1964_v56, %v1960_v15 }
 0x2d9   :  { %v1962_v12 = vmul.f32 %v1949_v39, %v9226_v36  ;;  %v1965_v10 = vmul.f32 %v1937_v49, %v9227_v35  ;;  %3552 = vrot.lane.b32.xlu0 %v6368_v14, %s5542_s12  ;;  %2206 = vmatprep.subr.bf16.mxu0 %v1975_v6  ;;  %v1952_v59 = vmul.f32 %v1938_v53, %v9228_v19  ;;  %v9231_v53 = vld [vmem:[#allocation38_spill] sm:$0xff] }
 0x2da   :  { %v6860_v13 = vpop.permute.xlu1 %2527  ;;  %v1970_v55 = vpack.c.bf16 %v1954_v38, %v1950_v18  ;;  %v2342_v39 = vsel %vm479_vm4, %v6636_v24, %v6784_v45  ;;  %v2346_v22 = vsel %vm479_vm4, %v6813_v2, %v6636_v24  ;;  %v2332_v38 = vsel %vm479_vm4, %v6498_v0, %v6578_v17 }
 0x2db   :  { %v1974_v4 = vpack.c.bf16 %v1962_v12, %v1958_v41  ;;  %v6873_v7 = vpop.permute.xlu0 %3118  ;;  %v1977_v44 = vpack.c.bf16 %v1965_v10, %v1961_v27  ;;  %v1973_v41 = vpack.c.bf16 %v1957_v52, %v1953_v25  ;;  %v1972_v27 = vpack.c.bf16 %v1956_v23, %v1952_v59  ;;  %v9229_v12 = vld [vmem:[#allocation14_spill] sm:$0xff] }
 0x2dc   :  { %3747 = vperm.xlu1 %5494, %v3741_v21   ;;  %5376 = vmatmul.mubr.msk.bf16.gmra.mxu0 %vm2065_vm10, %v5516_v5  ;;  %v2341_v21 = vsel %vm479_vm4, %v6500_v9, %v6580_v63  ;;  %v2357_v10 = vmul.f32 %v2342_v39, %v9229_v12  ;;  %v2334_v24 = vsel %vm479_vm4, %v6644_v20, %v6813_v2 }
 0x2dd   :  { %3762 = vperm.xlu0 %5493, %v3744_v48   ;;  %2207 = vmatpush1.bf16.msra.mxu0 %v1974_v4  ;;  %v2340_v48 = vsel %vm479_vm4, %v6490_v31, %v6570_v40  ;;  %v2353_v4 = vmul.f32 %v2341_v21, %v9229_v12  ;;  %v2337_v21 = vsel %vm479_vm4, %v6580_v63, %v9231_v53 }
 0x2de   :  { %v6883_v6 = vpop.permute.xlu1 %2543  ;;  %5378 = vmatmul.mubr.msk.bf16.gmra.mxu1 %vm2065_vm10, %v5516_v5  ;;  %2259 = vmatprep.subr.bf16.mxu1 %v1977_v44  ;;  %v9230_v44 = vld [vmem:[#allocation47_spill] sm:$0xff] }
 0x2df   :  { %2208 = vmatprep.subr.bf16.mxu0 %v1971_v58  ;;  %2260 = vmatpush1.bf16.msra.mxu1 %v1976_v11  ;;  %v6890_v8 = vpop.permute.xlu0 %3098  ;;  %v2333_v18 = vsel %vm479_vm4, %v9231_v53, %v9230_v44  ;;  %v2345_v25 = vsel %vm479_vm4, %v9230_v44, %v6500_v9  ;;  %v2338_v11 = vsel %vm479_vm4, %v6784_v45, %v6644_v20  ;;  %v9232_v58 = vld [vmem:[#allocation15_spill] sm:$0xff]  ;;  %v5518_v9 = vld [vmem:[%s8914_s5 + $0x8] sm:$0xff]  }
 0x2e0   :  { %2261 = vmatprep.subr.bf16.mxu1 %v1973_v41  ;;  %2226 = vmatprep.mubr.bf16.mxu0 %v9225_v61  ;;  %v2356_v41 = vmul.f32 %v2346_v22, %v9232_v58 }
 0x2e1   :  { %3752 = vperm.xlu0 %5493, %v3742_v33   ;;  %2209 = vmatpush1.bf16.msra.mxu0 %v1970_v55  ;;  %v9233_v55 = vld [vmem:[#allocation17_spill] sm:$0xff] }
 0x2e2   :  { %v6896_v49 = vpop.permute.xlu1 %2893  ;;  %2279 = vmatprep.mubr.bf16.mxu1 %v9225_v61 }
 0x2e3   :  { %2262 = vmatpush1.bf16.msra.mxu1 %v1972_v27  ;;  %v2315_v5 = vpop.permute.xlu0 %2314  ;;  %v9234_v27 = vld [vmem:[#allocation16_spill] sm:$0xff] }
 0x2e4   :  { %v2343_v56 = vsel %vm479_vm4, %v6646_v57, %v2315_v5  ;;  %5381 = vmatmul.mubr.msk.bf16.vlgmr.msra.gmra.mxu0 %vm2065_vm10, %v5517_v42  ;;  %v2339_v15 = vsel %vm479_vm4, %v2315_v5, %v6654_v29  ;;  %v2358_v22 = vmul.f32 %v2338_v11, %v9234_v27  ;;  %v2354_v44 = vmul.f32 %v2337_v21, %v9234_v27  ;;  %v9235_v11 = vld [vmem:[#allocation61_spill] sm:$0xff] }
 0x2e5   :  { %v2361_v26 = vmul.f32 %v2343_v56, %v9229_v12  ;;  %2236 = vmatprep.mubr.bf16.mxu0 %v9225_v61  ;;  %v2362_v39 = vmul.f32 %v2339_v15, %v9234_v27  ;;  %v2355_v56 = vmul.f32 %v2333_v18, %v9233_v55 }
 0x2e6   :  { %v6917_v52 = vpop.permute.xlu1 %2909  ;;  %5383 = vmatmul.mubr.msk.bf16.vlgmr.msra.gmra.mxu1 %vm2065_vm10, %v5517_v42  ;;  %v2359_v42 = vmul.f32 %v2334_v24, %v9233_v55 }
 0x2e7   :  { %v2331_v23 = vpop.permute.xlu0 %2330  ;;  %v2374_v2 = vpack.c.bf16 %v2361_v26, %v2357_v10  ;;  %2289 = vmatprep.mubr.bf16.mxu1 %v9225_v61  ;;  %v2352_v10 = vmul.f32 %v2345_v25, %v9232_v58  ;;  %v2375_v53 = vpack.c.bf16 %v2362_v39, %v2358_v22  ;;  %v9238_v39 = vld [vmem:[#allocation63_spill] sm:$0xff]  ;;  %v9241_v22 = vld [vmem:[#allocation40_spill] sm:$0xff] }
 0x2e8   :  { %v2335_v33 = vsel %vm479_vm4, %v6654_v29, %v2331_v23  ;;  %v2347_v59 = vsel %vm479_vm4, %v2331_v23, %v6646_v57  ;;  %v2349_v29 = vmul.f32 %v2340_v48, %v9229_v12  ;;  %v2344_v57 = vsel %vm479_vm4, %v6578_v17, %v6490_v31 }
 0x2e9   :  { %v2360_v20 = vmul.f32 %v2347_v59, %v9232_v58  ;;  %v2363_v45 = vmul.f32 %v2335_v33, %v9233_v55  ;;  %2405 = vmatprep.subr.bf16.mxu0 %v2374_v2  ;;  %v2336_v31 = vsel %vm479_vm4, %v6570_v40, %v6498_v0  ;;  %v2351_v17 = vmul.f32 %v2332_v38, %v9233_v55  ;;  %v9236_v59 = vld [vmem:[#allocation57_spill] sm:$0xff] }
 0x2ea   :  { %v6964_v5 = vpop.permute.xlu1 %3100  ;;  %v2370_v63 = vpack.c.bf16 %v2353_v4, %v2349_v29  ;;  %v2348_v15 = vmul.f32 %v2344_v57, %v9232_v58  ;;  %v2350_v0 = vmul.f32 %v2336_v31, %v9234_v27  ;;  %v5519_v4 = vld [vmem:[%s8914_s5 + $0x20] sm:$0xff]   ;;  %v2561_v57 = vsel %vm676_vm5, %v6883_v6, %v9235_v11  ;;  %v9243_v31 = vld [vmem:[#allocation39_spill] sm:$0xff] }
 0x2eb   :  { %v2373_v26 = vpack.c.bf16 %v2360_v20, %v2356_v41  ;;  %v6978_v24 = vpop.permute.xlu0 %3106  ;;  %v2376_v48 = vpack.c.bf16 %v2363_v45, %v2359_v42  ;;  %v2372_v25 = vpack.c.bf16 %v2355_v56, %v2351_v17  ;;  %v2557_v41 = vsel %vm676_vm5, %v9235_v11, %v6860_v13  ;;  %v9239_v45 = vld [vmem:[#allocation18_spill] sm:$0xff] }
 0x2ec   :  { %5382 = vmatmul.mubr.msk.bf16.gmra.mxu0 %vm2065_vm10, %v5518_v9  ;;  %v2369_v40 = vpack.c.bf16 %v2352_v10, %v2348_v15  ;;  %v2371_v23 = vpack.c.bf16 %v2354_v44, %v2350_v0  ;;  %v2572_v29 = vmul.f32 %v2557_v41, %v9239_v45  ;;  %v9240_v10 = vld [vmem:[#allocation48_spill] sm:$0xff]  ;;  %v9245_v44 = vld [vmem:[#allocation65_spill] sm:$0xff]  ;;  %v9246_v0 = vld [vmem:[#allocation59_spill] sm:$0xff] }
 0x2ed   :  { %2406 = vmatpush1.bf16.msra.mxu0 %v2373_v26  ;;  %2458 = vmatprep.subr.bf16.mxu1 %v2376_v48  ;;  %v2555_v26 = vsel %vm676_vm5, %v9241_v22, %v9240_v10  ;;  %v9242_v48 = vld [vmem:[#allocation49_spill] sm:$0xff] }
 0x2ee   :  { %v6988_v18 = vpop.permute.xlu1 %3108  ;;  %5384 = vmatmul.mubr.msk.bf16.gmra.mxu1 %vm2065_vm10, %v5518_v9  ;;  %2407 = vmatprep.subr.bf16.mxu0 %v2370_v63  ;;  %v9237_v9 = vld [vmem:[#allocation42_spill] sm:$0xff]  ;;  %v2547_v17 = vsel %vm676_vm5, %v9243_v31, %v9242_v48 }
 0x2ef   :  { %2459 = vmatpush1.bf16.msra.mxu1 %v2375_v53  ;;  %v6992_v38 = vpop.permute.xlu0 %3114  ;;  %2425 = vmatprep.mubr.bf16.mxu0 %v9225_v61  ;;  %v2556_v42 = vsel %vm676_vm5, %v9237_v9, %v9236_v59  ;;  %v9244_v63 = vld [vmem:[#allocation62_spill] sm:$0xff]  ;;  %v2560_v11 = vsel %vm676_vm5, %v9246_v0, %v9237_v9 }
 0x2f0   :  { %2460 = vmatprep.subr.bf16.mxu1 %v2372_v25  ;;  %2478 = vmatprep.mubr.bf16.mxu1 %v9225_v61  ;;  %v2549_v15 = vsel %vm676_vm5, %v9244_v63, %v6883_v6  ;;  %v2568_v25 = vmul.f32 %v2556_v42, %v9239_v45  ;;  %v5520_v9 = vld [vmem:[%s8914_s5 + $0x28] sm:$0xff]  }
 0x2f1   :  { %2408 = vmatpush1.bf16.msra.mxu0 %v2369_v40  ;;  %v9247_v40 = vld [vmem:[#allocation44_spill] sm:$0xff] }
 0x2f2   :  { %v6999_v2 = vpop.permute.xlu1 %3116 }
 0x2f3   :  { %2461 = vmatpush1.bf16.msra.mxu1 %v2371_v23  ;;  %v2530_v33 = vpop.permute.xlu0 %2529  ;;  %v2548_v23 = vsel %vm676_vm5, %v9247_v40, %v9246_v0  ;;  %v9250_v0 = vld [vmem:[#allocation20_spill] sm:$0xff] }
 0x2f4   :  { %v2558_v20 = vsel %vm676_vm5, %v9238_v39, %v2530_v33  ;;  %5391 = vmatmul.mubr.msk.bf16.vlgmr.msra.gmra.mxu0 %vm2065_vm10, %v5519_v4  ;;  %v2554_v53 = vsel %vm676_vm5, %v2530_v33, %v9245_v44  ;;  %v9248_v33 = vld [vmem:[#allocation21_spill] sm:$0xff] }
 0x2f5   :  { %v2576_v21 = vmul.f32 %v2558_v20, %v9239_v45  ;;  %2435 = vmatprep.mubr.bf16.mxu0 %v9225_v61  ;;  %v2571_v42 = vmul.f32 %v2561_v57, %v9248_v33  ;;  %v2577_v37 = vmul.f32 %v2554_v53, %v9250_v0 }
 0x2f6   :  { %v7019_v56 = vpop.permute.xlu1 %3124  ;;  %5393 = vmatmul.mubr.msk.bf16.vlgmr.msra.gmra.mxu1 %vm2065_vm10, %v5519_v4  ;;  %v2553_v4 = vsel %vm676_vm5, %v6860_v13, %v9244_v63 }
 0x2f7   :  { %v2546_v41 = vpop.permute.xlu0 %2545  ;;  %v2589_v6 = vpack.c.bf16 %v2576_v21, %v2572_v29  ;;  %2488 = vmatprep.mubr.bf16.mxu1 %v9225_v61  ;;  %v9249_v29 = vld [vmem:[#allocation19_spill] sm:$0xff] }
 0x2f8   :  { %v2550_v20 = vsel %vm676_vm5, %v9245_v44, %v2546_v41  ;;  %v2562_v62 = vsel %vm676_vm5, %v2546_v41, %v9238_v39  ;;  %v2574_v21 = vmul.f32 %v2549_v15, %v9249_v29  ;;  %v2564_v44 = vmul.f32 %v2555_v26, %v9239_v45 }
 0x2f9   :  { %v2575_v13 = vmul.f32 %v2562_v62, %v9248_v33  ;;  %v2578_v57 = vmul.f32 %v2550_v20, %v9249_v29  ;;  %2620 = vmatprep.subr.bf16.mxu0 %v2589_v6  ;;  %v2559_v39 = vsel %vm676_vm5, %v9242_v48, %v9241_v22  ;;  %v2552_v15 = vsel %vm676_vm5, %v9236_v59, %v9247_v40 }
 0x2fa   :  { %v7066_v63 = vpop.permute.xlu1 %3096  ;;  %v2570_v53 = vmul.f32 %v2548_v23, %v9249_v29  ;;  %v2567_v62 = vmul.f32 %v2560_v11, %v9248_v33  ;;  %v2573_v41 = vmul.f32 %v2553_v4, %v9250_v0  ;;  %v2551_v22 = vsel %vm676_vm5, %v9240_v10, %v9243_v31 }
 0x2fb   :  { %v2588_v6 = vpack.c.bf16 %v2575_v13, %v2571_v42  ;;  %v7080_v20 = vpop.permute.xlu0 %3122  ;;  %v2591_v26 = vpack.c.bf16 %v2578_v57, %v2574_v21  ;;  %v2566_v48 = vmul.f32 %v2547_v17, %v9249_v29  ;;  %v2585_v59 = vpack.c.bf16 %v2568_v25, %v2564_v44  ;;  %v9251_v25 = vld [vmem:[#allocation53_spill] sm:$0xff]  ;;  %v5521_v21 = vld [vmem:[%s8914_s5 + $0x30] sm:$0xff]   ;;  %v9252_v57 = vld [vmem:[#allocation54_spill] sm:$0xff] }
 0x2fc   :  { %5392 = vmatmul.mubr.msk.bf16.gmra.mxu0 %vm2065_vm10, %v5520_v9  ;;  %v2563_v40 = vmul.f32 %v2559_v39, %v9248_v33  ;;  %v2569_v23 = vmul.f32 %v2552_v15, %v9250_v0  ;;  %v2590_v11 = vpack.c.bf16 %v2577_v37, %v2573_v41  ;;  %v2565_v10 = vmul.f32 %v2551_v22, %v9250_v0  ;;  %v9253_v15 = vld [vmem:[#allocation52_spill] sm:$0xff]  ;;  %v9255_v41 = vld [vmem:[#allocation51_spill] sm:$0xff] }
 0x2fd   :  { %2621 = vmatpush1.bf16.msra.mxu0 %v2588_v6  ;;  %2673 = vmatprep.subr.bf16.mxu1 %v2591_v26  ;;  %v2587_v42 = vpack.c.bf16 %v2570_v53, %v2566_v48  ;;  %v2740_v37 = vpack.c.bf16 %v6467_v1, %v9251_v25  ;;  %v2742_v44 = vpack.c.bf16 %v6478_v46, %v9252_v57  ;;  %v9254_v53 = vld [vmem:[#allocation56_spill] sm:$0xff]  ;;  %v9256_v6 = vld [vmem:[#allocation55_spill] sm:$0xff]  ;;  %v9263_v57 = vld [vmem:[#allocation58_spill] sm:$0xff] }
 0x2fe   :  { %v7090_v4 = vpop.permute.xlu1 %3104  ;;  %5394 = vmatmul.mubr.msk.bf16.gmra.mxu1 %vm2065_vm10, %v5520_v9  ;;  %2622 = vmatprep.subr.bf16.mxu0 %v2585_v59  ;;  %v2584_v31 = vpack.c.bf16 %v2567_v62, %v2563_v40  ;;  %v2586_v9 = vpack.c.bf16 %v2569_v23, %v2565_v10  ;;  %v2739_v1 = vpack.c.bf16 %v9254_v53, %v9253_v15  ;;  %v9257_v59 = vld [vmem:[#allocation50_spill] sm:$0xff] }
 0x2ff   :  { %2674 = vmatpush1.bf16.msra.mxu1 %v2590_v11  ;;  %v7094_v17 = vpop.permute.xlu0 %3317  ;;  %2640 = vmatprep.mubr.bf16.mxu0 %v9225_v61  ;;  %v2736_v62 = vpack.c.bf16 %v6361_v16, %v6349_v60  ;;  %v2741_v26 = vpack.c.bf16 %v9256_v6, %v9255_v41  ;;  %v2738_v46 = vpack.c.bf16 %v6368_v14, %v6357_v50  ;;  %v5522_v16 = vld [vmem:[%s8914_s5 + $0x38] sm:$0xff]   ;;  %v9264_v53 = vld [vmem:[#allocation46_spill] sm:$0xff] }
 0x300   :  { %2675 = vmatprep.subr.bf16.mxu1 %v2587_v42  ;;  %2693 = vmatprep.mubr.bf16.mxu1 %v9225_v61  ;;  %v2735_v60 = vpack.c.bf16 %v9257_v59, %v6244_v43  ;;  %v2737_v40 = vpack.c.bf16 %v6270_v3, %v6252_v54  ;;  %v5523_v54 = vld [vmem:[%s8914_s5 + $0x40] sm:$0xff]   ;;  %v9259_v11 = vld [vmem:[#allocation60_spill] sm:$0xff] }
 0x301   :  { %2623 = vmatpush1.bf16.msra.mxu0 %v2584_v31  ;;  %v9258_v3 = vld [vmem:[#allocation45_spill] sm:$0xff]  ;;  %v9260_v31 = vld [vmem:[#allocation66_spill] sm:$0xff]  ;;  %v9266_v6 = vld [vmem:[#allocation68_spill] sm:$0xff] }
 0x302   :  { %v7103_v13 = vpop.permute.xlu1 %3112  ;;  %2771 = vmatprep.subr.bf16.mxu0 %v2740_v37  ;;  %v2918_v42 = vsel %vm1032_vm6, %v9259_v11, %v9258_v3  ;;  %v2919_v25 = vsel %vm1032_vm6, %v6896_v49, %v9260_v31  ;;  %v9261_v37 = vld [vmem:[#allocation64_spill] sm:$0xff] }
 0x303   :  { %2676 = vmatpush1.bf16.msra.mxu1 %v2586_v9  ;;  %v7107_v39 = vpop.permute.xlu0 %3333  ;;  %v9262_v9 = vld [vmem:[#allocation43_spill] sm:$0xff]  ;;  %v9268_v59 = vld [vmem:[#allocation24_spill] sm:$0xff] }
 0x304   :  { %2824 = vmatprep.subr.bf16.mxu1 %v2742_v44  ;;  %5401 = vmatmul.mubr.msk.bf16.vlgmr.msra.gmra.mxu0 %vm2065_vm10, %v5521_v21  ;;  %v2917_v44 = vsel %vm1032_vm6, %v9263_v57, %v9262_v9 }
 0x305   :  { %2772 = vmatpush1.bf16.msra.mxu0 %v2739_v1  ;;  %2650 = vmatprep.mubr.bf16.mxu0 %v9225_v61  ;;  %v2922_v1 = vsel %vm1032_vm6, %v9264_v53, %v9259_v11 }
 0x306   :  { %v7116_v22 = vpop.permute.xlu1 %3120  ;;  %5403 = vmatmul.mubr.msk.bf16.vlgmr.msra.gmra.mxu1 %vm2065_vm10, %v5521_v21  ;;  %2773 = vmatprep.subr.bf16.mxu0 %v2736_v62  ;;  %v2923_v21 = vsel %vm1032_vm6, %v9261_v37, %v6896_v49  ;;  %v9265_v62 = vld [vmem:[#allocation23_spill] sm:$0xff] }
 0x307   :  { %2825 = vmatpush1.bf16.msra.mxu1 %v2741_v26  ;;  %v7122_v48 = vpop.permute.xlu0 %3313  ;;  %2703 = vmatprep.mubr.bf16.mxu1 %v9225_v61  ;;  %v2934_v41 = vmul.f32 %v2918_v42, %v9265_v62  ;;  %v9269_v42 = vld [vmem:[#allocation41_spill] sm:$0xff] }
 0x308   :  { %2826 = vmatprep.subr.bf16.mxu1 %v2738_v46  ;;  %v9267_v46 = vld [vmem:[#allocation67_spill] sm:$0xff]  ;;  %v2921_v33 = vsel %vm1032_vm6, %v9269_v42, %v9263_v57  ;;  %v2926_v57 = vsel %vm1032_vm6, %v6758_v28, %v9264_v53  ;;  %v5524_v53 = vld [vmem:[%s8914_s5 + $0x48] sm:$0xff]  }
 0x309   :  { %2774 = vmatpush1.bf16.msra.mxu0 %v2735_v60  ;;  %v2937_v60 = vmul.f32 %v2923_v21, %v9268_v59  ;;  %v2927_v21 = vsel %vm1032_vm6, %v6917_v52, %v9261_v37 }
 0x30a   :  { %v7132_v23 = vpop.permute.xlu1 %3315 }
 0x30b   :  { %2827 = vmatpush1.bf16.msra.mxu1 %v2737_v40  ;;  %v7134_v50 = vpop.permute.xlu0 %3321 }
 0x30c   :  { %5402 = vmatmul.mubr.msk.bf16.gmra.mxu0 %vm2065_vm10, %v5522_v16 }
 0x30d   :  { %2791 = vmatprep.mubr.bf16.mxu0 %v9225_v61 }
 0x30e   :  { %v7137_v14 = vpop.permute.xlu1 %3323  ;;  %5404 = vmatmul.mubr.msk.bf16.gmra.mxu1 %vm2065_vm10, %v5522_v16  ;;  %v2938_v16 = vmul.f32 %v2919_v25, %v9265_v62  ;;  %v2915_v25 = vsel %vm1032_vm6, %v9260_v31, %v6917_v52  ;;  %v9270_v31 = vld [vmem:[#allocation5_spill] sm:$0xff] }
 0x30f   :  { %v7141_v43 = vpop.permute.xlu0 %3329  ;;  %2844 = vmatprep.mubr.bf16.mxu1 %v9225_v61  ;;  %v2925_v0 = vsel %vm1032_vm6, %v9270_v31, %v9269_v42 }
 0x312   :  { %v7151_v10 = vpop.permute.xlu1 %3331 }
 0x313   :  { %v2896_v15 = vpop.permute.xlu0 %2895 }
 0x314   :  { %v2920_v26 = vsel %vm1032_vm6, %v2896_v15, %v9266_v6  ;;  %v2924_v49 = vsel %vm1032_vm6, %v9267_v46, %v2896_v15  ;;  %5411 = vmatmul.mubr.msk.bf16.vlgmr.msra.gmra.mxu0 %vm2065_vm10, %v5523_v54  ;;  %v2930_v15 = vmul.f32 %v2917_v44, %v9265_v62 }
 0x315   :  { %v2941_v40 = vmul.f32 %v2924_v49, %v9268_v59  ;;  %v2942_v11 = vmul.f32 %v2920_v26, %v9265_v62  ;;  %2801 = vmatprep.mubr.bf16.mxu0 %v9225_v61  ;;  %v2933_v26 = vmul.f32 %v2922_v1, %v9268_v59  ;;  %v9271_v1 = vld [vmem:[#allocation25_spill] sm:$0xff] }
 0x316   :  { %v7181_v29 = vpop.permute.xlu1 %3339  ;;  %5413 = vmatmul.mubr.msk.bf16.vlgmr.msra.gmra.mxu1 %vm2065_vm10, %v5523_v54  ;;  %v2951_v37 = vpack.c.bf16 %v2934_v41, %v2930_v15  ;;  %v2914_v41 = vsel %vm1032_vm6, %v9258_v3, %v6758_v28 }
 0x317   :  { %v2954_v44 = vpack.c.bf16 %v2941_v40, %v2937_v60  ;;  %v2912_v49 = vpop.permute.xlu0 %2911  ;;  %v2955_v62 = vpack.c.bf16 %v2942_v11, %v2938_v16  ;;  %2854 = vmatprep.mubr.bf16.mxu1 %v9225_v61  ;;  %v2939_v60 = vmul.f32 %v2915_v25, %v9271_v1  ;;  %v9272_v16 = vld [vmem:[#allocation22_spill] sm:$0xff]  ;;  %v2935_v28 = vmul.f32 %v2914_v41, %v9271_v1 }
 0x318   :  { %v2916_v52 = vsel %vm1032_vm6, %v9266_v6, %v2912_v49  ;;  %v2928_v54 = vsel %vm1032_vm6, %v2912_v49, %v9267_v46  ;;  %v2940_v40 = vmul.f32 %v2927_v21, %v9272_v16  ;;  %v2929_v6 = vmul.f32 %v2921_v33, %v9268_v59 }
 0x319   :  { %v2943_v11 = vmul.f32 %v2916_v52, %v9271_v1  ;;  %v2944_v42 = vmul.f32 %v2928_v54, %v9272_v16  ;;  %2986 = vmatprep.subr.bf16.mxu0 %v2955_v62  ;;  %v2936_v46 = vmul.f32 %v2926_v57, %v9272_v16  ;;  %v2913_v62 = vsel %vm1032_vm6, %v9262_v9, %v9270_v31  ;;  %v5525_v31 = vld [vmem:[%s8914_s5 + $0x50] sm:$0xff]  }
 0x31a   :  { %v7221_v45 = vpop.permute.xlu1 %3311  ;;  %2987 = vmatpush1.bf16.msra.mxu0 %v2954_v44  ;;  %v2950_v49 = vpack.c.bf16 %v2933_v26, %v2929_v6  ;;  %v2932_v33 = vmul.f32 %v2925_v0, %v9272_v16  ;;  %v2931_v57 = vmul.f32 %v2913_v62, %v9271_v1  ;;  %v3138_v0 = vsel %vm1229_vm7, %v6964_v5, %v6988_v18 }
 0x31b   :  { %v2956_v15 = vpack.c.bf16 %v2943_v11, %v2939_v60  ;;  %v7229_v25 = vpop.permute.xlu0 %3337  ;;  %2988 = vmatprep.subr.bf16.mxu0 %v2951_v37  ;;  %v2957_v21 = vpack.c.bf16 %v2944_v42, %v2940_v40  ;;  %v3134_v9 = vsel %vm1229_vm7, %v6988_v18, %v6999_v2  ;;  %v3132_v37 = vsel %vm1229_vm7, %v7090_v4, %v7103_v13  ;;  %v9274_v40 = vld [vmem:[#allocation27_spill] sm:$0xff] }
 0x31c   :  { %5412 = vmatmul.mubr.msk.bf16.gmra.mxu0 %vm2065_vm10, %v5524_v53  ;;  %v2953_v26 = vpack.c.bf16 %v2936_v46, %v2932_v33  ;;  %v2952_v52 = vpack.c.bf16 %v2935_v28, %v2931_v57  ;;  %v3133_v18 = vsel %vm1229_vm7, %v6978_v24, %v6992_v38  ;;  %v3153_v11 = vmul.f32 %v3134_v9, %v9274_v40 }
 0x31d   :  { %3039 = vmatprep.subr.bf16.mxu1 %v2957_v21  ;;  %3006 = vmatprep.mubr.bf16.mxu0 %v9225_v61  ;;  %v3130_v6 = vsel %vm1229_vm7, %v6999_v2, %v7019_v56  ;;  %v3142_v41 = vsel %vm1229_vm7, %v7019_v56, %v6964_v5  ;;  %v3136_v2 = vsel %vm1229_vm7, %v7066_v63, %v7090_v4  ;;  %v9275_v4 = vld [vmem:[#allocation29_spill] sm:$0xff] }
 0x31e   :  { %v7238_v3 = vpop.permute.xlu1 %3319  ;;  %5414 = vmatmul.mubr.msk.bf16.gmra.mxu1 %vm2065_vm10, %v5524_v53  ;;  %2989 = vmatpush1.bf16.msra.mxu0 %v2950_v49  ;;  %v9273_v53 = vld [vmem:[#allocation28_spill] sm:$0xff]  ;;  %v3145_v21 = vmul.f32 %v3132_v37, %v9274_v40  ;;  %v3137_v62 = vsel %vm1229_vm7, %v6890_v8, %v6978_v24  ;;  %v3149_v33 = vmul.f32 %v3133_v18, %v9274_v40 }
 0x31f   :  { %3040 = vmatpush1.bf16.msra.mxu1 %v2956_v15  ;;  %v7243_v44 = vpop.permute.xlu0 %3532  ;;  %3059 = vmatprep.mubr.bf16.mxu1 %v9225_v61  ;;  %v3152_v60 = vmul.f32 %v3138_v0, %v9273_v53  ;;  %v3154_v28 = vmul.f32 %v3130_v6, %v9275_v4  ;;  %v3144_v24 = vmul.f32 %v3136_v2, %v9273_v53 }
 0x320   :  { %3041 = vmatprep.subr.bf16.mxu1 %v2953_v26  ;;  %v3140_v26 = vsel %vm1229_vm7, %v7116_v22, %v7066_v63  ;;  %v5526_v63 = vld [vmem:[%s8914_s5 + $0x58] sm:$0xff]  }
 0x322   :  { %v7257_v54 = vpop.permute.xlu1 %3327 }
 0x323   :  { %3042 = vmatpush1.bf16.msra.mxu1 %v2952_v52  ;;  %v3111_v42 = vpop.permute.xlu0 %3110  ;;  %v9276_v52 = vld [vmem:[#allocation26_spill] sm:$0xff] }
 0x324   :  { %v3135_v46 = vsel %vm1229_vm7, %v3111_v42, %v6873_v7  ;;  %v3139_v15 = vsel %vm1229_vm7, %v6772_v30, %v3111_v42  ;;  %5421 = vmatmul.mubr.msk.bf16.vlgmr.msra.gmra.mxu0 %vm2065_vm10, %v5525_v31  ;;  %v3155_v37 = vmul.f32 %v3142_v41, %v9276_v52  ;;  %v3148_v41 = vmul.f32 %v3137_v62, %v9273_v53 }
 0x325   :  { %v3156_v49 = vmul.f32 %v3139_v15, %v9273_v53  ;;  %v3157_v5 = vmul.f32 %v3135_v46, %v9274_v40  ;;  %3016 = vmatprep.mubr.bf16.mxu0 %v9225_v61  ;;  %v3147_v46 = vmul.f32 %v3140_v26, %v9276_v52  ;;  %v5527_v26 = vld [vmem:[%s8914_s5 + $0x60] sm:$0xff]  }
 0x326   :  { %v7291_v56 = vpop.permute.xlu1 %3335  ;;  %5423 = vmatmul.mubr.msk.bf16.vlgmr.msra.gmra.mxu1 %vm2065_vm10, %v5525_v31 }
 0x327   :  { %v3169_v57 = vpack.c.bf16 %v3156_v49, %v3152_v60  ;;  %v3127_v0 = vpop.permute.xlu0 %3126  ;;  %v3170_v9 = vpack.c.bf16 %v3157_v5, %v3153_v11  ;;  %3069 = vmatprep.mubr.bf16.mxu1 %v9225_v61  ;;  %v3141_v60 = vsel %vm1229_vm7, %v7080_v20, %v6890_v8  ;;  %v3165_v5 = vpack.c.bf16 %v3148_v41, %v3144_v24 }
 0x328   :  { %v3131_v31 = vsel %vm1229_vm7, %v6873_v7, %v3127_v0  ;;  %v3143_v18 = vsel %vm1229_vm7, %v3127_v0, %v6772_v30  ;;  %v3166_v7 = vpack.c.bf16 %v3149_v33, %v3145_v21  ;;  %v3128_v30 = vsel %vm1229_vm7, %v7103_v13, %v7116_v22 }
 0x329   :  { %v3158_v11 = vmul.f32 %v3131_v31, %v9275_v4  ;;  %v3159_v42 = vmul.f32 %v3143_v18, %v9276_v52  ;;  %3201 = vmatprep.subr.bf16.mxu0 %v3170_v9  ;;  %v3129_v21 = vsel %vm1229_vm7, %v6992_v38, %v7080_v20  ;;  %v3151_v49 = vmul.f32 %v3141_v60, %v9276_v52  ;;  %v9278_v31 = vld [vmem:[#allocation31_spill] sm:$0xff] }
 0x32a   :  { %v7323_v6 = vpop.permute.xlu1 %3530  ;;  %3202 = vmatpush1.bf16.msra.mxu0 %v3169_v57  ;;  %v3146_v13 = vmul.f32 %v3128_v30, %v9275_v4  ;;  %v3150_v33 = vmul.f32 %v3129_v21, %v9275_v4  ;;  %v3353_v20 = vsel %vm1426_vm8, %v7132_v23, %v7137_v14  ;;  %v3347_v9 = vsel %vm1426_vm8, %v7238_v3, %v7257_v54 }
 0x32b   :  { %v3171_v15 = vpack.c.bf16 %v3158_v11, %v3154_v28  ;;  %v7331_v8 = vpop.permute.xlu0 %3548  ;;  %3203 = vmatprep.subr.bf16.mxu0 %v3166_v7  ;;  %v3172_v2 = vpack.c.bf16 %v3159_v42, %v3155_v37  ;;  %v3168_v62 = vpack.c.bf16 %v3151_v49, %v3147_v46  ;;  %v3349_v28 = vsel %vm1426_vm8, %v7137_v14, %v7151_v10  ;;  %v9277_v37 = vld [vmem:[#allocation32_spill] sm:$0xff] }
 0x32c   :  { %5422 = vmatmul.mubr.msk.bf16.gmra.mxu0 %vm2065_vm10, %v5526_v63  ;;  %v3167_v57 = vpack.c.bf16 %v3150_v33, %v3146_v13  ;;  %v3367_v24 = vmul.f32 %v3353_v20, %v9277_v37  ;;  %v3348_v14 = vsel %vm1426_vm8, %v7134_v50, %v7141_v43  ;;  %v3368_v18 = vmul.f32 %v3349_v28, %v9278_v31 }
 0x32d   :  { %3254 = vmatprep.subr.bf16.mxu1 %v3172_v2  ;;  %3221 = vmatprep.mubr.bf16.mxu0 %v9225_v61  ;;  %v3345_v60 = vsel %vm1426_vm8, %v7151_v10, %v7181_v29  ;;  %v3357_v11 = vsel %vm1426_vm8, %v7181_v29, %v7132_v23  ;;  %v3351_v10 = vsel %vm1426_vm8, %v7221_v45, %v7238_v3  ;;  %v9279_v2 = vld [vmem:[#allocation33_spill] sm:$0xff] }
 0x32e   :  { %v7340_v22 = vpop.permute.xlu1 %3538  ;;  %5424 = vmatmul.mubr.msk.bf16.gmra.mxu1 %vm2065_vm10, %v5526_v63  ;;  %3204 = vmatpush1.bf16.msra.mxu0 %v3165_v5  ;;  %v3360_v41 = vmul.f32 %v3347_v9, %v9278_v31  ;;  %v3352_v46 = vsel %vm1426_vm8, %v7122_v48, %v7134_v50  ;;  %v3369_v3 = vmul.f32 %v3345_v60, %v9279_v2 }
 0x32f   :  { %3255 = vmatpush1.bf16.msra.mxu1 %v3171_v15  ;;  %v7345_v38 = vpop.permute.xlu0 %3528  ;;  %3274 = vmatprep.mubr.bf16.mxu1 %v9225_v61  ;;  %v3364_v15 = vmul.f32 %v3348_v14, %v9278_v31  ;;  %v3355_v21 = vsel %vm1426_vm8, %v7291_v56, %v7221_v45  ;;  %v3359_v50 = vmul.f32 %v3351_v10, %v9277_v37  ;;  %v5528_v45 = vld [vmem:[%s8914_s5 + $0x68] sm:$0xff]  }
 0x330   :  { %3256 = vmatprep.subr.bf16.mxu1 %v3168_v62  ;;  %v9280_v62 = vld [vmem:[#allocation30_spill] sm:$0xff]  ;;  %v3363_v14 = vmul.f32 %v3352_v46, %v9277_v37 }
 0x331   :  { %v3370_v33 = vmul.f32 %v3357_v11, %v9280_v62  ;;  %v3344_v11 = vsel %vm1426_vm8, %v7141_v43, %v7229_v25  ;;  %v3568_v43 = vsel %vm1623_vm9, %v7323_v6, %v7340_v22 }
 0x332   :  { %v7359_v0 = vpop.permute.xlu1 %3546 }
 0x333   :  { %3257 = vmatpush1.bf16.msra.mxu1 %v3167_v57  ;;  %v3326_v63 = vpop.permute.xlu0 %3325 }
 0x334   :  { %v3350_v42 = vsel %vm1426_vm8, %v3326_v63, %v7107_v39  ;;  %v3354_v7 = vsel %vm1426_vm8, %v7094_v17, %v3326_v63  ;;  %5431 = vmatmul.mubr.msk.bf16.vlgmr.msra.gmra.mxu0 %vm2065_vm10, %v5527_v26 }
 0x335   :  { %v3371_v30 = vmul.f32 %v3354_v7, %v9277_v37  ;;  %v3372_v29 = vmul.f32 %v3350_v42, %v9278_v31  ;;  %3231 = vmatprep.mubr.bf16.mxu0 %v9225_v61  ;;  %v3380_v7 = vpack.c.bf16 %v3363_v14, %v3359_v50 }
 0x336   :  { %v3555_v23 = vpop.permute.xlu1 %3554  ;;  %5433 = vmatmul.mubr.msk.bf16.vlgmr.msra.gmra.mxu1 %vm2065_vm10, %v5527_v26  ;;  %v3356_v26 = vsel %vm1426_vm8, %v7229_v25, %v7122_v48  ;;  %v3564_v25 = vsel %vm1623_vm9, %v7340_v22, %v7359_v0 }
 0x337   :  { %v3384_v49 = vpack.c.bf16 %v3371_v30, %v3367_v24  ;;  %v3342_v5 = vpop.permute.xlu0 %3341  ;;  %v3385_v13 = vpack.c.bf16 %v3372_v29, %v3368_v18  ;;  %3284 = vmatprep.mubr.bf16.mxu1 %v9225_v61  ;;  %v3362_v18 = vmul.f32 %v3355_v21, %v9280_v62  ;;  %v3366_v42 = vmul.f32 %v3356_v26, %v9280_v62  ;;  %v5529_v29 = vld [vmem:[%s8914_s5 + $0x70] sm:$0xff]   ;;  %v9281_v21 = vld [vmem:[#allocation36_spill] sm:$0xff] }
 0x338   :  { %v3346_v20 = vsel %vm1426_vm8, %v7107_v39, %v3342_v5  ;;  %v3358_v28 = vsel %vm1426_vm8, %v3342_v5, %v7094_v17  ;;  %v3381_v39 = vpack.c.bf16 %v3364_v15, %v3360_v41  ;;  %v3343_v17 = vsel %vm1426_vm8, %v7257_v54, %v7291_v56  ;;  %v9282_v5 = vld [vmem:[#allocation35_spill] sm:$0xff] }
 0x339   :  { %v3373_v57 = vmul.f32 %v3346_v20, %v9279_v2  ;;  %v3374_v9 = vmul.f32 %v3358_v28, %v9280_v62  ;;  %3416 = vmatprep.subr.bf16.mxu0 %v3385_v13  ;;  %v3361_v10 = vmul.f32 %v3343_v17, %v9279_v2  ;;  %v3383_v56 = vpack.c.bf16 %v3366_v42, %v3362_v18 }
 0x33a   :  { %v7423_v24 = vpop.permute.xlu1 %3526  ;;  %3417 = vmatpush1.bf16.msra.mxu0 %v3384_v49  ;;  %v3365_v41 = vmul.f32 %v3344_v11, %v9279_v2  ;;  %v3582_v49 = vmul.f32 %v3568_v43, %v9281_v21  ;;  %v3583_v13 = vmul.f32 %v3564_v25, %v9282_v5  ;;  %v3572_v50 = vsel %vm1623_vm9, %v3555_v23, %v7323_v6  ;;  %v9284_v11 = vld [vmem:[#allocation34_spill] sm:$0xff] }
 0x33b   :  { %v3386_v63 = vpack.c.bf16 %v3373_v57, %v3369_v3  ;;  %v3537_v48 = vpop.permute.xlu0 %3536  ;;  %3418 = vmatprep.subr.bf16.mxu0 %v3381_v39  ;;  %v3387_v60 = vpack.c.bf16 %v3374_v9, %v3370_v33  ;;  %v3560_v33 = vsel %vm1623_vm9, %v7359_v0, %v3555_v23  ;;  %v9283_v57 = vld [vmem:[#allocation37_spill] sm:$0xff]  ;;  %v3585_v42 = vmul.f32 %v3572_v50, %v9284_v11 }
 0x33c   :  { %5432 = vmatmul.mubr.msk.bf16.gmra.mxu0 %vm2065_vm10, %v5528_v45  ;;  %v3382_v46 = vpack.c.bf16 %v3365_v41, %v3361_v10  ;;  %v3584_v9 = vmul.f32 %v3560_v33, %v9283_v57  ;;  %v3567_v14 = vsel %vm1623_vm9, %v7345_v38, %v3537_v48 }
 0x33d   :  { %3469 = vmatprep.subr.bf16.mxu1 %v3387_v60  ;;  %3436 = vmatprep.mubr.bf16.mxu0 %v9225_v61 }
 0x33e   :  { %v3535_v54 = vpop.permute.xlu1 %3534  ;;  %5434 = vmatmul.mubr.msk.bf16.gmra.mxu1 %vm2065_vm10, %v5528_v45  ;;  %3419 = vmatpush1.bf16.msra.mxu0 %v3380_v7 }
 0x33f   :  { %3470 = vmatpush1.bf16.msra.mxu1 %v3386_v63  ;;  %v3545_v30 = vpop.permute.xlu0 %3544  ;;  %3489 = vmatprep.mubr.bf16.mxu1 %v9225_v61  ;;  %v3566_v0 = vsel %vm1623_vm9, %v7423_v24, %v3535_v54 }
 0x340   :  { %3471 = vmatprep.subr.bf16.mxu1 %v3383_v56  ;;  %v3563_v20 = vsel %vm1623_vm9, %v3537_v48, %v3545_v30  ;;  %v3574_v7 = vmul.f32 %v3566_v0, %v9281_v21  ;;  %v5530_v48 = vld [vmem:[%s8914_s5 + $0x78] sm:$0xff]  }
 0x341   :  { %v3579_v17 = vmul.f32 %v3563_v20, %v9282_v5 }
 0x342   :  { %v3543_v15 = vpop.permute.xlu1 %3542 }
 0x343   :  { %v3562_v3 = vsel %vm1623_vm9, %v3535_v54, %v3543_v15  ;;  %3472 = vmatpush1.bf16.msra.mxu1 %v3382_v46  ;;  %v3541_v22 = vpop.permute.xlu0 %3540 }
 0x344   :  { %v3565_v28 = vsel %vm1623_vm9, %v3541_v22, %v7331_v8  ;;  %v3569_v45 = vsel %vm1623_vm9, %v7243_v44, %v3541_v22  ;;  %5441 = vmatmul.mubr.msk.bf16.vlgmr.msra.gmra.mxu0 %vm2065_vm10, %v5529_v29  ;;  %v3575_v26 = vmul.f32 %v3562_v3, %v9282_v5 }
 0x345   :  { %v3586_v6 = vmul.f32 %v3569_v45, %v9281_v21  ;;  %v3587_v23 = vmul.f32 %v3565_v28, %v9282_v5  ;;  %3446 = vmatprep.mubr.bf16.mxu0 %v9225_v61  ;;  %v5532_v28 = vld [vmem:[%s8914_s5 + $0x88] sm:$0xff]  }
 0x346   :  { %5443 = vmatmul.mubr.msk.bf16.vlgmr.msra.gmra.mxu1 %vm2065_vm10, %v5529_v29  ;;  %v3551_v39 = vpop.permute.xlu1 %3550  ;;  %v3596_v25 = vpack.c.bf16 %v3579_v17, %v3575_v26  ;;  %v3578_v29 = vmul.f32 %v3567_v14, %v9281_v21 }
 0x347   :  { %v3599_v18 = vpack.c.bf16 %v3586_v6, %v3582_v49  ;;  %v3557_v63 = vpop.permute.xlu0 %3556  ;;  %v3600_v60 = vpack.c.bf16 %v3587_v23, %v3583_v13  ;;  %3499 = vmatprep.mubr.bf16.mxu1 %v9225_v61  ;;  %v3558_v56 = vsel %vm1623_vm9, %v3543_v15, %v3551_v39 }
 0x348   :  { %v3561_v10 = vsel %vm1623_vm9, %v7331_v8, %v3557_v63  ;;  %v3573_v54 = vsel %vm1623_vm9, %v3557_v63, %v7243_v44  ;;  %v3570_v8 = vsel %vm1623_vm9, %v3551_v39, %v7423_v24  ;;  %v3595_v49 = vpack.c.bf16 %v3578_v29, %v3574_v7 }
 0x349   :  { %v3588_v41 = vmul.f32 %v3561_v10, %v9283_v57  ;;  %v3589_v43 = vmul.f32 %v3573_v54, %v9284_v11  ;;  %3631 = vmatprep.subr.bf16.mxu0 %v3600_v60  ;;  %v3576_v15 = vmul.f32 %v3558_v56, %v9283_v57  ;;  %v3577_v22 = vmul.f32 %v3570_v8, %v9284_v11 }
 0x34a   :  { %3632 = vmatpush1.bf16.msra.mxu0 %v3599_v18 }
 0x34b   :  { %v3601_v44 = vpack.c.bf16 %v3588_v41, %v3584_v9  ;;  %v3553_v46 = vpop.permute.xlu0 %3552  ;;  %3633 = vmatprep.subr.bf16.mxu0 %v3596_v25  ;;  %v3602_v3 = vpack.c.bf16 %v3589_v43, %v3585_v42 }
 0x34c   :  { %v3559_v13 = vsel %vm1623_vm9, %v3545_v30, %v3553_v46  ;;  %v3571_v33 = vsel %vm1623_vm9, %v3553_v46, %v7345_v38  ;;  %5442 = vmatmul.mubr.msk.bf16.gmra.mxu0 %vm2065_vm10, %v5530_v48  ;;  %v5531_v38 = vld [vmem:[%s8914_s5 + $0x80] sm:$0xff]  }
 0x34d   :  { %v3580_v24 = vmul.f32 %v3559_v13, %v9283_v57  ;;  %v3581_v50 = vmul.f32 %v3571_v33, %v9284_v11  ;;  %3684 = vmatprep.subr.bf16.mxu1 %v3602_v3  ;;  %3651 = vmatprep.mubr.bf16.mxu0 %v9225_v61 }
 0x34e   :  { %5444 = vmatmul.mubr.msk.bf16.gmra.mxu1 %vm2065_vm10, %v5530_v48  ;;  %3634 = vmatpush1.bf16.msra.mxu0 %v3595_v49 }
 0x34f   :  { %v3597_v20 = vpack.c.bf16 %v3580_v24, %v3576_v15  ;;  %3685 = vmatpush1.bf16.msra.mxu1 %v3601_v44  ;;  %v3598_v30 = vpack.c.bf16 %v3581_v50, %v3577_v22  ;;  %3704 = vmatprep.mubr.bf16.mxu1 %v9225_v61 }
 0x351   :  { %3686 = vmatprep.subr.bf16.mxu1 %v3598_v30 }
 0x353   :  { %3687 = vmatpush1.bf16.msra.mxu1 %v3597_v20 }
 0x354   :  { %5451 = vmatmul.mubr.msk.bf16.vlgmr.msra.gmra.mxu0 %vm2065_vm10, %v5531_v38 }
 0x355   :  { %3661 = vmatprep.mubr.bf16.mxu0 %v9225_v61 }
 0x356   :  { %5453 = vmatmul.mubr.msk.bf16.vlgmr.msra.gmra.mxu1 %vm2065_vm10, %v5531_v38 }
 0x357   :  { %3714 = vmatprep.mubr.bf16.mxu1 %v9225_v61 }
 0x35c   :  { %5452 = vmatmul.mubr.msk.bf16.gmra.mxu0 %vm2065_vm10, %v5532_v28 }
 0x35d   :  { %4013 = vmatprep.mubr.bf16.mxu0 %v9225_v61 }
 0x35e   :  { %5454 = vmatmul.mubr.msk.bf16.gmra.mxu1 %vm2065_vm10, %v5532_v28 }
 0x35f   :  { %4054 = vmatprep.mubr.bf16.mxu1 %v9225_v61 }
 0x394   :  { %v2106_v45 = vpop.f32.mrf.mxu0 }
 0x396   :  { %v2159_v0 = vpop.f32.mrf.mxu1  ;;  %v2108_v26 = vpop.f32.mrf.mxu0 }
 0x398   :  { %v2161_v6 = vpop.f32.mrf.mxu1  ;;  %v2110_v23 = vpop.f32.mrf.mxu0 }
 0x39a   :  { %v2163_v9 = vpop.f32.mrf.mxu1  ;;  %v2112_v39 = vpop.f32.mrf.mxu0 }
 0x39c   :  { %v2165_v14 = vpop.f32.mrf.mxu1  ;;  %v2116_v17 = vpop.f32.mrf.mxu0 }
 0x39e   :  { %v2169_v18 = vpop.f32.mrf.mxu1  ;;  %v2118_v63 = vpop.f32.mrf.mxu0 }
 0x3a0   :  { %v2171_v60 = vpop.f32.mrf.mxu1  ;;  %v2120_v42 = vpop.f32.mrf.mxu0 }
 0x3a2   :  { %v2173_v7 = vpop.f32.mrf.mxu1  ;;  %v2122_v10 = vpop.f32.mrf.mxu0 }
 0x3a4   :  { %v2175_v54 = vpop.f32.mrf.mxu1  ;;  %v2228_v48 = vpop.f32.mrf.mxu0 }
 0x3a5   :  { %v2229_v56 = vadd.f32 %v2228_v48, %v2106_v45 }
 0x3a6   :  { %v2281_v41 = vpop.f32.mrf.mxu1  ;;  %v2230_v43 = vpop.f32.mrf.mxu0 }
 0x3a7   :  { %v2282_v25 = vadd.f32 %v2281_v41, %v2159_v0  ;;  %v2231_v29 = vadd.f32 %v2230_v43, %v2108_v26 }
 0x3a8   :  { %v2283_v8 = vpop.f32.mrf.mxu1  ;;  %v2232_v44 = vpop.f32.mrf.mxu0 }
 0x3a9   :  { %v2284_v46 = vadd.f32 %v2283_v8, %v2161_v6  ;;  %v2233_v3 = vadd.f32 %v2232_v44, %v2110_v23 }
 0x3aa   :  { %v2285_v49 = vpop.f32.mrf.mxu1  ;;  %v2234_v15 = vpop.f32.mrf.mxu0 }
 0x3ab   :  { %v2286_v13 = vadd.f32 %v2285_v49, %v2163_v9  ;;  %v2235_v33 = vadd.f32 %v2234_v15, %v2112_v39 }
 0x3ac   :  { %v2287_v22 = vpop.f32.mrf.mxu1  ;;  %v2238_v24 = vpop.f32.mrf.mxu0 }
 0x3ad   :  { %v2288_v50 = vadd.f32 %v2287_v22, %v2165_v14  ;;  %v2239_v20 = vadd.f32 %v2238_v24, %v2116_v17 }
 0x3ae   :  { %v2291_v30 = vpop.f32.mrf.mxu1  ;;  %v2240_v38 = vpop.f32.mrf.mxu0 }
 0x3af   :  { %v2292_v28 = vadd.f32 %v2291_v30, %v2169_v18  ;;  %v2241_v45 = vadd.f32 %v2240_v38, %v2118_v63 }
 0x3b0   :  { %v2293_v48 = vpop.f32.mrf.mxu1  ;;  %v2242_v11 = vpop.f32.mrf.mxu0 }
 0x3b1   :  { %v2294_v0 = vadd.f32 %v2293_v48, %v2171_v60  ;;  %v2243_v26 = vadd.f32 %v2242_v11, %v2120_v42 }
 0x3b2   :  { %v2295_v41 = vpop.f32.mrf.mxu1  ;;  %v2244_v43 = vpop.f32.mrf.mxu0 }
 0x3b3   :  { %v2296_v6 = vadd.f32 %v2295_v41, %v2173_v7  ;;  %v2245_v23 = vadd.f32 %v2244_v43, %v2122_v10 }
 0x3b4   :  { %v2297_v8 = vpop.f32.mrf.mxu1  ;;  %v2427_v44 = vpop.f32.mrf.mxu0 }
 0x3b5   :  { %v2298_v9 = vadd.f32 %v2297_v8, %v2175_v54  ;;  %v2499_v39 = vadd.f32 %v2427_v44, %v2229_v56 }
 0x3b6   :  { %v2480_v49 = vpop.f32.mrf.mxu1  ;;  %v2429_v15 = vpop.f32.mrf.mxu0 }
 0x3b7   :  { %v2501_v14 = vadd.f32 %v2480_v49, %v2282_v25  ;;  %v2500_v17 = vadd.f32 %v2429_v15, %v2231_v29 }
 0x3b8   :  { %v2482_v22 = vpop.f32.mrf.mxu1  ;;  %v2431_v24 = vpop.f32.mrf.mxu0 }
 0x3b9   :  { %v2502_v18 = vadd.f32 %v2482_v22, %v2284_v46  ;;  %v2503_v63 = vadd.f32 %v2431_v24, %v2233_v3 }
 0x3ba   :  { %v2484_v30 = vpop.f32.mrf.mxu1  ;;  %v2433_v38 = vpop.f32.mrf.mxu0 }
 0x3bb   :  { %v2505_v60 = vadd.f32 %v2484_v30, %v2286_v13  ;;  %v2504_v11 = vadd.f32 %v2433_v38, %v2235_v33 }
 0x3bc   :  { %v2486_v42 = vpop.f32.mrf.mxu1  ;;  %v2437_v48 = vpop.f32.mrf.mxu0 }
 0x3bd   :  { %v2506_v7 = vadd.f32 %v2486_v42, %v2288_v50  ;;  %v2507_v10 = vadd.f32 %v2437_v48, %v2239_v20 }
 0x3be   :  { %v2490_v41 = vpop.f32.mrf.mxu1  ;;  %v2439_v43 = vpop.f32.mrf.mxu0 }
 0x3bf   :  { %v2509_v54 = vadd.f32 %v2490_v41, %v2292_v28  ;;  %v2508_v56 = vadd.f32 %v2439_v43, %v2241_v45 }
 0x3c0   :  { %v2492_v8 = vpop.f32.mrf.mxu1  ;;  %v2441_v44 = vpop.f32.mrf.mxu0 }
 0x3c1   :  { %v2510_v25 = vadd.f32 %v2492_v8, %v2294_v0  ;;  %v2511_v29 = vadd.f32 %v2441_v44, %v2243_v26 }
 0x3c2   :  { %v2494_v49 = vpop.f32.mrf.mxu1  ;;  %v2443_v15 = vpop.f32.mrf.mxu0 }
 0x3c3   :  { %v2513_v46 = vadd.f32 %v2494_v49, %v2296_v6  ;;  %v2512_v3 = vadd.f32 %v2443_v15, %v2245_v23 }
 0x3c4   :  { %v2496_v22 = vpop.f32.mrf.mxu1  ;;  %v2642_v24 = vpop.f32.mrf.mxu0 }
 0x3c5   :  { %v2514_v13 = vadd.f32 %v2496_v22, %v2298_v9  ;;  %v7532_v33 = vadd.f32 %v2642_v24, %v2499_v39 }
 0x3c6   :  { %v2695_v30 = vpop.f32.mrf.mxu1  ;;  %v2644_v50 = vpop.f32.mrf.mxu0 }
 0x3c7   :  { %v7534_v20 = vadd.f32 %v2695_v30, %v2501_v14  ;;  %v2715_v38 = vadd.f32 %v2644_v50, %v2500_v17 }
 0x3c8   :  { %v2697_v28 = vpop.f32.mrf.mxu1  ;;  %v2646_v45 = vpop.f32.mrf.mxu0 }
 0x3c9   :  { %v2717_v42 = vadd.f32 %v2697_v28, %v2502_v18  ;;  %v7536_v48 = vadd.f32 %v2646_v45, %v2503_v63 }
 0x3ca   :  { %v2699_v0 = vpop.f32.mrf.mxu1  ;;  %v2648_v26 = vpop.f32.mrf.mxu0 }
 0x3cb   :  { %v7538_v41 = vadd.f32 %v2699_v0, %v2505_v60  ;;  %v2719_v6 = vadd.f32 %v2648_v26, %v2504_v11 }
 0x3cc   :  { %v2701_v23 = vpop.f32.mrf.mxu1  ;;  %v2652_v43 = vpop.f32.mrf.mxu0 }
 0x3cd   :  { %v2721_v9 = vadd.f32 %v2701_v23, %v2506_v7  ;;  %v2722_v39 = vadd.f32 %v2652_v43, %v2507_v10 }
 0x3ce   :  { %v2705_v8 = vpop.f32.mrf.mxu1  ;;  %v2654_v44 = vpop.f32.mrf.mxu0 }
 0x3cf   :  { %v2724_v49 = vadd.f32 %v2705_v8, %v2509_v54  ;;  %v2723_v14 = vadd.f32 %v2654_v44, %v2508_v56 }
 0x3d0   :  { %v2707_v15 = vpop.f32.mrf.mxu1  ;;  %v2656_v17 = vpop.f32.mrf.mxu0 }
 0x3d1   :  { %v2725_v22 = vadd.f32 %v2707_v15, %v2510_v25  ;;  %v2726_v24 = vadd.f32 %v2656_v17, %v2511_v29 }
 0x3d2   :  { %v2709_v18 = vpop.f32.mrf.mxu1  ;;  %v2658_v63 = vpop.f32.mrf.mxu0 }
 0x3d3   :  { %v2728_v30 = vadd.f32 %v2709_v18, %v2513_v46  ;;  %v2727_v50 = vadd.f32 %v2658_v63, %v2512_v3 }
 0x3d4   :  { %v2711_v28 = vpop.f32.mrf.mxu1  ;;  %v7540_v60 = vpop.f32.mrf.mxu0 }
 0x3d5   :  { %v2729_v11 = vadd.f32 %v2711_v28, %v2514_v13 }
 0x3d6   :  { %v7542_v45 = vpop.f32.mrf.mxu1  ;;  %v2795_v7 = vpop.f32.mrf.mxu0 }
 0x3d7   :  { %v2866_v10 = vadd.f32 %v2795_v7, %v2715_v38 }
 0x3d8   :  { %v2848_v0 = vpop.f32.mrf.mxu1  ;;  %v7544_v26 = vpop.f32.mrf.mxu0 }
 0x3d9   :  { %v2868_v54 = vadd.f32 %v2848_v0, %v2717_v42 }
 0x3da   :  { %v7546_v56 = vpop.f32.mrf.mxu1  ;;  %v2799_v25 = vpop.f32.mrf.mxu0 }
 0x3db   :  { %v2870_v29 = vadd.f32 %v2799_v25, %v2719_v6 }
 0x3dc   :  { %v2852_v23 = vpop.f32.mrf.mxu1  ;;  %v2803_v43 = vpop.f32.mrf.mxu0 }
 0x3dd   :  { %v2872_v46 = vadd.f32 %v2852_v23, %v2721_v9  ;;  %v2873_v3 = vadd.f32 %v2803_v43, %v2722_v39 }
 0x3de   :  { %v2856_v8 = vpop.f32.mrf.mxu1  ;;  %v2805_v44 = vpop.f32.mrf.mxu0 }
 0x3df   :  { %v2875_v15 = vadd.f32 %v2856_v8, %v2724_v49  ;;  %v2874_v13 = vadd.f32 %v2805_v44, %v2723_v14 }
 0x3e0   :  { %v2858_v17 = vpop.f32.mrf.mxu1  ;;  %v2807_v18 = vpop.f32.mrf.mxu0 }
 0x3e1   :  { %v2876_v63 = vadd.f32 %v2858_v17, %v2725_v22  ;;  %v2877_v38 = vadd.f32 %v2807_v18, %v2726_v24 }
 0x3e2   :  { %v2860_v28 = vpop.f32.mrf.mxu1  ;;  %v2809_v7 = vpop.f32.mrf.mxu0 }
 0x3e3   :  { %v2879_v57 = vadd.f32 %v2860_v28, %v2728_v30  ;;  %v2878_v42 = vadd.f32 %v2809_v7, %v2727_v50 }
 0x3e4   :  { %v2862_v0 = vpop.f32.mrf.mxu1  ;;  %v7548_v21 = vpop.f32.mrf.mxu0 }
 0x3e5   :  { %v2880_v6 = vadd.f32 %v2862_v0, %v2729_v11 }
 0x3e6   :  { %v7550_v25 = vpop.f32.mrf.mxu1  ;;  %v3010_v9 = vpop.f32.mrf.mxu0 }
 0x3e7   :  { %v3081_v39 = vadd.f32 %v3010_v9, %v2866_v10 }
 0x3e8   :  { %v3063_v23 = vpop.f32.mrf.mxu1  ;;  %v7552_v43 = vpop.f32.mrf.mxu0 }
 0x3e9   :  { %v3083_v49 = vadd.f32 %v3063_v23, %v2868_v54 }
 0x3ea   :  { %v7554_v14 = vpop.f32.mrf.mxu1  ;;  %v3014_v22 = vpop.f32.mrf.mxu0 }
 0x3eb   :  { %v3085_v24 = vadd.f32 %v3014_v22, %v2870_v29 }
 0x3ec   :  { %v3067_v8 = vpop.f32.mrf.mxu1  ;;  %v3018_v44 = vpop.f32.mrf.mxu0 }
 0x3ed   :  { %v3087_v30 = vadd.f32 %v3067_v8, %v2872_v46  ;;  %v3088_v50 = vadd.f32 %v3018_v44, %v2873_v3 }
 0x3ee   :  { %v3071_v17 = vpop.f32.mrf.mxu1  ;;  %v3020_v18 = vpop.f32.mrf.mxu0 }
 0x3ef   :  { %v3090_v28 = vadd.f32 %v3071_v17, %v2875_v15  ;;  %v3089_v11 = vadd.f32 %v3020_v18, %v2874_v13 }
 0x3f0   :  { %v3073_v7 = vpop.f32.mrf.mxu1  ;;  %v3022_v0 = vpop.f32.mrf.mxu0 }
 0x3f1   :  { %v3091_v5 = vadd.f32 %v3073_v7, %v2876_v63  ;;  %v3092_v10 = vadd.f32 %v3022_v0, %v2877_v38 }
 0x3f2   :  { %v3075_v9 = vpop.f32.mrf.mxu1  ;;  %v3024_v61 = vpop.f32.mrf.mxu0 }
 0x3f3   :  { %v3094_v62 = vadd.f32 %v3075_v9, %v2879_v57  ;;  %v3093_v54 = vadd.f32 %v3024_v61, %v2878_v42 }
 0x3f4   :  { %v3077_v23 = vpop.f32.mrf.mxu1  ;;  %v3223_v2 = vpop.f32.mrf.mxu0 }
 0x3f5   :  { %v3095_v31 = vadd.f32 %v3077_v23, %v2880_v6 }
 0x3f6   :  { %v3276_v29 = vpop.f32.mrf.mxu1  ;;  %v3225_v22 = vpop.f32.mrf.mxu0 }
 0x3f7   :  { %v3296_v37 = vadd.f32 %v3225_v22, %v3081_v39 }
 0x3f8   :  { %v3278_v46 = vpop.f32.mrf.mxu1  ;;  %v7556_v3 = vpop.f32.mrf.mxu0 }
 0x3f9   :  { %v3298_v8 = vadd.f32 %v3278_v46, %v3083_v49 }
 0x3fa   :  { %v7558_v15 = vpop.f32.mrf.mxu1  ;;  %v3229_v13 = vpop.f32.mrf.mxu0 }
 0x3fb   :  { %v3300_v44 = vadd.f32 %v3229_v13, %v3085_v24 }
 0x3fc   :  { %v3282_v63 = vpop.f32.mrf.mxu1  ;;  %v3233_v38 = vpop.f32.mrf.mxu0 }
 0x3fd   :  { %v3302_v17 = vadd.f32 %v3282_v63, %v3087_v30  ;;  %v3303_v18 = vadd.f32 %v3233_v38, %v3088_v50 }
 0x3fe   :  { %v3286_v57 = vpop.f32.mrf.mxu1  ;;  %v3235_v61 = vpop.f32.mrf.mxu0 }
 0x3ff   :  { %v3305_v42 = vadd.f32 %v3286_v57, %v3090_v28  ;;  %v3304_v7 = vadd.f32 %v3235_v61, %v3089_v11 }
 0x400   :  { %v3288_v6 = vpop.f32.mrf.mxu1  ;;  %v3237_v0 = vpop.f32.mrf.mxu0 }
 0x401   :  { %v3306_v9 = vadd.f32 %v3288_v6, %v3091_v5  ;;  %v3307_v39 = vadd.f32 %v3237_v0, %v3092_v10  ;;  %v7566_v6 = vpop.permute.xlu1 %3757 }
 0x402   :  { %v3290_v23 = vpop.f32.mrf.mxu1  ;;  %v3239_v22 = vpop.f32.mrf.mxu0 }
 0x403   :  { %v3309_v52 = vadd.f32 %v3290_v23, %v3094_v62  ;;  %v3308_v49 = vadd.f32 %v3239_v22, %v3093_v54  ;;  %v2865_v62 = vadd.f32 %v7540_v60, %v7532_v33 }
 0x404   :  { %v3292_v46 = vpop.f32.mrf.mxu1  ;;  %v3438_v4 = vpop.f32.mrf.mxu0 }
 0x405   :  { %v3310_v40 = vadd.f32 %v3292_v46, %v3095_v31 }
 0x406   :  { %v3491_v24 = vpop.f32.mrf.mxu1  ;;  %v3440_v13 = vpop.f32.mrf.mxu0 }
 0x407   :  { %v7560_v53 = vadd.f32 %v3440_v13, %v3296_v37  ;;  %v2867_v37 = vadd.f32 %v7542_v45, %v7534_v20 }
 0x408   :  { %v3493_v30 = vpop.f32.mrf.mxu1  ;;  %v3442_v50 = vpop.f32.mrf.mxu0 }
 0x409   :  { %v3513_v63 = vadd.f32 %v3493_v30, %v3298_v8  ;;  %v3080_v8 = vadd.f32 %v7548_v21, %v2865_v62  ;;  %v3082_v46 = vadd.f32 %v7550_v25, %v2867_v37  ;;  %v2871_v30 = vadd.f32 %v7546_v56, %v7538_v41 }
 0x40a   :  { %v3495_v28 = vpop.f32.mrf.mxu1  ;;  %v3444_v11 = vpop.f32.mrf.mxu0  ;;  %v7600_v41 = vstv %s8916_s10 }
 0x40b   :  { %v7562_v38 = vadd.f32 %v3444_v11, %v3300_v44  ;;  %v3295_v33 = vadd.f32 %v3223_v2, %v3080_v8  ;;  %v3297_v45 = vadd.f32 %v3276_v29, %v3082_v46  ;;  %v7591_v11 = vpop.permute.xlu0 %3762 }
 0x40c   :  { %v3497_v5 = vpop.f32.mrf.mxu1  ;;  %v3448_v10 = vpop.f32.mrf.mxu0 }
 0x40d   :  { %v3517_v54 = vadd.f32 %v3497_v5, %v3302_v17  ;;  %v3518_v57 = vadd.f32 %v3448_v10, %v3303_v18  ;;  %v2869_v18 = vadd.f32 %v7544_v26, %v7536_v48  ;;  %v3510_v21 = vadd.f32 %v3438_v4, %v3295_v33 }
 0x40e   :  { %v3501_v61 = vpop.f32.mrf.mxu1  ;;  %v3450_v31 = vpop.f32.mrf.mxu0  ;;  %v3512_v48 = vadd.f32 %v3491_v24, %v3297_v45  ;;  %v3086_v4 = vadd.f32 %v7554_v14, %v2871_v30 }
 0x40f   :  { %v7571_v0 = vadd.f32 %v3501_v61, %v3305_v42  ;;  %v7573_v44 = vadd.f32 %v3450_v31, %v3304_v7  ;;  %v3084_v2 = vadd.f32 %v7552_v43, %v2869_v18 }
 0x410   :  { %v3503_v23 = vpop.f32.mrf.mxu1  ;;  %v3452_v22 = vpop.f32.mrf.mxu0  ;;  %v3301_v24 = vadd.f32 %v7558_v15, %v3086_v4 }
 0x411   :  { %v7576_v60 = vadd.f32 %v3503_v23, %v3306_v9  ;;  %v7578_v17 = vadd.f32 %v3452_v22, %v3307_v39  ;;  %v7589_v39 = vpop.permute.xlu1 %3747  ;;  %v3753_v22 = vpop.permute.xlu0 %3752 }
 0x412   :  { %v3505_v13 = vpop.f32.mrf.mxu1  ;;  %v3454_v20 = vpop.f32.mrf.mxu0  ;;  %v3516_v61 = vadd.f32 %v3495_v28, %v3301_v24 }
 0x413   :  { %v7582_v42 = vadd.f32 %v3505_v13, %v3309_v52  ;;  %v7584_v7 = vadd.f32 %v3454_v20, %v3308_v49  ;;  %v3299_v52 = vadd.f32 %v7556_v3, %v3084_v2 }
 0x414   :  { %v3507_v25 = vpop.f32.mrf.mxu1  ;;  %v3653_v9 = vpop.f32.mrf.mxu0 }
 0x415   :  { %v7593_v26 = vadd.f32 %v3507_v25, %v3310_v40  ;;  %v3725_v29 = vadd.f32 %v3653_v9, %v3510_v21  ;;  %v3514_v40 = vadd.f32 %v3442_v50, %v3299_v52 }
 0x416   :  { %v3706_v56 = vpop.f32.mrf.mxu1  ;;  %v7602_v43 = vpop.f32.mrf.mxu0 }
 0x417   :  { %v3765_v49 = vadd.f32 %v7589_v39, %v3725_v29  ;;  %v3727_v5 = vadd.f32 %v3706_v56, %v3512_v48 }
 0x418   :  { %v3708_v10 = vpop.f32.mrf.mxu1  ;;  %v3657_v62 = vpop.f32.mrf.mxu0 }
 0x419   :  { %vm3782_vm11 = vcmp.ge.f32.partialorder %v3765_v49, 0.0  ;;  %v3799_v14 = vmul.f32 %v7600_v41, %v3765_v49  ;;  %v3767_v3 = vadd.f32 %v7589_v39, %v3727_v5  ;;  %v3728_v31 = vadd.f32 %v3708_v10, %v3513_v63 }
 0x41a   :  { %v3729_v37 = vadd.f32 %v3657_v62, %v3514_v40  ;;  %v3710_v8 = vpop.f32.mrf.mxu1  ;;  %v3659_v23 = vpop.f32.mrf.mxu0 }
 0x41b   :  { %v7608_v46 = vsel %vm3782_vm11, %v3765_v49, %v3799_v14  ;;  %vm3784_vm12 = vcmp.ge.f32.partialorder %v3767_v3, 0.0  ;;  %v3801_v33 = vmul.f32 %v7600_v41, %v3767_v3  ;;  %v3768_v15 = vadd.f32 %v7589_v39, %v3728_v31 }
 0x41c   :  { %9285 = vst [vmem:[#allocation10_spill] sm:$0xff] %v7608_v46  ;;  %v3769_v50 = vadd.f32 %v3753_v22, %v3729_v37  ;;  %v3731_v18 = vadd.f32 %v3710_v8, %v3516_v61  ;;  %v3712_v13 = vpop.f32.mrf.mxu1  ;;  %3904 = vrot.lane.b32.xlu1 %v7608_v46, %s5534_s25  ;;  %v3663_v20 = vpop.f32.mrf.mxu0  ;;  %v3730_v63 = vadd.f32 %v3659_v23, %v7562_v38 }
 0x41d   :  { %v3732_v28 = vadd.f32 %v3712_v13, %v3517_v54  ;;  %v3733_v45 = vadd.f32 %v3663_v20, %v3518_v57  ;;  %v7615_v21 = vsel %vm3784_vm12, %v3767_v3, %v3801_v33  ;;  %vm3785_vm13 = vcmp.ge.f32.partialorder %v3768_v15, 0.0 }
 0x41e   :  { %9286 = vst [vmem:[#allocation11_spill] sm:$0xff] %v7615_v21  ;;  %v3802_v30 = vmul.f32 %v7600_v41, %v3768_v15  ;;  %vm3786_vm14 = vcmp.ge.f32.partialorder %v3769_v50, 0.0  ;;  %v3716_v2 = vpop.f32.mrf.mxu1  ;;  %v3665_v25 = vpop.f32.mrf.mxu0  ;;  %v3803_v9 = vmul.f32 %v7600_v41, %v3769_v50  ;;  %v3771_v48 = vadd.f32 %v3753_v22, %v3731_v18 }
 0x41f   :  { %v3770_v29 = vadd.f32 %v3753_v22, %v3730_v63  ;;  %v3772_v4 = vadd.f32 %v3753_v22, %v3732_v28  ;;  %v3773_v56 = vadd.f32 %v7566_v6, %v3733_v45  ;;  %v3735_v38 = vadd.f32 %v3716_v2, %v7571_v0 }
 0x420   :  { %v7619_v52 = vsel %vm3785_vm13, %v3768_v15, %v3802_v30  ;;  %v3734_v54 = vadd.f32 %v3665_v25, %v7573_v44  ;;  %v3718_v57 = vpop.f32.mrf.mxu1  ;;  %3920 = vrot.lane.b32.xlu1 %v7615_v21, %s5534_s25  ;;  %v3667_v49 = vpop.f32.mrf.mxu0  ;;  %v7626_v5 = vsel %vm3786_vm14, %v3769_v50, %v3803_v9  ;;  %vm3788_vm15 = vcmp.ge.f32.partialorder %v3771_v48, 0.0 }
 0x421   :  { %9287 = vst [vmem:[#allocation13_spill] sm:$0xff] %v7619_v52  ;;  %9288 = vst [vmem:[#allocation12_spill] sm:$0xff] %v7626_v5  ;;  %v3805_v24 = vmul.f32 %v7600_v41, %v3771_v48  ;;  %vm3787_vm2 = vcmp.ge.f32.partialorder %v3770_v29, 0.0  ;;  %v3804_v40 = vmul.f32 %v7600_v41, %v3770_v29  ;;  %vm3789_vm3 = vcmp.ge.f32.partialorder %v3772_v4, 0.0  ;;  %3906 = vrot.lane.b32.xlu0 %v7626_v5, %s5534_s25 }
 0x422   :  { %v3806_v10 = vmul.f32 %v7600_v41, %v3772_v4  ;;  %vm3790_vm11 = vcmp.ge.f32.partialorder %v3773_v56, 0.0  ;;  %v3720_v0 = vpop.f32.mrf.mxu1  ;;  %v3807_v62 = vmul.f32 %v7600_v41, %v3773_v56  ;;  %v3775_v14 = vadd.f32 %v7566_v6, %v3735_v38  ;;  %v3669_v23 = vpop.f32.mrf.mxu0 }
 0x423   :  { %v7633_v44 = vsel %vm3788_vm15, %v3771_v48, %v3805_v24  ;;  %v3774_v3 = vadd.f32 %v7566_v6, %v3734_v54  ;;  %v7638_v61 = vsel %vm3787_vm2, %v3770_v29, %v3804_v40  ;;  %v3736_v37 = vadd.f32 %v3718_v57, %v7576_v60 }
 0x424   :  { %9289 = vst [vmem:[#allocation14_spill] sm:$0xff] %v7633_v44  ;;  %9290 = vst [vmem:[#allocation47_spill] sm:$0xff] %v7638_v61  ;;  %v7640_v31 = vsel %vm3789_vm3, %v3772_v4, %v3806_v10  ;;  %v3737_v8 = vadd.f32 %v3667_v49, %v7578_v17  ;;  %v3722_v22 = vpop.f32.mrf.mxu1  ;;  %3831 = vrot.lane.b32.xlu1 %v7608_v46, %s5536_s1  ;;  %v7646_v33 = vsel %vm3790_vm11, %v3773_v56, %v3807_v62 }
 0x425   :  { %9291 = vst [vmem:[#allocation38_spill] sm:$0xff] %v7640_v31  ;;  %9292 = vst [vmem:[#allocation15_spill] sm:$0xff] %v7646_v33  ;;  %vm3792_vm12 = vcmp.ge.f32.partialorder %v3775_v14, 0.0  ;;  %v3809_v15 = vmul.f32 %v7600_v41, %v3775_v14  ;;  %vm3791_vm13 = vcmp.ge.f32.partialorder %v3774_v3, 0.0  ;;  %v3808_v50 = vmul.f32 %v7600_v41, %v3774_v3  ;;  %3922 = vrot.lane.b32.xlu0 %v7633_v44, %s5534_s25 }
 0x426   :  { %v3776_v18 = vadd.f32 %v7566_v6, %v3736_v37  ;;  %v3777_v13 = vadd.f32 %v7591_v11, %v3737_v8  ;;  %v3739_v60 = vadd.f32 %v3720_v0, %v7582_v42  ;;  %v3738_v20 = vadd.f32 %v3669_v23, %v7584_v7 }
 0x427   :  { %v7655_v17 = vsel %vm3792_vm12, %v3775_v14, %v3809_v15  ;;  %v3740_v63 = vadd.f32 %v3722_v22, %v7593_v26  ;;  %v7659_v28 = vsel %vm3791_vm13, %v3774_v3, %v3808_v50  ;;  %v3726_v38 = vadd.f32 %v7602_v43, %v7560_v53 }
 0x428   :  { %9293 = vst [vmem:[#allocation17_spill] sm:$0xff] %v7655_v17  ;;  %vm3793_vm14 = vcmp.ge.f32.partialorder %v3776_v18, 0.0  ;;  %v3810_v45 = vmul.f32 %v7600_v41, %v3776_v18  ;;  %vm3794_vm15 = vcmp.ge.f32.partialorder %v3777_v13, 0.0  ;;  %3847 = vrot.lane.b32.xlu1 %v7615_v21, %s5536_s1  ;;  %v3811_v6 = vmul.f32 %v7600_v41, %v3777_v13 }
 0x429   :  { %v3779_v42 = vadd.f32 %v7591_v11, %v3739_v60  ;;  %v3778_v30 = vadd.f32 %v7591_v11, %v3738_v20  ;;  %v3780_v2 = vadd.f32 %v7591_v11, %v3740_v63  ;;  %3833 = vrot.lane.b32.xlu0 %v7626_v5, %s5536_s1  ;;  %v3766_v54 = vadd.f32 %v7589_v39, %v3726_v38 }
 0x42a   :  { %v7668_v7 = vsel %vm3793_vm14, %v3776_v18, %v3810_v45  ;;  %v7674_v25 = vsel %vm3794_vm15, %v3777_v13, %v3811_v6 }
 0x42b   :  { %9294 = vst [vmem:[#allocation16_spill] sm:$0xff] %v7668_v7  ;;  %9295 = vst [vmem:[#allocation61_spill] sm:$0xff] %v7674_v25  ;;  %vm3796_vm2 = vcmp.ge.f32.partialorder %v3779_v42, 0.0  ;;  %v3813_v9 = vmul.f32 %v7600_v41, %v3779_v42  ;;  %vm3795_vm3 = vcmp.ge.f32.partialorder %v3778_v30, 0.0  ;;  %v3812_v48 = vmul.f32 %v7600_v41, %v3778_v30 }
 0x42c   :  { %vm3797_vm11 = vcmp.ge.f32.partialorder %v3780_v2, 0.0  ;;  %v3814_v29 = vmul.f32 %v7600_v41, %v3780_v2  ;;  %4148 = vrot.lane.b32.xlu1 %v7608_v46, %s5537_s26  ;;  %v3800_v57 = vmul.f32 %v7600_v41, %v3766_v54  ;;  %vm3783_vm12 = vcmp.ge.f32.partialorder %v3766_v54, 0.0 }
 0x42d   :  { %v7681_v11 = vsel %vm3796_vm2, %v3779_v42, %v3813_v9  ;;  %v7683_v4 = vsel %vm3795_vm3, %v3778_v30, %v3812_v48  ;;  %3849 = vrot.lane.b32.xlu0 %v7633_v44, %s5536_s1 }
 0x42e   :  { %9296 = vst [vmem:[#allocation57_spill] sm:$0xff] %v7681_v11  ;;  %v7685_v56 = vsel %vm3797_vm11, %v3780_v2, %v3814_v29  ;;  %v7733_v53 = vsel %vm3783_vm12, %v3766_v54, %v3800_v57 }
 0x42f   :  { %9297 = vst [vmem:[#allocation42_spill] sm:$0xff] %v7685_v56  ;;  %9298 = vst [vmem:[#allocation63_spill] sm:$0xff] %v7733_v53 }
 0x430   :  { %4164 = vrot.lane.b32.xlu1 %v7615_v21, %s5537_s26 }
 0x431   :  { %4150 = vrot.lane.b32.xlu0 %v7626_v5, %s5537_s26 }
 0x434   :  { %4311 = vrot.lane.b32.xlu1 %v7608_v46, %s5538_s27 }
 0x435   :  { %4166 = vrot.lane.b32.xlu0 %v7633_v44, %s5537_s26 }
 0x438   :  { %4327 = vrot.lane.b32.xlu1 %v7615_v21, %s5538_s27 }
 0x439   :  { %4313 = vrot.lane.b32.xlu0 %v7626_v5, %s5538_s27 }
 0x43c   :  { %4573 = vrot.lane.b32.xlu1 %v7608_v46, %s5539_s28 }
 0x43d   :  { %4329 = vrot.lane.b32.xlu0 %v7633_v44, %s5538_s27 }
 0x440   :  { %4589 = vrot.lane.b32.xlu1 %v7615_v21, %s5539_s28 }
 0x441   :  { %4575 = vrot.lane.b32.xlu0 %v7626_v5, %s5539_s28 }
 0x444   :  { %4736 = vrot.lane.b32.xlu1 %v7608_v46, %s5540_s29 }
 0x445   :  { %4591 = vrot.lane.b32.xlu0 %v7633_v44, %s5539_s28 }
 0x448   :  { %4752 = vrot.lane.b32.xlu1 %v7615_v21, %s5540_s29 }
 0x449   :  { %4738 = vrot.lane.b32.xlu0 %v7626_v5, %s5540_s29 }
 0x44c   :  { %4899 = vrot.lane.b32.xlu1 %v7608_v46, %s5541_s30 }
 0x44d   :  { %4754 = vrot.lane.b32.xlu0 %v7633_v44, %s5540_s29 }
 0x450   :  { %4915 = vrot.lane.b32.xlu1 %v7615_v21, %s5541_s30 }
 0x451   :  { %4901 = vrot.lane.b32.xlu0 %v7626_v5, %s5541_s30 }
 0x454   :  { %5062 = vrot.lane.b32.xlu1 %v7608_v46, %s5542_s12 }
 0x455   :  { %4917 = vrot.lane.b32.xlu0 %v7633_v44, %s5541_s30 }
 0x458   :  { %3912 = vrot.lane.b32.xlu1 %v7733_v53, %s5534_s25 }
 0x459   :  { %5064 = vrot.lane.b32.xlu0 %v7626_v5, %s5542_s12 }
 0x45c   :  { %3928 = vrot.lane.b32.xlu1 %v7619_v52, %s5534_s25 }
 0x45d   :  { %3914 = vrot.lane.b32.xlu0 %v7638_v61, %s5534_s25 }
 0x460   :  { %3839 = vrot.lane.b32.xlu1 %v7733_v53, %s5536_s1 }
 0x461   :  { %3930 = vrot.lane.b32.xlu0 %v7640_v31, %s5534_s25 }
 0x464   :  { %3855 = vrot.lane.b32.xlu1 %v7619_v52, %s5536_s1 }
 0x465   :  { %3841 = vrot.lane.b32.xlu0 %v7638_v61, %s5536_s1 }
 0x468   :  { %4156 = vrot.lane.b32.xlu1 %v7733_v53, %s5537_s26 }
 0x469   :  { %3857 = vrot.lane.b32.xlu0 %v7640_v31, %s5536_s1 }
 0x46c   :  { %4172 = vrot.lane.b32.xlu1 %v7619_v52, %s5537_s26 }
 0x46d   :  { %4158 = vrot.lane.b32.xlu0 %v7638_v61, %s5537_s26 }
 0x470   :  { %4319 = vrot.lane.b32.xlu1 %v7733_v53, %s5538_s27 }
 0x471   :  { %4174 = vrot.lane.b32.xlu0 %v7640_v31, %s5537_s26 }
 0x474   :  { %4335 = vrot.lane.b32.xlu1 %v7619_v52, %s5538_s27 }
 0x475   :  { %4321 = vrot.lane.b32.xlu0 %v7638_v61, %s5538_s27 }
 0x478   :  { %4581 = vrot.lane.b32.xlu1 %v7733_v53, %s5539_s28 }
 0x479   :  { %4337 = vrot.lane.b32.xlu0 %v7640_v31, %s5538_s27 }
 0x47c   :  { %4597 = vrot.lane.b32.xlu1 %v7619_v52, %s5539_s28 }
 0x47d   :  { %4583 = vrot.lane.b32.xlu0 %v7638_v61, %s5539_s28 }
 0x480   :  { %4744 = vrot.lane.b32.xlu1 %v7733_v53, %s5540_s29 }
 0x481   :  { %4599 = vrot.lane.b32.xlu0 %v7640_v31, %s5539_s28 }
 0x484   :  { %4760 = vrot.lane.b32.xlu1 %v7619_v52, %s5540_s29 }
 0x485   :  { %4746 = vrot.lane.b32.xlu0 %v7638_v61, %s5540_s29 }
 0x488   :  { %4907 = vrot.lane.b32.xlu1 %v7733_v53, %s5541_s30 }
 0x489   :  { %4762 = vrot.lane.b32.xlu0 %v7640_v31, %s5540_s29 }
 0x48c   :  { %4923 = vrot.lane.b32.xlu1 %v7619_v52, %s5541_s30 }
 0x48d   :  { %4909 = vrot.lane.b32.xlu0 %v7638_v61, %s5541_s30 }
 0x48e   :  { %v7791_v39 = vpop.permute.xlu1 %3904 }
 0x490   :  { %3908 = vrot.lane.b32.xlu1 %v7646_v33, %s5534_s25 }
 0x491   :  { %4925 = vrot.lane.b32.xlu0 %v7640_v31, %s5541_s30 }
 0x492   :  { %v7797_v41 = vpop.permute.xlu1 %3920 }
 0x493   :  { %v7799_v43 = vpop.permute.xlu0 %3906 }
 0x494   :  { %3924 = vrot.lane.b32.xlu1 %v7655_v17, %s5534_s25 }
 0x495   :  { %3910 = vrot.lane.b32.xlu0 %v7674_v25, %s5534_s25 }
 0x496   :  { %v7805_v49 = vpop.permute.xlu1 %3831 }
 0x497   :  { %v7807_v24 = vpop.permute.xlu0 %3922 }
 0x498   :  { %9299 = vst [vmem:[#allocation48_spill] sm:$0xff] %v7807_v24  ;;  %3835 = vrot.lane.b32.xlu1 %v7646_v33, %s5536_s1 }
 0x499   :  { %3926 = vrot.lane.b32.xlu0 %v7681_v11, %s5534_s25 }
 0x49a   :  { %v7813_v40 = vpop.permute.xlu1 %3847 }
 0x49b   :  { %v7815_v10 = vpop.permute.xlu0 %3833 }
 0x49c   :  { %3851 = vrot.lane.b32.xlu1 %v7655_v17, %s5536_s1 }
 0x49d   :  { %3837 = vrot.lane.b32.xlu0 %v7674_v25, %s5536_s1 }
 0x49e   :  { %v7821_v0 = vpop.permute.xlu1 %4148 }
 0x49f   :  { %v7823_v62 = vpop.permute.xlu0 %3849 }
 0x4a0   :  { %4152 = vrot.lane.b32.xlu1 %v7646_v33, %s5537_s26 }
 0x4a1   :  { %3853 = vrot.lane.b32.xlu0 %v7681_v11, %s5536_s1 }
 0x4a2   :  { %v7829_v14 = vpop.permute.xlu1 %4164 }
 0x4a3   :  { %v7831_v3 = vpop.permute.xlu0 %4150 }
 0x4a4   :  { %4168 = vrot.lane.b32.xlu1 %v7655_v17, %s5537_s26 }
 0x4a5   :  { %4154 = vrot.lane.b32.xlu0 %v7674_v25, %s5537_s26 }
 0x4a6   :  { %v7837_v37 = vpop.permute.xlu1 %4311 }
 0x4a7   :  { %v7839_v8 = vpop.permute.xlu0 %4166 }
 0x4a8   :  { %4315 = vrot.lane.b32.xlu1 %v7646_v33, %s5538_s27 }
 0x4a9   :  { %4170 = vrot.lane.b32.xlu0 %v7681_v11, %s5537_s26 }
 0x4aa   :  { %v7845_v23 = vpop.permute.xlu1 %4327 }
 0x4ab   :  { %v7847_v22 = vpop.permute.xlu0 %4313 }
 0x4ac   :  { %4331 = vrot.lane.b32.xlu1 %v7655_v17, %s5538_s27 }
 0x4ad   :  { %4317 = vrot.lane.b32.xlu0 %v7674_v25, %s5538_s27 }
 0x4ae   :  { %v7853_v15 = vpop.permute.xlu1 %4573 }
 0x4af   :  { %v7855_v50 = vpop.permute.xlu0 %4329 }
 0x4b0   :  { %4577 = vrot.lane.b32.xlu1 %v7646_v33, %s5539_s28 }
 0x4b1   :  { %4333 = vrot.lane.b32.xlu0 %v7681_v11, %s5538_s27 }
 0x4b2   :  { %v7861_v18 = vpop.permute.xlu1 %4589 }
 0x4b3   :  { %v7863_v13 = vpop.permute.xlu0 %4575 }
 0x4b4   :  { %4593 = vrot.lane.b32.xlu1 %v7655_v17, %s5539_s28 }
 0x4b5   :  { %4579 = vrot.lane.b32.xlu0 %v7674_v25, %s5539_s28 }
 0x4b6   :  { %v7869_v60 = vpop.permute.xlu1 %4736 }
 0x4b7   :  { %v7871_v20 = vpop.permute.xlu0 %4591 }
 0x4b8   :  { %4740 = vrot.lane.b32.xlu1 %v7646_v33, %s5540_s29 }
 0x4b9   :  { %4595 = vrot.lane.b32.xlu0 %v7681_v11, %s5539_s28 }
 0x4ba   :  { %v7877_v63 = vpop.permute.xlu1 %4752 }
 0x4bb   :  { %v7879_v45 = vpop.permute.xlu0 %4738 }
 0x4bc   :  { %4756 = vrot.lane.b32.xlu1 %v7655_v17, %s5540_s29 }
 0x4bd   :  { %4742 = vrot.lane.b32.xlu0 %v7674_v25, %s5540_s29 }
 0x4be   :  { %v7885_v6 = vpop.permute.xlu1 %4899 }
 0x4bf   :  { %v7887_v42 = vpop.permute.xlu0 %4754 }
 0x4c0   :  { %4903 = vrot.lane.b32.xlu1 %v7646_v33, %s5541_s30 }
 0x4c1   :  { %4758 = vrot.lane.b32.xlu0 %v7681_v11, %s5540_s29 }
 0x4c2   :  { %v7893_v30 = vpop.permute.xlu1 %4915 }
 0x4c3   :  { %v7895_v2 = vpop.permute.xlu0 %4901 }
 0x4c4   :  { %4919 = vrot.lane.b32.xlu1 %v7655_v17, %s5541_s30 }
 0x4c5   :  { %4905 = vrot.lane.b32.xlu0 %v7674_v25, %s5541_s30 }
 0x4c6   :  { %v7901_v9 = vpop.permute.xlu1 %5062 }
 0x4c7   :  { %9300 = vst [vmem:[#allocation40_spill] sm:$0xff] %v7901_v9  ;;  %v7903_v48 = vpop.permute.xlu0 %4917 }
 0x4c8   :  { %5066 = vrot.lane.b32.xlu1 %v7646_v33, %s5542_s12 }
 0x4c9   :  { %4921 = vrot.lane.b32.xlu0 %v7681_v11, %s5541_s30 }
 0x4ca   :  { %v7909_v29 = vpop.permute.xlu1 %3912 }
 0x4cb   :  { %v7911_v38 = vpop.permute.xlu0 %5064 }
 0x4cc   :  { %9301 = vst [vmem:[#allocation49_spill] sm:$0xff] %v7911_v38  ;;  %5082 = vrot.lane.b32.xlu1 %v7655_v17, %s5542_s12 }
 0x4cd   :  { %5068 = vrot.lane.b32.xlu0 %v7674_v25, %s5542_s12 }
 0x4ce   :  { %v3929_v54 = vpop.permute.xlu1 %3928 }
 0x4cf   :  { %v7917_v57 = vpop.permute.xlu0 %3914  ;;  %v3936_v38 = vsel %vm162_vm0, %v7797_v41, %v3929_v54  ;;  %v3948_v9 = vsel %vm162_vm0, %v3929_v54, %v7791_v39 }
 0x4d0   :  { %3916 = vrot.lane.b32.xlu1 %v7659_v28, %s5534_s25  ;;  %v7938_v17 = vmul.f32 %v3948_v9, %v9221_v47  ;;  %v7941_v25 = vmul.f32 %v3936_v38, %v9222_v34 }
 0x4d1   :  { %5084 = vrot.lane.b32.xlu0 %v7681_v11, %s5542_s12 }
 0x4d2   :  { %v3840_v26 = vpop.permute.xlu1 %3839  ;;  %9302 = vst [vmem:[#allocation39_spill] sm:$0xff] %v7938_v17  ;;  %9303 = vst [vmem:[#allocation62_spill] sm:$0xff] %v7941_v25 }
 0x4d3   :  { %v3931_v46 = vpop.permute.xlu0 %3930  ;;  %v3871_v9 = vsel %vm116_vm1, %v7805_v49, %v3840_v26 }
 0x4d4   :  { %3932 = vrot.lane.b32.xlu1 %v7668_v7, %s5534_s25  ;;  %v3937_v5 = vsel %vm162_vm0, %v7807_v24, %v3931_v46  ;;  %v3949_v11 = vsel %vm162_vm0, %v3931_v46, %v7799_v43  ;;  %v3867_v46 = vsel %vm116_vm1, %v3840_v26, %v7813_v40  ;;  %v7970_v26 = vmul.f32 %v3871_v9, %v9224_v32 }
 0x4d5   :  { %v7944_v54 = vmul.f32 %v3949_v11, %v9221_v47  ;;  %v7947_v33 = vmul.f32 %v3937_v5, %v9222_v34  ;;  %3918 = vrot.lane.b32.xlu0 %v7683_v4, %s5534_s25  ;;  %v7973_v38 = vmul.f32 %v3867_v46, %v9228_v19 }
 0x4d6   :  { %v3856_v24 = vpop.permute.xlu1 %3855 }
 0x4d7   :  { %9304 = vst [vmem:[#allocation65_spill] sm:$0xff] %v7944_v54  ;;  %v3842_v11 = vpop.permute.xlu0 %3841  ;;  %9305 = vst [vmem:[#allocation59_spill] sm:$0xff] %v7973_v38  ;;  %v3875_v9 = vsel %vm116_vm1, %v3856_v24, %v7805_v49 }
 0x4d8   :  { %3843 = vrot.lane.b32.xlu1 %v7659_v28, %s5536_s1  ;;  %v3868_v34 = vsel %vm116_vm1, %v3842_v11, %v7823_v62  ;;  %v3872_v47 = vsel %vm116_vm1, %v7815_v10, %v3842_v11  ;;  %v3863_v11 = vsel %vm116_vm1, %v7813_v40, %v3856_v24  ;;  %v8002_v49 = vmul.f32 %v3875_v9, %v9226_v36 }
 0x4d9   :  { %v7976_v17 = vmul.f32 %v3872_v47, %v9224_v32  ;;  %v7979_v54 = vmul.f32 %v3868_v34, %v9228_v19  ;;  %3934 = vrot.lane.b32.xlu0 %v7685_v56, %s5534_s25  ;;  %v8005_v24 = vmul.f32 %v3863_v11, %v9227_v35 }
 0x4da   :  { %v4157_v5 = vpop.permute.xlu1 %4156  ;;  %9307 = vst [vmem:[#allocation53_spill] sm:$0xff] %v8002_v49 }
 0x4db   :  { %9306 = vst [vmem:[#allocation44_spill] sm:$0xff] %v7979_v54  ;;  %v3858_v47 = vpop.permute.xlu0 %3857  ;;  %v4188_v9 = vsel %vm479_vm4, %v7821_v0, %v4157_v5 }
 0x4dc   :  { %3859 = vrot.lane.b32.xlu1 %v7668_v7, %s5536_s1  ;;  %v3864_v25 = vsel %vm116_vm1, %v7823_v62, %v3858_v47  ;;  %v3876_v40 = vsel %vm116_vm1, %v3858_v47, %v7815_v10  ;;  %v4184_v10 = vsel %vm479_vm4, %v4157_v5, %v7829_v14  ;;  %v8034_v5 = vmul.f32 %v4188_v9, %v9229_v12 }
 0x4dd   :  { %v8008_v46 = vmul.f32 %v3876_v40, %v9226_v36  ;;  %v8011_v38 = vmul.f32 %v3864_v25, %v9227_v35  ;;  %3845 = vrot.lane.b32.xlu0 %v7683_v4, %s5536_s1  ;;  %v8037_v11 = vmul.f32 %v4184_v10, %v9234_v27 }
 0x4de   :  { %v4173_v62 = vpop.permute.xlu1 %4172  ;;  %9309 = vst [vmem:[#allocation52_spill] sm:$0xff] %v8034_v5  ;;  %v9318_v5 = vld [vmem:[#allocation20_spill] sm:$0xff] }
 0x4df   :  { %9308 = vst [vmem:[#allocation54_spill] sm:$0xff] %v8008_v46  ;;  %v4159_v47 = vpop.permute.xlu0 %4158  ;;  %9310 = vst [vmem:[#allocation56_spill] sm:$0xff] %v8037_v11  ;;  %v4192_v9 = vsel %vm479_vm4, %v4173_v62, %v7821_v0 }
 0x4e0   :  { %4160 = vrot.lane.b32.xlu1 %v7659_v28, %s5537_s26  ;;  %v4185_v40 = vsel %vm479_vm4, %v4159_v47, %v7839_v8  ;;  %v4189_v34 = vsel %vm479_vm4, %v7831_v3, %v4159_v47  ;;  %v4180_v47 = vsel %vm479_vm4, %v7829_v14, %v4173_v62  ;;  %v8066_v0 = vmul.f32 %v4192_v9, %v9232_v58 }
 0x4e1   :  { %v8040_v54 = vmul.f32 %v4189_v34, %v9229_v12  ;;  %v8043_v49 = vmul.f32 %v4185_v40, %v9234_v27  ;;  %3861 = vrot.lane.b32.xlu0 %v7685_v56, %s5536_s1  ;;  %v8069_v62 = vmul.f32 %v4180_v47, %v9233_v55 }
 0x4e2   :  { %v4320_v25 = vpop.permute.xlu1 %4319  ;;  %9312 = vst [vmem:[#allocation55_spill] sm:$0xff] %v8066_v0 }
 0x4e3   :  { %9311 = vst [vmem:[#allocation51_spill] sm:$0xff] %v8043_v49  ;;  %v4175_v34 = vpop.permute.xlu0 %4174  ;;  %9313 = vst [vmem:[#allocation50_spill] sm:$0xff] %v8069_v62  ;;  %v4351_v9 = vsel %vm676_vm5, %v7837_v37, %v4320_v25  ;;  %v9316_v49 = vld [vmem:[#allocation18_spill] sm:$0xff] }
 0x4e4   :  { %4176 = vrot.lane.b32.xlu1 %v7668_v7, %s5537_s26  ;;  %v4181_v46 = vsel %vm479_vm4, %v7839_v8, %v4175_v34  ;;  %v4193_v14 = vsel %vm479_vm4, %v4175_v34, %v7831_v3  ;;  %v4347_v3 = vsel %vm676_vm5, %v4320_v25, %v7845_v23  ;;  %v8098_v25 = vmul.f32 %v4351_v9, %v9316_v49 }
 0x4e5   :  { %v8072_v10 = vmul.f32 %v4193_v14, %v9232_v58  ;;  %v8075_v11 = vmul.f32 %v4181_v46, %v9233_v55  ;;  %4162 = vrot.lane.b32.xlu0 %v7683_v4, %s5537_s26  ;;  %v8101_v47 = vmul.f32 %v4347_v3, %v9318_v5 }
 0x4e6   :  { %v4336_v8 = vpop.permute.xlu1 %4335  ;;  %9317 = vst [vmem:[#allocation66_spill] sm:$0xff] %v8098_v25  ;;  %v9326_v25 = vld [vmem:[#allocation23_spill] sm:$0xff] }
 0x4e7   :  { %9314 = vst [vmem:[#allocation45_spill] sm:$0xff] %v8072_v10  ;;  %9315 = vst [vmem:[#allocation60_spill] sm:$0xff] %v8075_v11  ;;  %v4322_v34 = vpop.permute.xlu0 %4321  ;;  %v4355_v9 = vsel %vm676_vm5, %v4336_v8, %v7837_v37  ;;  %v9321_v11 = vld [vmem:[#allocation21_spill] sm:$0xff] }
 0x4e8   :  { %4323 = vrot.lane.b32.xlu1 %v7659_v28, %s5538_s27  ;;  %v4348_v14 = vsel %vm676_vm5, %v4322_v34, %v7855_v50  ;;  %v4352_v40 = vsel %vm676_vm5, %v7847_v22, %v4322_v34  ;;  %9319 = vst [vmem:[#allocation64_spill] sm:$0xff] %v8101_v47  ;;  %v4343_v34 = vsel %vm676_vm5, %v7845_v23, %v4336_v8  ;;  %v9323_v8 = vld [vmem:[#allocation19_spill] sm:$0xff] }
 0x4e9   :  { %v8104_v0 = vmul.f32 %v4352_v40, %v9316_v49  ;;  %v8107_v10 = vmul.f32 %v4348_v14, %v9318_v5  ;;  %4178 = vrot.lane.b32.xlu0 %v7685_v56, %s5537_s26  ;;  %v8130_v37 = vmul.f32 %v4355_v9, %v9321_v11  ;;  %v8133_v3 = vmul.f32 %v4343_v34, %v9323_v8 }
 0x4ea   :  { %v4582_v46 = vpop.permute.xlu1 %4581 }
 0x4eb   :  { %9320 = vst [vmem:[#allocation43_spill] sm:$0xff] %v8107_v10  ;;  %v4338_v40 = vpop.permute.xlu0 %4337  ;;  %9322 = vst [vmem:[#allocation58_spill] sm:$0xff] %v8130_v37  ;;  %v4613_v9 = vsel %vm1032_vm6, %v7853_v15, %v4582_v46 }
 0x4ec   :  { %4339 = vrot.lane.b32.xlu1 %v7668_v7, %s5538_s27  ;;  %v4344_v62 = vsel %vm676_vm5, %v7855_v50, %v4338_v40  ;;  %v4356_v23 = vsel %vm676_vm5, %v4338_v40, %v7847_v22  ;;  %v4609_v22 = vsel %vm1032_vm6, %v4582_v46, %v7861_v18  ;;  %v8162_v46 = vmul.f32 %v4613_v9, %v9268_v59 }
 0x4ed   :  { %v8136_v47 = vmul.f32 %v4356_v23, %v9321_v11  ;;  %v8139_v10 = vmul.f32 %v4344_v62, %v9323_v8  ;;  %4325 = vrot.lane.b32.xlu0 %v7683_v4, %s5538_s27  ;;  %v8165_v34 = vmul.f32 %v4609_v22, %v9326_v25 }
 0x4ee   :  { %v4598_v50 = vpop.permute.xlu1 %4597  ;;  %9325 = vst [vmem:[#allocation68_spill] sm:$0xff] %v8162_v46 }
 0x4ef   :  { %9324 = vst [vmem:[#allocation46_spill] sm:$0xff] %v8136_v47  ;;  %v4584_v40 = vpop.permute.xlu0 %4583  ;;  %9327 = vst [vmem:[#allocation67_spill] sm:$0xff] %v8165_v34  ;;  %v4617_v9 = vsel %vm1032_vm6, %v4598_v50, %v7853_v15  ;;  %v9336_v34 = vld [vmem:[#allocation27_spill] sm:$0xff] }
 0x4f0   :  { %5070 = vrot.lane.b32.xlu1 %v7733_v53, %s5542_s12  ;;  %v4610_v23 = vsel %vm1032_vm6, %v4584_v40, %v7871_v20  ;;  %v4614_v14 = vsel %vm1032_vm6, %v7863_v13, %v4584_v40  ;;  %v4605_v40 = vsel %vm1032_vm6, %v7861_v18, %v4598_v50  ;;  %v8197_v50 = vmul.f32 %v4617_v9, %v9272_v16 }
 0x4f1   :  { %v8168_v37 = vmul.f32 %v4614_v14, %v9268_v59  ;;  %v8171_v53 = vmul.f32 %v4610_v23, %v9326_v25  ;;  %4341 = vrot.lane.b32.xlu0 %v7685_v56, %s5538_s27  ;;  %v8194_v15 = vmul.f32 %v4605_v40, %v9271_v1 }
 0x4f2   :  { %v4745_v62 = vpop.permute.xlu1 %4744  ;;  %9331 = vst [vmem:[#allocation20_spill] sm:$0xff] %v8197_v50 }
 0x4f3   :  { %9328 = vst [vmem:[#allocation41_spill] sm:$0xff] %v8168_v37  ;;  %9329 = vst [vmem:[#allocation5_spill] sm:$0xff] %v8171_v53  ;;  %v4600_v14 = vpop.permute.xlu0 %4599  ;;  %v4776_v40 = vsel %vm1229_vm7, %v7869_v60, %v4745_v62  ;;  %v9334_v37 = vld [vmem:[#allocation28_spill] sm:$0xff] }
 0x4f4   :  { %4585 = vrot.lane.b32.xlu1 %v7659_v28, %s5539_s28  ;;  %v4606_v59 = vsel %vm1032_vm6, %v7871_v20, %v4600_v14  ;;  %v4618_v18 = vsel %vm1032_vm6, %v4600_v14, %v7863_v13  ;;  %9330 = vst [vmem:[#allocation18_spill] sm:$0xff] %v8194_v15  ;;  %v4772_v13 = vsel %vm1229_vm7, %v4745_v62, %v7877_v63 }
 0x4f5   :  { %v8200_v22 = vmul.f32 %v4606_v59, %v9271_v1  ;;  %v8203_v46 = vmul.f32 %v4618_v18, %v9272_v16  ;;  %5072 = vrot.lane.b32.xlu0 %v7638_v61, %s5542_s12  ;;  %v8226_v62 = vmul.f32 %v4776_v40, %v9334_v37  ;;  %v8229_v9 = vmul.f32 %v4772_v13, %v9336_v34 }
 0x4f6   :  { %v4761_v20 = vpop.permute.xlu1 %4760 }
 0x4f7   :  { %9332 = vst [vmem:[#allocation21_spill] sm:$0xff] %v8200_v22  ;;  %9333 = vst [vmem:[#allocation19_spill] sm:$0xff] %v8203_v46  ;;  %v4747_v59 = vpop.permute.xlu0 %4746  ;;  %v4780_v40 = vsel %vm1229_vm7, %v4761_v20, %v7869_v60  ;;  %v9340_v46 = vld [vmem:[#allocation29_spill] sm:$0xff] }
 0x4f8   :  { %4601 = vrot.lane.b32.xlu1 %v7668_v7, %s5539_s28  ;;  %v4773_v18 = vsel %vm1229_vm7, %v4747_v59, %v7887_v42  ;;  %v4777_v23 = vsel %vm1229_vm7, %v7879_v45, %v4747_v59  ;;  %9335 = vst [vmem:[#allocation69_spill] sm:$0xff] %v8226_v62  ;;  %9337 = vst [vmem:[#allocation70_spill] sm:$0xff] %v8229_v9  ;;  %v4768_v59 = vsel %vm1229_vm7, %v7877_v63, %v4761_v20  ;;  %v9342_v20 = vld [vmem:[#allocation26_spill] sm:$0xff]  ;;  %v9346_v9 = vld [vmem:[#allocation32_spill] sm:$0xff] }
 0x4f9   :  { %v8232_v15 = vmul.f32 %v4777_v23, %v9334_v37  ;;  %v8235_v22 = vmul.f32 %v4773_v18, %v9336_v34  ;;  %5080 = vrot.lane.b32.xlu0 %v7633_v44, %s5542_s12  ;;  %v8258_v60 = vmul.f32 %v4768_v59, %v9340_v46  ;;  %v8261_v13 = vmul.f32 %v4780_v40, %v9342_v20 }
 0x4fa   :  { %v4908_v14 = vpop.permute.xlu1 %4907 }
 0x4fb   :  { %9338 = vst [vmem:[#allocation71_spill] sm:$0xff] %v8232_v15  ;;  %9339 = vst [vmem:[#allocation72_spill] sm:$0xff] %v8235_v22  ;;  %v4763_v23 = vpop.permute.xlu0 %4762  ;;  %v4939_v59 = vsel %vm1426_vm8, %v7885_v6, %v4908_v14  ;;  %v9348_v22 = vld [vmem:[#allocation31_spill] sm:$0xff] }
 0x4fc   :  { %4748 = vrot.lane.b32.xlu1 %v7659_v28, %s5540_s29  ;;  %v4769_v50 = vsel %vm1229_vm7, %v7887_v42, %v4763_v23  ;;  %v4781_v63 = vsel %vm1229_vm7, %v4763_v23, %v7879_v45  ;;  %9341 = vst [vmem:[#allocation73_spill] sm:$0xff] %v8258_v60  ;;  %9343 = vst [vmem:[#allocation74_spill] sm:$0xff] %v8261_v13  ;;  %v4935_v45 = vsel %vm1426_vm8, %v4908_v14, %v7893_v30 }
 0x4fd   :  { %v8264_v62 = vmul.f32 %v4769_v50, %v9340_v46  ;;  %v8267_v15 = vmul.f32 %v4781_v63, %v9342_v20  ;;  %4587 = vrot.lane.b32.xlu0 %v7683_v4, %s5539_s28  ;;  %v8290_v14 = vmul.f32 %v4939_v59, %v9346_v9  ;;  %v8293_v40 = vmul.f32 %v4935_v45, %v9348_v22 }
 0x4fe   :  { %v4924_v42 = vpop.permute.xlu1 %4923 }
 0x4ff   :  { %9344 = vst [vmem:[#allocation75_spill] sm:$0xff] %v8264_v62  ;;  %9345 = vst [vmem:[#allocation76_spill] sm:$0xff] %v8267_v15  ;;  %v4910_v50 = vpop.permute.xlu0 %4909  ;;  %v4943_v45 = vsel %vm1426_vm8, %v4924_v42, %v7885_v6  ;;  %v9352_v15 = vld [vmem:[#allocation33_spill] sm:$0xff] }
 0x500   :  { %4764 = vrot.lane.b32.xlu1 %v7668_v7, %s5540_s29  ;;  %v4936_v63 = vsel %vm1426_vm8, %v4910_v50, %v7903_v48  ;;  %v4940_v18 = vsel %vm1426_vm8, %v7895_v2, %v4910_v50  ;;  %9347 = vst [vmem:[#allocation77_spill] sm:$0xff] %v8290_v14  ;;  %9349 = vst [vmem:[#allocation78_spill] sm:$0xff] %v8293_v40  ;;  %v4931_v50 = vsel %vm1426_vm8, %v7893_v30, %v4924_v42  ;;  %v9354_v42 = vld [vmem:[#allocation30_spill] sm:$0xff] }
 0x501   :  { %v8296_v60 = vmul.f32 %v4940_v18, %v9346_v9  ;;  %v8299_v62 = vmul.f32 %v4936_v63, %v9348_v22  ;;  %4603 = vrot.lane.b32.xlu0 %v7685_v56, %s5539_s28  ;;  %v8324_v6 = vmul.f32 %v4931_v50, %v9352_v15  ;;  %v8327_v18 = vmul.f32 %v4943_v45, %v9354_v42 }
 0x502   :  { %v8303_v23 = vpop.permute.xlu1 %3908 }
 0x503   :  { %9350 = vst [vmem:[#allocation79_spill] sm:$0xff] %v8296_v60  ;;  %9351 = vst [vmem:[#allocation80_spill] sm:$0xff] %v8299_v62  ;;  %v4926_v59 = vpop.permute.xlu0 %4925 }
 0x504   :  { %4911 = vrot.lane.b32.xlu1 %v7659_v28, %s5541_s30  ;;  %v4932_v13 = vsel %vm1426_vm8, %v7903_v48, %v4926_v59  ;;  %v4944_v30 = vsel %vm1426_vm8, %v4926_v59, %v7895_v2  ;;  %9353 = vst [vmem:[#allocation81_spill] sm:$0xff] %v8324_v6  ;;  %9355 = vst [vmem:[#allocation82_spill] sm:$0xff] %v8327_v18  ;;  %v5225_v18 = vld [vmem:[%s8917_s8] sm:$0xf] }
 0x505   :  { %v8330_v14 = vmul.f32 %v4932_v13, %v9352_v15  ;;  %v8333_v60 = vmul.f32 %v4944_v30, %v9354_v42  ;;  %4750 = vrot.lane.b32.xlu0 %v7683_v4, %s5540_s29 }
 0x506   :  { %v3925_v48 = vpop.permute.xlu1 %3924 }
 0x507   :  { %9356 = vst [vmem:[#allocation83_spill] sm:$0xff] %v8330_v14  ;;  %9357 = vst [vmem:[#allocation84_spill] sm:$0xff] %v8333_v60  ;;  %v8339_v2 = vpop.permute.xlu0 %3910 }
 0x508   :  { %4927 = vrot.lane.b32.xlu1 %v7668_v7, %s5541_s30 }
 0x509   :  { %4766 = vrot.lane.b32.xlu0 %v7685_v56, %s5540_s29 }
 0x50a   :  { %v8347_v13 = vpop.permute.xlu1 %3835 }
 0x50b   :  { %v8349_v45 = vpop.permute.xlu0 %3926 }
 0x50c   :  { %5074 = vrot.lane.b32.xlu1 %v7659_v28, %s5542_s12 }
 0x50d   :  { %4913 = vrot.lane.b32.xlu0 %v7683_v4, %s5541_s30 }
 0x50e   :  { %v8355_v59 = vpop.permute.xlu1 %3851 }
 0x50f   :  { %v8357_v30 = vpop.permute.xlu0 %3837 }
 0x510   :  { %5090 = vrot.lane.b32.xlu1 %v7668_v7, %s5542_s12  ;;  %v9377_v7 = vld [vmem:[#allocation7_spill] sm:$0xff] }
 0x511   :  { %4929 = vrot.lane.b32.xlu0 %v7685_v56, %s5541_s30 }
 0x512   :  { %v8363_v63 = vpop.permute.xlu1 %4152 }
 0x513   :  { %v8365_v50 = vpop.permute.xlu0 %3853 }
 0x514   :  { %5078 = vrot.lane.b32.xlu1 %v7615_v21, %s5542_s12 }
 0x515   :  { %5076 = vrot.lane.b32.xlu0 %v7683_v4, %s5542_s12 }
 0x516   :  { %v8371_v6 = vpop.permute.xlu1 %4168 }
 0x517   :  { %v8373_v14 = vpop.permute.xlu0 %4154 }
 0x518   :  { %5086 = vrot.lane.b32.xlu1 %v7619_v52, %s5542_s12 }
 0x519   :  { %5092 = vrot.lane.b32.xlu0 %v7685_v56, %s5542_s12 }
 0x51a   :  { %v8382_v60 = vpop.permute.xlu1 %4315 }
 0x51b   :  { %v8384_v40 = vpop.permute.xlu0 %4170 }
 0x51c   :  { %5228 = vperm.xlu1 %5494, %v5225_v18  }
 0x51d   :  { %5088 = vrot.lane.b32.xlu0 %v7640_v31, %s5542_s12 }
 0x51e   :  { %v8388_v62 = vpop.permute.xlu1 %4331 }
 0x51f   :  { %v8390_v42 = vpop.permute.xlu0 %4317 }
 0x522   :  { %v8392_v15 = vpop.permute.xlu1 %4577 }
 0x523   :  { %9358 = vst [vmem:[#allocation85_spill] sm:$0xff] %v8392_v15  ;;  %v8394_v9 = vpop.permute.xlu0 %4333 }
 0x526   :  { %v8396_v22 = vpop.permute.xlu1 %4593 }
 0x527   :  { %9359 = vst [vmem:[#allocation86_spill] sm:$0xff] %v8396_v22  ;;  %v8398_v20 = vpop.permute.xlu0 %4579  ;;  %v9378_v22 = vld [vmem:[#allocation6_spill] sm:$0xff] }
 0x528   :  { %9360 = vst [vmem:[#allocation87_spill] sm:$0xff] %v8398_v20 }
 0x52a   :  { %v8400_v46 = vpop.permute.xlu1 %4740 }
 0x52b   :  { %9361 = vst [vmem:[#allocation88_spill] sm:$0xff] %v8400_v46  ;;  %v8402_v37 = vpop.permute.xlu0 %4595 }
 0x52c   :  { %9362 = vst [vmem:[#allocation89_spill] sm:$0xff] %v8402_v37  ;;  %v3940_v37 = vsel %vm162_vm0, %v7909_v29, %v7797_v41 }
 0x52e   :  { %v8404_v18 = vpop.permute.xlu1 %4756 }
 0x52f   :  { %9363 = vst [vmem:[#allocation90_spill] sm:$0xff] %v8404_v18  ;;  %v8406_v53 = vpop.permute.xlu0 %4742 }
 0x530   :  { %9364 = vst [vmem:[#allocation91_spill] sm:$0xff] %v8406_v53 }
 0x532   :  { %v8408_v34 = vpop.permute.xlu1 %4903 }
 0x533   :  { %9365 = vst [vmem:[#allocation92_spill] sm:$0xff] %v8408_v34  ;;  %v8410_v16 = vpop.permute.xlu0 %4758 }
 0x534   :  { %9366 = vst [vmem:[#allocation93_spill] sm:$0xff] %v8410_v16 }
 0x536   :  { %v8412_v1 = vpop.permute.xlu1 %4919 }
 0x537   :  { %9367 = vst [vmem:[#allocation94_spill] sm:$0xff] %v8412_v1  ;;  %v8414_v44 = vpop.permute.xlu0 %4905 }
 0x538   :  { %9368 = vst [vmem:[#allocation95_spill] sm:$0xff] %v8414_v44 }
 0x53a   :  { %v8416_v21 = vpop.permute.xlu1 %5066 }
 0x53b   :  { %9369 = vst [vmem:[#allocation96_spill] sm:$0xff] %v8416_v21  ;;  %v8418_v31 = vpop.permute.xlu0 %4921  ;;  %v3944_v21 = vsel %vm162_vm0, %v7791_v39, %v7909_v29 }
 0x53c   :  { %9370 = vst [vmem:[#allocation97_spill] sm:$0xff] %v8418_v31  ;;  %v9375_v31 = vld [vmem:[#allocation9_spill] sm:$0xff] }
 0x53e   :  { %v8420_v52 = vpop.permute.xlu1 %5082 }
 0x53f   :  { %9371 = vst [vmem:[#allocation98_spill] sm:$0xff] %v8420_v52  ;;  %v8422_v46 = vpop.permute.xlu0 %5068 }
 0x540   :  { %9372 = vst [vmem:[#allocation99_spill] sm:$0xff] %v8422_v46  ;;  %v3945_v46 = vsel %vm162_vm0, %v7799_v43, %v7917_v57 }
 0x542   :  { %v3917_v25 = vpop.permute.xlu1 %3916 }
 0x543   :  { %v8424_v18 = vpop.permute.xlu0 %5084  ;;  %v3942_v34 = vsel %vm162_vm0, %v3917_v25, %v3925_v48  ;;  %v3946_v1 = vsel %vm162_vm0, %v8303_v23, %v3917_v25 }
 0x544   :  { %9373 = vst [vmem:[#allocation100_spill] sm:$0xff] %v8424_v18  ;;  %v9374_v18 = vld [vmem:[#allocation8_spill] sm:$0xff]  ;;  %v3962_v16 = vmul.f32 %v3942_v34, %v9375_v31 }
 0x545   :  { %v3961_v44 = vmul.f32 %v3946_v1, %v9374_v18  ;;  %v3953_v61 = vmul.f32 %v3944_v21, %v9374_v18  ;;  %v3957_v56 = vmul.f32 %v3945_v46, %v9374_v18 }
 0x546   :  { %v3933_v53 = vpop.permute.xlu1 %3932 }
 0x547   :  { %v3919_v52 = vpop.permute.xlu0 %3918  ;;  %v3938_v39 = vsel %vm162_vm0, %v3925_v48, %v3933_v53  ;;  %v3950_v43 = vsel %vm162_vm0, %v3933_v53, %v8303_v23 }
 0x548   :  { %v3943_v25 = vsel %vm162_vm0, %v3919_v52, %v8349_v45  ;;  %v3947_v15 = vsel %vm162_vm0, %v8339_v2, %v3919_v52  ;;  %v9376_v52 = vld [vmem:[#allocation48_spill] sm:$0xff]  ;;  %v3963_v47 = vmul.f32 %v3938_v39, %v9378_v22 }
 0x549   :  { %v3965_v20 = vmul.f32 %v3947_v15, %v9374_v18  ;;  %v3966_v1 = vmul.f32 %v3943_v25, %v9375_v31  ;;  %v3941_v48 = vsel %vm162_vm0, %v7917_v57, %v9376_v52  ;;  %v3960_v25 = vmul.f32 %v3950_v43, %v9377_v7 }
 0x54a   :  { %v3844_v34 = vpop.permute.xlu1 %3843  ;;  %v3971_v43 = vpack.c.bf16 %v3957_v56, %v3953_v61 }
 0x54b   :  { %v3976_v53 = vpack.c.bf16 %v3966_v1, %v3962_v16  ;;  %v3935_v23 = vpop.permute.xlu0 %3934  ;;  %v3975_v15 = vpack.c.bf16 %v3965_v20, %v3961_v44  ;;  %v3869_v29 = vsel %vm116_vm1, %v3844_v34, %v8355_v59  ;;  %v3873_v16 = vsel %vm116_vm1, %v8347_v13, %v3844_v34 }
 0x54c   :  { %v3939_v41 = vsel %vm162_vm0, %v8349_v45, %v3935_v23  ;;  %v3951_v21 = vsel %vm162_vm0, %v3935_v23, %v8339_v2  ;;  %v3954_v20 = vmul.f32 %v3940_v37, %v9375_v31  ;;  %v3958_v45 = vmul.f32 %v3941_v48, %v9375_v31  ;;  %v9379_v23 = vld [vmem:[#allocation62_spill] sm:$0xff] }
 0x54d   :  { %v3964_v44 = vmul.f32 %v3951_v21, %v9377_v7  ;;  %v3967_v57 = vmul.f32 %v3939_v41, %v9378_v22  ;;  %3993 = vmatprep.subr.bf16.mxu0 %v3975_v15  ;;  %v3888_v1 = vmul.f32 %v3873_v16, %v9224_v32  ;;  %v3889_v52 = vmul.f32 %v3869_v29, %v9228_v19  ;;  %v9381_v16 = vld [vmem:[#allocation65_spill] sm:$0xff] }
 0x54e   :  { %v3860_v46 = vpop.permute.xlu1 %3859  ;;  %v3972_v34 = vpack.c.bf16 %v3958_v45, %v3954_v20  ;;  %v9380_v15 = vpack.c.bf16 %v7947_v33, %v9379_v23 }
 0x54f   :  { %v3974_v18 = vpack.c.bf16 %v3964_v44, %v3960_v25  ;;  %v3846_v2 = vpop.permute.xlu0 %3845  ;;  %v3977_v39 = vpack.c.bf16 %v3967_v57, %v3963_v47  ;;  %v3877_v31 = vsel %vm116_vm1, %v3860_v46, %v8347_v13  ;;  %v3865_v47 = vsel %vm116_vm1, %v8355_v59, %v3860_v46  ;;  %v9382_v44 = vld [vmem:[#allocation39_spill] sm:$0xff] }
 0x550   :  { %v3870_v7 = vsel %vm116_vm1, %v3846_v2, %v8365_v50  ;;  %v3874_v22 = vsel %vm116_vm1, %v8357_v30, %v3846_v2  ;;  %v3890_v41 = vmul.f32 %v3865_v47, %v9227_v35  ;;  %v9383_v57 = vpack.c.bf16 %v9381_v16, %v9382_v44 }
 0x551   :  { %v3892_v37 = vmul.f32 %v3874_v22, %v9224_v32  ;;  %v3893_v61 = vmul.f32 %v3870_v7, %v9228_v19  ;;  %3994 = vmatpush1.bf16.msra.mxu0 %v3974_v18  ;;  %4034 = vmatprep.subr.bf16.mxu1 %v3977_v39  ;;  %v3887_v32 = vmul.f32 %v3877_v31, %v9226_v36 }
 0x552   :  { %v4161_v56 = vpop.permute.xlu1 %4160  ;;  %3995 = vmatprep.subr.bf16.mxu0 %v3971_v43  ;;  %4035 = vmatpush1.bf16.msra.mxu1 %v3976_v53  ;;  %v9384_v7 = vpack.c.bf16 %v7976_v17, %v7970_v26  ;;  %v9386_v26 = vmov 0  }
 0x553   :  { %v3902_v48 = vpack.c.bf16 %v3893_v61, %v3889_v52  ;;  %4036 = vmatprep.subr.bf16.mxu1 %v9380_v15  ;;  %v3862_v13 = vpop.permute.xlu0 %3861  ;;  %v3901_v25 = vpack.c.bf16 %v3892_v37, %v3888_v1  ;;  %v4190_v19 = vsel %vm479_vm4, %v8363_v63, %v4161_v56  ;;  %v4186_v33 = vsel %vm479_vm4, %v4161_v56, %v8371_v6 }
 0x554   :  { %v3866_v59 = vsel %vm116_vm1, %v8365_v50, %v3862_v13  ;;  %v3878_v53 = vsel %vm116_vm1, %v3862_v13, %v8357_v30  ;;  %v5455_v50 = vld [vmem:[%s8918_s7 + $0x2] sm:$0x3]  ;;  %v4205_v30 = vmul.f32 %v4190_v19, %v9229_v12  ;;  %v9391_v13 = vld [vmem:[#allocation59_spill] sm:$0xff] }
 0x555   :  { %v3891_v21 = vmul.f32 %v3878_v53, %v9226_v36  ;;  %v3894_v29 = vmul.f32 %v3866_v59, %v9227_v35  ;;  %3996 = vmatpush1.bf16.msra.mxu0 %v9383_v57  ;;  %v4206_v36 = vmul.f32 %v4186_v33, %v9234_v27  ;;  %v9393_v57 = vld [vmem:[#allocation52_spill] sm:$0xff] }
 0x556   :  { %v4177_v46 = vpop.permute.xlu1 %4176  ;;  %4037 = vmatpush1.bf16.msra.mxu1 %v3972_v34  ;;  %4078 = vmatprep.subr.bf16.mxu0 %v3901_v25 }
 0x557   :  { %v3900_v20 = vpack.c.bf16 %v3891_v21, %v3887_v32  ;;  %v4163_v45 = vpop.permute.xlu0 %4162  ;;  %v3903_v18 = vpack.c.bf16 %v3894_v29, %v3890_v41  ;;  %v4194_v35 = vsel %vm479_vm4, %v4177_v46, %v8363_v63  ;;  %v4182_v43 = vsel %vm479_vm4, %v8371_v6, %v4177_v46 }
 0x558   :  { %v4187_v2 = vsel %vm479_vm4, %v4163_v45, %v8384_v40  ;;  %v4191_v39 = vsel %vm479_vm4, %v8373_v14, %v4163_v45  ;;  %5456 = vmatmul.mubr.msk.bf16.vlgmr.msra.gmra.mxu0 %vm2065_vm10, %v5455_v50  ;;  %v4204_v22 = vmul.f32 %v4194_v35, %v9232_v58  ;;  %v4207_v6 = vmul.f32 %v4182_v43, %v9233_v55 }
 0x559   :  { %v4209_v1 = vmul.f32 %v4191_v39, %v9229_v12  ;;  %v4210_v52 = vmul.f32 %v4187_v2, %v9234_v27  ;;  %5457 = vmatmul.mubr.msk.bf16.vlgmr.msra.gmra.mxu1 %vm2065_vm10, %v5455_v50  ;;  %4079 = vmatpush1.bf16.msra.mxu0 %v3900_v20  ;;  %v9385_v12 = vpack.c.bf16 %v8011_v38, %v8005_v24  ;;  %v9387_v38 = vld [vmem:[#allocation54_spill] sm:$0xff]  ;;  %v9388_v24 = vld [vmem:[#allocation53_spill] sm:$0xff]  ;;  %v9399_v39 = vld [vmem:[#allocation55_spill] sm:$0xff] }
 0x55a   :  { %v4324_v63 = vpop.permute.xlu1 %4323  ;;  %4119 = vmatprep.subr.bf16.mxu1 %v3903_v18  ;;  %4080 = vmatprep.subr.bf16.mxu0 %v9384_v7  ;;  %v9394_v46 = vpack.c.bf16 %v8040_v54, %v9393_v57  ;;  %v9396_v20 = vld [vmem:[#allocation50_spill] sm:$0xff]  ;;  %v9398_v2 = vld [vmem:[#allocation45_spill] sm:$0xff] }
 0x55b   :  { %v4220_v31 = vpack.c.bf16 %v4210_v52, %v4206_v36  ;;  %4120 = vmatpush1.bf16.msra.mxu1 %v3902_v48  ;;  %v4179_v37 = vpop.permute.xlu0 %4178  ;;  %v4219_v61 = vpack.c.bf16 %v4209_v1, %v4205_v30  ;;  %4098 = vmatprep.mubr.bf16.mxu0 %v9386_v26  ;;  %v4353_v56 = vsel %vm676_vm5, %v8382_v60, %v4324_v63  ;;  %v9395_v30 = vld [vmem:[#allocation60_spill] sm:$0xff]  ;;  %v9401_v52 = vld [vmem:[#allocation51_spill] sm:$0xff] }
 0x55c   :  { %4121 = vmatprep.subr.bf16.mxu1 %v9385_v12  ;;  %v4183_v27 = vsel %vm479_vm4, %v8384_v40, %v4179_v37  ;;  %v4195_v17 = vsel %vm479_vm4, %v4179_v37, %v8373_v14  ;;  %v9389_v48 = vpack.c.bf16 %v9387_v38, %v9388_v24  ;;  %v3895_v40 = vld [vmem:[%s8918_s7] sm:$0x3]  ;;  %4139 = vmatprep.mubr.bf16.mxu1 %v9386_v26 }
 0x55d   :  { %v4208_v47 = vmul.f32 %v4195_v17, %v9232_v58  ;;  %v4211_v34 = vmul.f32 %v4183_v27, %v9233_v55  ;;  %v4349_v14 = vsel %vm676_vm5, %v4324_v63, %v8388_v62  ;;  %v9390_v58 = vld [vmem:[#allocation44_spill] sm:$0xff]  ;;  %v4368_v19 = vmul.f32 %v4353_v56, %v9316_v49  ;;  %v9407_v27 = vld [vmem:[#allocation46_spill] sm:$0xff] }
 0x55e   :  { %4081 = vmatpush1.bf16.msra.mxu0 %v9389_v48  ;;  %v4340_v23 = vpop.permute.xlu1 %4339  ;;  %v9392_v55 = vpack.c.bf16 %v9390_v58, %v9391_v13  ;;  %v4369_v41 = vmul.f32 %v4349_v14, %v9318_v5  ;;  %v9397_v45 = vpack.c.bf16 %v9395_v30, %v9396_v20  ;;  %v9400_v43 = vpack.c.bf16 %v9398_v2, %v9399_v39  ;;  %v9402_v63 = vld [vmem:[#allocation56_spill] sm:$0xff]  ;;  %v9408_v17 = vld [vmem:[#allocation58_spill] sm:$0xff]  ;;  %v9417_v14 = vld [vmem:[#allocation61_spill] sm:$0xff] }
 0x55f   :  { %4237 = vmatprep.subr.bf16.mxu0 %v4219_v61  ;;  %v4218_v15 = vpack.c.bf16 %v4208_v47, %v4204_v22  ;;  %v4326_v25 = vpop.permute.xlu0 %4325  ;;  %v4221_v32 = vpack.c.bf16 %v4211_v34, %v4207_v6  ;;  %v4345_v16 = vsel %vm676_vm5, %v8388_v62, %v4340_v23  ;;  %v4357_v44 = vsel %vm676_vm5, %v4340_v23, %v8382_v60  ;;  %v5463_v47 = vld [vmem:[%s8918_s7 + $0x6] sm:$0x3]  ;;  %v9410_v34 = vld [vmem:[#allocation86_spill] sm:$0xff]  ;;  %v9418_v58 = vld [vmem:[#allocation63_spill] sm:$0xff] }
 0x560   :  { %4122 = vmatpush1.bf16.msra.mxu1 %v9392_v55  ;;  %v4350_v59 = vsel %vm676_vm5, %v4326_v25, %v8394_v9  ;;  %v4354_v53 = vsel %vm676_vm5, %v8390_v42, %v4326_v25  ;;  %v4367_v54 = vmul.f32 %v4357_v44, %v9321_v11  ;;  %v4370_v18 = vmul.f32 %v4345_v16, %v9323_v8  ;;  %v9419_v13 = vld [vmem:[#allocation47_spill] sm:$0xff]  ;;  %v9420_v25 = vld [vmem:[#allocation89_spill] sm:$0xff]  ;;  %v9427_v20 = vld [vmem:[#allocation38_spill] sm:$0xff] }
 0x561   :  { %5458 = vmatmul.mubr.msk.bf16.vlgmr.msra.gmra.mxu0 %vm2065_vm10, %v3895_v40  ;;  %v4372_v33 = vmul.f32 %v4354_v53, %v9316_v49  ;;  %v4373_v21 = vmul.f32 %v4350_v59, %v9318_v5  ;;  %4278 = vmatprep.subr.bf16.mxu1 %v4221_v32  ;;  %v9403_v7 = vpack.c.bf16 %v9401_v52, %v9402_v63  ;;  %v9422_v53 = vld [vmem:[#allocation17_spill] sm:$0xff]  ;;  %v9425_v44 = vld [vmem:[#allocation23_spill] sm:$0xff]  ;;  %v9432_v52 = vld [vmem:[#allocation22_spill] sm:$0xff] }
 0x562   :  { %4238 = vmatpush1.bf16.msra.mxu0 %v4218_v15  ;;  %v8585_v29 = vpop.permute.xlu1 %5070  ;;  %4257 = vmatprep.mubr.bf16.mxu0 %v9386_v26  ;;  %v9406_v6 = vpack.c.bf16 %v8139_v10, %v8133_v3  ;;  %v4481_v12 = vpack.c.bf16 %v7683_v4, %v7659_v28  ;;  %v9409_v56 = vpack.c.bf16 %v9407_v27, %v9408_v17  ;;  %v9411_v10 = vld [vmem:[#allocation16_spill] sm:$0xff]  ;;  %v9412_v3 = vld [vmem:[#allocation42_spill] sm:$0xff]  ;;  %v9413_v28 = vld [vmem:[#allocation43_spill] sm:$0xff] }
 0x563   :  { %5459 = vmatmul.mubr.msk.bf16.vlgmr.msra.gmra.mxu1 %vm2065_vm10, %v3895_v40  ;;  %4239 = vmatprep.subr.bf16.mxu0 %v9394_v46  ;;  %v4383_v49 = vpack.c.bf16 %v4373_v21, %v4369_v41  ;;  %v4342_v5 = vpop.permute.xlu0 %4341  ;;  %v4382_v50 = vpack.c.bf16 %v4372_v33, %v4368_v19  ;;  %v4483_v24 = vpack.c.bf16 %v9412_v3, %v9411_v10  ;;  %v9414_v4 = vld [vmem:[#allocation64_spill] sm:$0xff]  ;;  %v9416_v40 = vld [vmem:[#allocation15_spill] sm:$0xff]  ;;  %v9423_v41 = vld [vmem:[#allocation57_spill] sm:$0xff] }
 0x564   :  { %4279 = vmatpush1.bf16.msra.mxu1 %v4220_v31  ;;  %v4346_v62 = vsel %vm676_vm5, %v8394_v9, %v4342_v5  ;;  %v4358_v60 = vsel %vm676_vm5, %v4342_v5, %v8390_v42  ;;  %4298 = vmatprep.mubr.bf16.mxu1 %v9386_v26  ;;  %v5460_v9 = vld [vmem:[%s8918_s7 + $0x4] sm:$0x3]  ;;  %v9404_v31 = vld [vmem:[#allocation66_spill] sm:$0xff]  ;;  %v9415_v48 = vpack.c.bf16 %v9413_v28, %v9414_v4  ;;  %v9421_v19 = vld [vmem:[#allocation87_spill] sm:$0xff] }
 0x565   :  { %4280 = vmatprep.subr.bf16.mxu1 %v9397_v45  ;;  %v4371_v36 = vmul.f32 %v4358_v60, %v9321_v11  ;;  %v4374_v35 = vmul.f32 %v4346_v62, %v9323_v8  ;;  %v9405_v37 = vpack.c.bf16 %v8104_v0, %v9404_v31  ;;  %v4480_v15 = vpack.c.bf16 %v9417_v14, %v9416_v40  ;;  %v9424_v21 = vld [vmem:[#allocation85_spill] sm:$0xff]  ;;  %v9428_v62 = vld [vmem:[#allocation24_spill] sm:$0xff]  ;;  %v9434_v31 = vld [vmem:[#allocation10_spill] sm:$0xff] }
 0x566   :  { %4240 = vmatpush1.bf16.msra.mxu0 %v9400_v43  ;;  %v4586_v1 = vpop.permute.xlu1 %4585  ;;  %v4477_v55 = vpack.c.bf16 %v9419_v13, %v9418_v58  ;;  %v4482_v33 = vpack.c.bf16 %v9423_v41, %v9422_v53  ;;  %v9426_v30 = vld [vmem:[#allocation13_spill] sm:$0xff]  ;;  %v9436_v27 = vld [vmem:[#allocation90_spill] sm:$0xff]  ;;  %v9437_v10 = vld [vmem:[#allocation88_spill] sm:$0xff] }
 0x567   :  { %4400 = vmatprep.subr.bf16.mxu0 %v4382_v50  ;;  %v4381_v42 = vpack.c.bf16 %v4371_v36, %v4367_v54  ;;  %v8621_v22 = vpop.permute.xlu0 %5072  ;;  %v4384_v11 = vpack.c.bf16 %v4374_v35, %v4370_v18  ;;  %v4611_v38 = vsel %vm1032_vm6, %v4586_v1, %v9410_v34  ;;  %v4615_v16 = vsel %vm1032_vm6, %v9424_v21, %v4586_v1  ;;  %v9429_v18 = vld [vmem:[#allocation11_spill] sm:$0xff]  ;;  %v9430_v36 = vld [vmem:[#allocation14_spill] sm:$0xff]  ;;  %v9441_v13 = vld [vmem:[#allocation5_spill] sm:$0xff] }
 0x568   :  { %4281 = vmatpush1.bf16.msra.mxu1 %v9403_v7  ;;  %v4630_v57 = vmul.f32 %v4611_v38, %v9425_v44  ;;  %v4479_v45 = vpack.c.bf16 %v9427_v20, %v9426_v30  ;;  %v4478_v35 = vpack.c.bf16 %v9430_v36, %v9429_v18  ;;  %v4629_v39 = vmul.f32 %v4615_v16, %v9428_v62  ;;  %v9439_v4 = vld [vmem:[#allocation91_spill] sm:$0xff]  ;;  %v5469_v18 = vld [vmem:[%s8918_s7 + $0xa] sm:$0x3] }
 0x569   :  { %5461 = vmatmul.mubr.msk.bf16.vlgmr.msra.gmra.mxu0 %vm2065_vm10, %v5460_v9  ;;  %4441 = vmatprep.subr.bf16.mxu1 %v4384_v11  ;;  %v9446_v16 = vld [vmem:[#allocation19_spill] sm:$0xff]  ;;  %v9453_v36 = vld [vmem:[#allocation94_spill] sm:$0xff] }
 0x56a   :  { %4401 = vmatpush1.bf16.msra.mxu0 %v4381_v42  ;;  %v4602_v8 = vpop.permute.xlu1 %4601  ;;  %4420 = vmatprep.mubr.bf16.mxu0 %v9386_v26 }
 0x56b   :  { %5462 = vmatmul.mubr.msk.bf16.vlgmr.msra.gmra.mxu1 %vm2065_vm10, %v5460_v9  ;;  %4402 = vmatprep.subr.bf16.mxu0 %v9405_v37  ;;  %v8628_v61 = vpop.permute.xlu0 %5080  ;;  %v4607_v5 = vsel %vm1032_vm6, %v9410_v34, %v4602_v8  ;;  %v4619_v50 = vsel %vm1032_vm6, %v4602_v8, %v9424_v21  ;;  %v9431_v9 = vld [vmem:[#allocation25_spill] sm:$0xff]  ;;  %v9433_v8 = vld [vmem:[#allocation12_spill] sm:$0xff] }
 0x56c   :  { %4442 = vmatpush1.bf16.msra.mxu1 %v4383_v49  ;;  %4461 = vmatprep.mubr.bf16.mxu1 %v9386_v26  ;;  %v4631_v42 = vmul.f32 %v4607_v5, %v9431_v9  ;;  %v4632_v63 = vmul.f32 %v4619_v50, %v9432_v52  ;;  %v9435_v37 = vpack.c.bf16 %v9433_v8, %v9434_v31  ;;  %v9449_v5 = vld [vmem:[#allocation26_spill] sm:$0xff]  ;;  %v9459_v31 = vld [vmem:[#allocation95_spill] sm:$0xff] }
 0x56d   :  { %4443 = vmatprep.subr.bf16.mxu1 %v9406_v6 }
 0x56e   :  { %4403 = vmatpush1.bf16.msra.mxu0 %v9409_v56  ;;  %v4749_v0 = vpop.permute.xlu1 %4748 }
 0x56f   :  { %4499 = vmatprep.subr.bf16.mxu0 %v4481_v12  ;;  %v4588_v23 = vpop.permute.xlu0 %4587  ;;  %v5466_v12 = vld [vmem:[%s8918_s7 + $0x8] sm:$0x3]  ;;  %v4774_v17 = vsel %vm1229_vm7, %v4749_v0, %v9436_v27  ;;  %v4778_v3 = vsel %vm1229_vm7, %v9437_v10, %v4749_v0 }
 0x570   :  { %4444 = vmatpush1.bf16.msra.mxu1 %v9415_v48  ;;  %v4612_v32 = vsel %vm1032_vm6, %v4588_v23, %v9420_v25  ;;  %v4616_v59 = vsel %vm1032_vm6, %v9421_v19, %v4588_v23  ;;  %v9440_v23 = vld [vmem:[#allocation27_spill] sm:$0xff] }
 0x571   :  { %4540 = vmatprep.subr.bf16.mxu1 %v4483_v24  ;;  %5464 = vmatmul.mubr.msk.bf16.vlgmr.msra.gmra.mxu0 %vm2065_vm10, %v5463_v47  ;;  %v4634_v46 = vmul.f32 %v4612_v32, %v9425_v44  ;;  %v4633_v60 = vmul.f32 %v4616_v59, %v9428_v62  ;;  %v9438_v24 = vld [vmem:[#allocation93_spill] sm:$0xff]  ;;  %v4793_v40 = vmul.f32 %v4774_v17, %v9440_v23  ;;  %v9444_v32 = vld [vmem:[#allocation28_spill] sm:$0xff] }
 0x572   :  { %4500 = vmatpush1.bf16.msra.mxu0 %v4480_v15  ;;  %v4765_v49 = vpop.permute.xlu1 %4764  ;;  %4519 = vmatprep.mubr.bf16.mxu0 %v9386_v26  ;;  %v9447_v44 = vld [vmem:[#allocation20_spill] sm:$0xff] }
 0x573   :  { %5465 = vmatmul.mubr.msk.bf16.vlgmr.msra.gmra.mxu1 %vm2065_vm10, %v5463_v47  ;;  %4501 = vmatprep.subr.bf16.mxu0 %v4477_v55  ;;  %v4604_v54 = vpop.permute.xlu0 %4603  ;;  %v4644_v2 = vpack.c.bf16 %v4634_v46, %v4630_v57  ;;  %v4643_v56 = vpack.c.bf16 %v4633_v60, %v4629_v39  ;;  %v4770_v14 = vsel %vm1229_vm7, %v9436_v27, %v4765_v49  ;;  %v9442_v55 = vld [vmem:[#allocation67_spill] sm:$0xff]  ;;  %v9451_v62 = vld [vmem:[#allocation68_spill] sm:$0xff] }
 0x574   :  { %4541 = vmatpush1.bf16.msra.mxu1 %v4482_v33  ;;  %v4608_v43 = vsel %vm1032_vm6, %v9420_v25, %v4604_v54  ;;  %v4620_v1 = vsel %vm1032_vm6, %v4604_v54, %v9421_v19  ;;  %4560 = vmatprep.mubr.bf16.mxu1 %v9386_v26  ;;  %v4782_v58 = vsel %vm1229_vm7, %v4765_v49, %v9437_v10  ;;  %v9445_v33 = vld [vmem:[#allocation29_spill] sm:$0xff] }
 0x575   :  { %4542 = vmatprep.subr.bf16.mxu1 %v4479_v45  ;;  %v4635_v7 = vmul.f32 %v4608_v43, %v9431_v9  ;;  %v4636_v11 = vmul.f32 %v4620_v1, %v9432_v52  ;;  %v9443_v25 = vpack.c.bf16 %v9441_v13, %v9442_v55  ;;  %v4792_v19 = vmul.f32 %v4778_v3, %v9444_v32  ;;  %v9450_v45 = vld [vmem:[#allocation41_spill] sm:$0xff]  ;;  %v9455_v1 = vld [vmem:[#allocation18_spill] sm:$0xff]  ;;  %v9464_v3 = vld [vmem:[#allocation32_spill] sm:$0xff] }
 0x576   :  { %4502 = vmatpush1.bf16.msra.mxu0 %v9435_v37  ;;  %v4912_v6 = vpop.permute.xlu1 %4911  ;;  %v4794_v21 = vmul.f32 %v4770_v14, %v9445_v33  ;;  %v9448_v57 = vpack.c.bf16 %v9446_v16, %v9447_v44  ;;  %v4795_v50 = vmul.f32 %v4782_v58, %v9449_v5  ;;  %v9452_v60 = vpack.c.bf16 %v9450_v45, %v9451_v62  ;;  %v9454_v43 = vld [vmem:[#allocation21_spill] sm:$0xff]  ;;  %v9466_v14 = vld [vmem:[#allocation76_spill] sm:$0xff]  ;;  %v9469_v55 = vld [vmem:[#allocation30_spill] sm:$0xff] }
 0x577   :  { %4662 = vmatprep.subr.bf16.mxu0 %v4644_v2  ;;  %v4645_v47 = vpack.c.bf16 %v4635_v7, %v4631_v42  ;;  %v4751_v34 = vpop.permute.xlu0 %4750  ;;  %v4646_v38 = vpack.c.bf16 %v4636_v11, %v4632_v63  ;;  %v9456_v9 = vpack.c.bf16 %v9454_v43, %v9455_v1  ;;  %v9457_v63 = vld [vmem:[#allocation92_spill] sm:$0xff]  ;;  %v9458_v11 = vld [vmem:[#allocation97_spill] sm:$0xff]  ;;  %v9481_v1 = vld [vmem:[#allocation35_spill] sm:$0xff] }
 0x578   :  { %4543 = vmatpush1.bf16.msra.mxu1 %v4478_v35  ;;  %v4775_v28 = vsel %vm1229_vm7, %v4751_v34, %v9438_v24  ;;  %v4779_v48 = vsel %vm1229_vm7, %v9439_v4, %v4751_v34  ;;  %v4937_v35 = vsel %vm1426_vm8, %v4912_v6, %v9453_v36  ;;  %v4941_v7 = vsel %vm1426_vm8, %v9457_v63, %v4912_v6  ;;  %v9461_v34 = vld [vmem:[#allocation72_spill] sm:$0xff]  ;;  %v9477_v45 = vld [vmem:[#allocation73_spill] sm:$0xff] }
 0x579   :  { %5467 = vmatmul.mubr.msk.bf16.vlgmr.msra.gmra.mxu0 %vm2065_vm10, %v5466_v12  ;;  %v4797_v15 = vmul.f32 %v4775_v28, %v9440_v23  ;;  %4703 = vmatprep.subr.bf16.mxu1 %v4646_v38  ;;  %v4796_v59 = vmul.f32 %v4779_v48, %v9444_v32  ;;  %v9462_v38 = vld [vmem:[#allocation70_spill] sm:$0xff]  ;;  %v9465_v23 = vld [vmem:[#allocation33_spill] sm:$0xff]  ;;  %v9473_v16 = vld [vmem:[#allocation40_spill] sm:$0xff] }
 0x57a   :  { %4663 = vmatpush1.bf16.msra.mxu0 %v4643_v56  ;;  %v4928_v0 = vpop.permute.xlu1 %4927  ;;  %4682 = vmatprep.mubr.bf16.mxu0 %v9386_v26  ;;  %v9463_v10 = vpack.c.bf16 %v9461_v34, %v9462_v38  ;;  %v5102_v44 = vsel %vm1623_vm9, %v9473_v16, %v8585_v29 }
 0x57b   :  { %5468 = vmatmul.mubr.msk.bf16.vlgmr.msra.gmra.mxu1 %vm2065_vm10, %v5466_v12  ;;  %4664 = vmatprep.subr.bf16.mxu0 %v9443_v25  ;;  %v4767_v53 = vpop.permute.xlu0 %4766  ;;  %v4807_v41 = vpack.c.bf16 %v4797_v15, %v4793_v40  ;;  %v4806_v2 = vpack.c.bf16 %v4796_v59, %v4792_v19  ;;  %v9460_v12 = vld [vmem:[#allocation31_spill] sm:$0xff]  ;;  %v4933_v17 = vsel %vm1426_vm8, %v9453_v36, %v4928_v0  ;;  %v9467_v15 = vld [vmem:[#allocation74_spill] sm:$0xff] }
 0x57c   :  { %4704 = vmatpush1.bf16.msra.mxu1 %v4645_v47  ;;  %v4771_v46 = vsel %vm1229_vm7, %v9438_v24, %v4767_v53  ;;  %v4783_v49 = vsel %vm1229_vm7, %v4767_v53, %v9439_v4  ;;  %4723 = vmatprep.mubr.bf16.mxu1 %v9386_v26  ;;  %v4956_v27 = vmul.f32 %v4937_v35, %v9460_v12  ;;  %v9470_v59 = vld [vmem:[#allocation71_spill] sm:$0xff]  ;;  %v9471_v53 = vld [vmem:[#allocation69_spill] sm:$0xff] }
 0x57d   :  { %4705 = vmatprep.subr.bf16.mxu1 %v9448_v57  ;;  %v4798_v30 = vmul.f32 %v4771_v46, %v9445_v33  ;;  %v4799_v20 = vmul.f32 %v4783_v49, %v9449_v5  ;;  %v4945_v47 = vsel %vm1426_vm8, %v4928_v0, %v9457_v63  ;;  %v4955_v24 = vmul.f32 %v4941_v7, %v9464_v3  ;;  %v9474_v57 = vld [vmem:[#allocation98_spill] sm:$0xff]  ;;  %v9475_v49 = vld [vmem:[#allocation96_spill] sm:$0xff]  ;;  %v9482_v63 = vld [vmem:[#allocation49_spill] sm:$0xff] }
 0x57e   :  { %4665 = vmatpush1.bf16.msra.mxu0 %v9452_v60  ;;  %v5075_v54 = vpop.permute.xlu1 %5074  ;;  %v4957_v40 = vmul.f32 %v4933_v17, %v9465_v23  ;;  %v9468_v58 = vpack.c.bf16 %v9466_v14, %v9467_v15  ;;  %v4958_v25 = vmul.f32 %v4945_v47, %v9469_v55  ;;  %v5103_v7 = vsel %vm1623_vm9, %v9482_v63, %v8621_v22  ;;  %v9487_v17 = vld [vmem:[#allocation37_spill] sm:$0xff]  ;;  %v9492_v15 = vld [vmem:[#allocation79_spill] sm:$0xff] }
 0x57f   :  { %4825 = vmatprep.subr.bf16.mxu0 %v4807_v41  ;;  %v4808_v39 = vpack.c.bf16 %v4798_v30, %v4794_v21  ;;  %v4914_v42 = vpop.permute.xlu0 %4913  ;;  %v4809_v52 = vpack.c.bf16 %v4799_v20, %v4795_v50  ;;  %v9472_v41 = vpack.c.bf16 %v9470_v59, %v9471_v53  ;;  %v5472_v21 = vld [vmem:[%s8918_s7 + $0xc] sm:$0x3]  ;;  %v5100_v46 = vsel %vm1623_vm9, %v5075_v54, %v9474_v57  ;;  %v9476_v20 = vld [vmem:[#allocation75_spill] sm:$0xff] }
 0x580   :  { %4706 = vmatpush1.bf16.msra.mxu1 %v9456_v9  ;;  %v4938_v8 = vsel %vm1426_vm8, %v4914_v42, %v9458_v11  ;;  %v4942_v37 = vsel %vm1426_vm8, %v9459_v31, %v4914_v42  ;;  %v5104_v5 = vsel %vm1623_vm9, %v9475_v49, %v5075_v54  ;;  %v9478_v62 = vpack.c.bf16 %v9476_v20, %v9477_v45 }
 0x581   :  { %5470 = vmatmul.mubr.msk.bf16.vlgmr.msra.gmra.mxu0 %vm2065_vm10, %v5469_v18  ;;  %v4960_v56 = vmul.f32 %v4938_v8, %v9460_v12  ;;  %4866 = vmatprep.subr.bf16.mxu1 %v4809_v52  ;;  %v4959_v28 = vmul.f32 %v4942_v37, %v9464_v3  ;;  %v5119_v9 = vmul.f32 %v5100_v46, %v9481_v1  ;;  %v9483_v8 = vld [vmem:[#allocation36_spill] sm:$0xff] }
 0x582   :  { %4826 = vmatpush1.bf16.msra.mxu0 %v4806_v2  ;;  %v5091_v6 = vpop.permute.xlu1 %5090  ;;  %4845 = vmatprep.mubr.bf16.mxu0 %v9386_v26  ;;  %v9479_v2 = vld [vmem:[#allocation100_spill] sm:$0xff] }
 0x583   :  { %5471 = vmatmul.mubr.msk.bf16.vlgmr.msra.gmra.mxu1 %vm2065_vm10, %v5469_v18  ;;  %4827 = vmatprep.subr.bf16.mxu0 %v9463_v10  ;;  %v4930_v4 = vpop.permute.xlu0 %4929  ;;  %v4970_v48 = vpack.c.bf16 %v4960_v56, %v4956_v27  ;;  %v4969_v50 = vpack.c.bf16 %v4959_v28, %v4955_v24  ;;  %v5096_v36 = vsel %vm1623_vm9, %v9474_v57, %v5091_v6  ;;  %v9484_v37 = vld [vmem:[#allocation80_spill] sm:$0xff]  ;;  %v9490_v24 = vld [vmem:[#allocation82_spill] sm:$0xff] }
 0x584   :  { %4867 = vmatpush1.bf16.msra.mxu1 %v4808_v39  ;;  %v4934_v0 = vsel %vm1426_vm8, %v9458_v11, %v4930_v4  ;;  %v4946_v13 = vsel %vm1426_vm8, %v4930_v4, %v9459_v31  ;;  %4886 = vmatprep.mubr.bf16.mxu1 %v9386_v26  ;;  %v5108_v35 = vsel %vm1623_vm9, %v5091_v6, %v9475_v49  ;;  %v9480_v39 = vld [vmem:[#allocation99_spill] sm:$0xff]  ;;  %v9488_v6 = vld [vmem:[#allocation34_spill] sm:$0xff]  ;;  %v9489_v3 = vld [vmem:[#allocation84_spill] sm:$0xff] }
 0x585   :  { %4868 = vmatprep.subr.bf16.mxu1 %v9468_v58  ;;  %v4961_v32 = vmul.f32 %v4934_v0, %v9465_v23  ;;  %v4962_v19 = vmul.f32 %v4946_v13, %v9469_v55  ;;  %v5099_v11 = vsel %vm1623_vm9, %v8621_v22, %v8628_v61  ;;  %v5118_v31 = vmul.f32 %v5104_v5, %v9483_v8  ;;  %v9493_v58 = vld [vmem:[#allocation77_spill] sm:$0xff]  ;;  %v5475_v13 = vld [vmem:[%s8918_s7 + $0xe] sm:$0x3] }
 0x586   :  { %4828 = vmatpush1.bf16.msra.mxu0 %v9472_v41  ;;  %v5079_v33 = vpop.permute.xlu1 %5078  ;;  %v5120_v56 = vmul.f32 %v5096_v36, %v9487_v17  ;;  %v5121_v47 = vmul.f32 %v5108_v35, %v9488_v6  ;;  %v9491_v28 = vpack.c.bf16 %v9489_v3, %v9490_v24  ;;  %v9494_v0 = vpack.c.bf16 %v9492_v15, %v9493_v58  ;;  %v9495_v41 = vld [vmem:[#allocation83_spill] sm:$0xff] }
 0x587   :  { %4988 = vmatprep.subr.bf16.mxu0 %v4970_v48  ;;  %v4971_v30 = vpack.c.bf16 %v4961_v32, %v4957_v40  ;;  %v5077_v60 = vpop.permute.xlu0 %5076  ;;  %v4972_v18 = vpack.c.bf16 %v4962_v19, %v4958_v25  ;;  %v5098_v42 = vsel %vm1623_vm9, %v8585_v29, %v5079_v33  ;;  %v9485_v29 = vld [vmem:[#allocation78_spill] sm:$0xff]  ;;  %v5110_v55 = vmul.f32 %v5102_v44, %v9483_v8 }
 0x588   :  { %4869 = vmatpush1.bf16.msra.mxu1 %v9478_v62  ;;  %v5101_v54 = vsel %vm1623_vm9, %v5077_v60, %v9479_v2  ;;  %v5105_v43 = vsel %vm1623_vm9, %v9480_v39, %v5077_v60  ;;  %v9486_v12 = vpack.c.bf16 %v9484_v37, %v9485_v29  ;;  %v5111_v22 = vmul.f32 %v5098_v42, %v9481_v1 }
 0x589   :  { %5473 = vmatmul.mubr.msk.bf16.vlgmr.msra.gmra.mxu0 %vm2065_vm10, %v5472_v21  ;;  %v5123_v52 = vmul.f32 %v5101_v54, %v9481_v1  ;;  %5029 = vmatprep.subr.bf16.mxu1 %v4972_v18  ;;  %v5122_v34 = vmul.f32 %v5105_v43, %v9483_v8  ;;  %v5115_v25 = vmul.f32 %v5099_v11, %v9481_v1 }
 0x58a   :  { %4989 = vmatpush1.bf16.msra.mxu0 %v4969_v50  ;;  %v5087_v27 = vpop.permute.xlu1 %5086  ;;  %5008 = vmatprep.mubr.bf16.mxu0 %v9386_v26  ;;  %v5114_v19 = vmul.f32 %v5103_v7, %v9483_v8 }
 0x58b   :  { %5474 = vmatmul.mubr.msk.bf16.vlgmr.msra.gmra.mxu1 %vm2065_vm10, %v5472_v21  ;;  %4990 = vmatprep.subr.bf16.mxu0 %v9486_v12  ;;  %v5093_v38 = vpop.permute.xlu0 %5092  ;;  %v5133_v10 = vpack.c.bf16 %v5123_v52, %v5119_v9  ;;  %v5094_v23 = vsel %vm1623_vm9, %v5079_v33, %v5087_v27  ;;  %v5106_v32 = vsel %vm1623_vm9, %v5087_v27, %v9473_v16  ;;  %v9496_v33 = vld [vmem:[#allocation81_spill] sm:$0xff] }
 0x58c   :  { %5030 = vmatpush1.bf16.msra.mxu1 %v4971_v30  ;;  %v5097_v4 = vsel %vm1623_vm9, %v9479_v2, %v5093_v38  ;;  %v5109_v48 = vsel %vm1623_vm9, %v5093_v38, %v9480_v39  ;;  %5049 = vmatprep.mubr.bf16.mxu1 %v9386_v26  ;;  %v5132_v59 = vpack.c.bf16 %v5122_v34, %v5118_v31 }
 0x58d   :  { %5031 = vmatprep.subr.bf16.mxu1 %v9491_v28  ;;  %v5124_v40 = vmul.f32 %v5097_v4, %v9487_v17  ;;  %v5125_v14 = vmul.f32 %v5109_v48, %v9488_v6  ;;  %v9497_v21 = vpack.c.bf16 %v9495_v41, %v9496_v33  ;;  %v5112_v49 = vmul.f32 %v5094_v23, %v9487_v17 }
 0x58e   :  { %4991 = vmatpush1.bf16.msra.mxu0 %v9494_v0  ;;  %v5129_v5 = vpack.c.bf16 %v5115_v25, %v5111_v22  ;;  %v5113_v50 = vmul.f32 %v5106_v32, %v9488_v6  ;;  %v5128_v45 = vpack.c.bf16 %v5114_v19, %v5110_v55 }
 0x58f   :  { %5151 = vmatprep.subr.bf16.mxu0 %v5133_v10  ;;  %v5134_v53 = vpack.c.bf16 %v5124_v40, %v5120_v56  ;;  %v5089_v57 = vpop.permute.xlu0 %5088  ;;  %v5135_v46 = vpack.c.bf16 %v5125_v14, %v5121_v47 }
 0x590   :  { %5032 = vmatpush1.bf16.msra.mxu1 %v9497_v21  ;;  %v5095_v44 = vsel %vm1623_vm9, %v8628_v61, %v5089_v57  ;;  %v5107_v16 = vsel %vm1623_vm9, %v5089_v57, %v9482_v63 }
 0x591   :  { %5476 = vmatmul.mubr.msk.bf16.vlgmr.msra.gmra.mxu0 %vm2065_vm10, %v5475_v13  ;;  %v5116_v30 = vmul.f32 %v5095_v44, %v9487_v17  ;;  %v5117_v20 = vmul.f32 %v5107_v16, %v9488_v6  ;;  %5192 = vmatprep.subr.bf16.mxu1 %v5135_v46 }
 0x592   :  { %5152 = vmatpush1.bf16.msra.mxu0 %v5132_v59  ;;  %5171 = vmatprep.mubr.bf16.mxu0 %v9386_v26 }
 0x593   :  { %5477 = vmatmul.mubr.msk.bf16.vlgmr.msra.gmra.mxu1 %vm2065_vm10, %v5475_v13  ;;  %5153 = vmatprep.subr.bf16.mxu0 %v5129_v5  ;;  %v5130_v61 = vpack.c.bf16 %v5116_v30, %v5112_v49  ;;  %v5131_v62 = vpack.c.bf16 %v5117_v20, %v5113_v50 }
 0x594   :  { %5193 = vmatpush1.bf16.msra.mxu1 %v5134_v53  ;;  %5212 = vmatprep.mubr.bf16.mxu1 %v9386_v26 }
 0x595   :  { %5194 = vmatprep.subr.bf16.mxu1 %v5131_v62 }
 0x596   :  { %5154 = vmatpush1.bf16.msra.mxu0 %v5128_v45 }
 0x598   :  { %5195 = vmatpush1.bf16.msra.mxu1 %v5130_v61 }
 0x599   :  { %5479 = vmatmul.mubr.msk.bf16.vlgmr.msra.gmra.mxu0 %vm2065_vm10, %v5478_v51 }
 0x59b   :  { %5480 = vmatmul.mubr.msk.bf16.vlgmr.msra.gmra.mxu1 %vm2065_vm10, %v5478_v51 }
 0x618   :  { %v4015_v60 = vpop.f32.mrf.mxu0 }
 0x619   :  { %v4056_v18 = vpop.f32.mrf.mxu1 }
 0x61a   :  { %v4017_v36 = vpop.f32.mrf.mxu0 }
 0x61b   :  { %v4058_v35 = vpop.f32.mrf.mxu1 }
 0x61c   :  { %v4019_v2 = vpop.f32.mrf.mxu0 }
 0x61d   :  { %v4060_v54 = vpop.f32.mrf.mxu1 }
 0x61e   :  { %v4020_v39 = vpop.f32.mrf.mxu0 }
 0x61f   :  { %v4061_v43 = vpop.f32.mrf.mxu1 }
 0x621   :  { %v4100_v26 = vpop.f32.mrf.mxu0 }
 0x622   :  { %v4101_v57 = vadd.f32 %v4100_v26, %v4015_v60 }
 0x623   :  { %v4141_v1 = vpop.f32.mrf.mxu1  ;;  %v4102_v9 = vpop.f32.mrf.mxu0 }
 0x624   :  { %v4142_v44 = vadd.f32 %v4141_v1, %v4056_v18  ;;  %v4103_v16 = vadd.f32 %v4102_v9, %v4017_v36 }
 0x625   :  { %v4143_v42 = vpop.f32.mrf.mxu1  ;;  %v4104_v52 = vpop.f32.mrf.mxu0 }
 0x626   :  { %v4144_v20 = vadd.f32 %v4143_v42, %v4058_v35 }
 0x627   :  { %v4145_v63 = vpop.f32.mrf.mxu1  ;;  %v4105_v7 = vpop.f32.mrf.mxu0 }
 0x629   :  { %v4146_v11 = vpop.f32.mrf.mxu1  ;;  %v4259_v8 = vpop.f32.mrf.mxu0 }
 0x62a   :  { %v4307_v5 = vadd.f32 %v4259_v8, %v4101_v57 }
 0x62b   :  { %v4300_v31 = vpop.f32.mrf.mxu1  ;;  %v4261_v37 = vpop.f32.mrf.mxu0 }
 0x62c   :  { %v4309_v45 = vadd.f32 %v4300_v31, %v4142_v44  ;;  %v4308_v61 = vadd.f32 %v4261_v37, %v4103_v16 }
 0x62d   :  { %v4302_v29 = vpop.f32.mrf.mxu1  ;;  %v4263_v12 = vpop.f32.mrf.mxu0 }
 0x62e   :  { %v4310_v54 = vadd.f32 %v4302_v29, %v4144_v20 }
 0x62f   :  { %v4304_v27 = vpop.f32.mrf.mxu1  ;;  %v4264_v17 = vpop.f32.mrf.mxu0 }
 0x631   :  { %v4305_v56 = vpop.f32.mrf.mxu1  ;;  %v4422_v6 = vpop.f32.mrf.mxu0 }
 0x632   :  { %v4470_v62 = vadd.f32 %v4422_v6, %v4307_v5 }
 0x633   :  { %v4463_v47 = vpop.f32.mrf.mxu1  ;;  %v4424_v34 = vpop.f32.mrf.mxu0 }
 0x634   :  { %v4472_v39 = vadd.f32 %v4463_v47, %v4309_v45  ;;  %v4471_v43 = vadd.f32 %v4424_v34, %v4308_v61 }
 0x635   :  { %v4465_v38 = vpop.f32.mrf.mxu1  ;;  %v4426_v10 = vpop.f32.mrf.mxu0 }
 0x636   :  { %v4473_v60 = vadd.f32 %v4465_v38, %v4310_v54 }
 0x637   :  { %v4467_v22 = vpop.f32.mrf.mxu1  ;;  %v4427_v3 = vpop.f32.mrf.mxu0 }
 0x639   :  { %v4468_v24 = vpop.f32.mrf.mxu1  ;;  %v4521_v28 = vpop.f32.mrf.mxu0 }
 0x63a   :  { %v4569_v52 = vadd.f32 %v4521_v28, %v4470_v62  ;;  %v5229_v24 = vpop.permute.xlu1 %5228 }
 0x63b   :  { %v4562_v4 = vpop.f32.mrf.mxu1  ;;  %v4523_v48 = vpop.f32.mrf.mxu0 }
 0x63c   :  { %v4571_v26 = vadd.f32 %v4562_v4, %v4472_v39  ;;  %v4570_v11 = vadd.f32 %v4523_v48, %v4471_v43 }
 0x63d   :  { %v4564_v23 = vpop.f32.mrf.mxu1  ;;  %v4525_v40 = vpop.f32.mrf.mxu0 }
 0x63e   :  { %v4572_v9 = vadd.f32 %v4564_v23, %v4473_v60 }
 0x63f   :  { %v4566_v14 = vpop.f32.mrf.mxu1  ;;  %v4526_v15 = vpop.f32.mrf.mxu0 }
 0x641   :  { %v4567_v58 = vpop.f32.mrf.mxu1  ;;  %v4684_v0 = vpop.f32.mrf.mxu0 }
 0x642   :  { %v4732_v18 = vadd.f32 %v4684_v0, %v4569_v52  ;;  %v5235_v0 = vld [vmem:[%s8908_s0] sm:$0xff] }
 0x643   :  { %v4725_v13 = vpop.f32.mrf.mxu1  ;;  %v4686_v55 = vpop.f32.mrf.mxu0 }
 0x644   :  { %v4734_v8 = vadd.f32 %v4725_v13, %v4571_v26  ;;  %v4733_v35 = vadd.f32 %v4686_v55, %v4570_v11 }
 0x645   :  { %v4727_v25 = vpop.f32.mrf.mxu1  ;;  %v4688_v32 = vpop.f32.mrf.mxu0 }
 0x646   :  { %v4735_v12 = vadd.f32 %v4727_v25, %v4572_v9 }
 0x647   :  { %v4729_v19 = vpop.f32.mrf.mxu1  ;;  %v4689_v59 = vpop.f32.mrf.mxu0 }
 0x648   :  { %v5481_v59 = vld [vmem:[%s8908_s0 + $0x8] sm:$0xff] }
 0x649   :  { %v4730_v53 = vpop.f32.mrf.mxu1  ;;  %v4847_v41 = vpop.f32.mrf.mxu0 }
 0x64a   :  { %v4895_v42 = vadd.f32 %v4847_v41, %v4732_v18 }
 0x64b   :  { %v4888_v33 = vpop.f32.mrf.mxu1  ;;  %v4849_v21 = vpop.f32.mrf.mxu0 }
 0x64c   :  { %v4897_v27 = vadd.f32 %v4888_v33, %v4734_v8  ;;  %v4896_v29 = vadd.f32 %v4849_v21, %v4733_v35 }
 0x64d   :  { %v4890_v46 = vpop.f32.mrf.mxu1  ;;  %v4851_v49 = vpop.f32.mrf.mxu0 }
 0x64e   :  { %v4898_v47 = vadd.f32 %v4890_v46, %v4735_v12 }
 0x64f   :  { %v4892_v50 = vpop.f32.mrf.mxu1  ;;  %v4852_v30 = vpop.f32.mrf.mxu0 }
 0x651   :  { %v4893_v51 = vpop.f32.mrf.mxu1  ;;  %v5010_v2 = vpop.f32.mrf.mxu0 }
 0x652   :  { %v5058_v17 = vadd.f32 %v5010_v2, %v4895_v42 }
 0x653   :  { %v5051_v63 = vpop.f32.mrf.mxu1  ;;  %v5012_v7 = vpop.f32.mrf.mxu0 }
 0x654   :  { %v5060_v34 = vadd.f32 %v5051_v63, %v4897_v27  ;;  %v5059_v38 = vadd.f32 %v5012_v7, %v4896_v29 }
 0x655   :  { %v5053_v36 = vpop.f32.mrf.mxu1  ;;  %v5014_v1 = vpop.f32.mrf.mxu0 }
 0x656   :  { %v5061_v28 = vadd.f32 %v5053_v36, %v4898_v47 }
 0x657   :  { %v5055_v31 = vpop.f32.mrf.mxu1  ;;  %v5015_v37 = vpop.f32.mrf.mxu0 }
 0x659   :  { %v5056_v56 = vpop.f32.mrf.mxu1  ;;  %v5173_v6 = vpop.f32.mrf.mxu0 }
 0x65a   :  { %v5221_v10 = vadd.f32 %v5173_v6, %v5058_v17 }
 0x65b   :  { %v5214_v22 = vpop.f32.mrf.mxu1  ;;  %v5175_v3 = vpop.f32.mrf.mxu0 }
 0x65c   :  { %v5223_v4 = vadd.f32 %v5214_v22, %v5060_v34  ;;  %v5222_v48 = vadd.f32 %v5175_v3, %v5059_v38  ;;  %v5231_v14 = vadd.f32 %v5229_v24, %v5221_v10 }
 0x65d   :  { %v5216_v23 = vpop.f32.mrf.mxu1  ;;  %v5177_v40 = vpop.f32.mrf.mxu0 }
 0x65e   :  { %v5232_v15 = vadd.f32 %v5229_v24, %v5222_v48  ;;  %v5224_v58 = vadd.f32 %v5216_v23, %v5061_v28  ;;  %v5233_v25 = vadd.f32 %v5229_v24, %v5223_v4 }
 0x65f   :  { %v5218_v13 = vpop.f32.mrf.mxu1  ;;  %v5178_v55 = vpop.f32.mrf.mxu0 }
 0x660   :  { %v5238_v32 = vcombine.low %v5231_v14, %v5232_v15  ;;  %v5234_v19 = vadd.f32 %v5229_v24, %v5224_v58 }
 0x661   :  { %v5219_v53 = vpop.f32.mrf.mxu1 }
 0x662   :  { %v5240_v41 = vadd.f32 %v5238_v32, %v5235_v0  ;;  %v5245_v33 = vcombine.low %v5233_v25, %v5234_v19 }
 0x664   :  { %5241 = vst [vmem:[%s8919_s11] sm:$0xff] %v5240_v41  ;;  %v5247_v21 = vadd.f32 %v5481_v59, %v5245_v33 }
 0x666   :  { %5482 = vst [vmem:[%s8919_s11 + $0x8] sm:$0xff] %v5247_v21 }

</bundles_post_ra>
